<compile_context>
chip_gen: v7x
topology: tpu7x:2x2x1
jax: 0.10.0
libtpu: 0.0.40
codegen_flags: <defaults>
</compile_context>

<pallas_src>
import functools

import jax
import jax.numpy as jnp
from jax import lax
from jax.experimental import pallas as pl
from jax.experimental.pallas import tpu as pltpu

EXPANSION = 4
BN_EPS = 1e-5
COMPUTE_DTYPE = jnp.bfloat16          # MXU input dtype (f32 accumulation)


# ---------------------------------------------------------------------------
# Generation-aware configuration
# ---------------------------------------------------------------------------
@functools.lru_cache(maxsize=1)
def _chip_config():
    """Per-generation VMEM budget / tile targets (queried once, Python-side)."""
    try:
        kind = jax.devices()[0].device_kind.lower()
    except Exception:
        kind = ""
    if "v7" in kind or "7x" in kind:
        # v7x: 64 MiB physical VMEM, 256-wide MXU -> cap scoped VMEM, mid tiles
        return {"vmem": 48 << 20, "mm": 512, "cout": 256}
    if "v6" in kind:
        # v6e: 128 MiB VMEM, 256-wide MXU -> large tiles
        return {"vmem": 96 << 20, "mm": 1024, "cout": 256}
    if "v5" in kind or "v4" in kind:
        # v5e/v4: 128 MiB VMEM, 128-wide MXU
        return {"vmem": 96 << 20, "mm": 1024, "cout": 128}
    # Unknown chip: conservative defaults.
    return {"vmem": 32 << 20, "mm": 512, "cout": 128}


def _tile(dim, target, align):
    """Largest tile <= target that divides `dim` and is a multiple of `align`
    (searches all aligned divisors, not only powers of two); falls back to the
    full dim (always a legal block size)."""
    if dim <= target:
        return dim
    t = (target // align) * align
    while t >= align:
        if dim % t == 0:
            return t
        t -= align
    # TODO(synk): pad/mask tails instead of a full-dim fallback for pathological
    # shapes that have no aligned divisor <= target.
    return dim


# ---------------------------------------------------------------------------
# Kernels
# ---------------------------------------------------------------------------
def _matmul_shift_kernel(x_ref, w_ref, shift_ref, o_ref, acc_ref, *, relu):
    """out = [relu](x @ w + shift); BN scale already folded into w."""
    @pl.when(pl.program_id(2) == 0)
    def _():
        acc_ref[...] = jnp.zeros_like(acc_ref)

    acc_ref[...] += jnp.dot(x_ref[...], w_ref[...],
                            preferred_element_type=jnp.float32)

    @pl.when(pl.program_id(2) == pl.num_programs(2) - 1)
    def _():
        out = acc_ref[...] + shift_ref[...]
        if relu:
            out = jnp.maximum(out, 0.0)
        o_ref[...] = out.astype(o_ref.dtype)


def _conv3_shortcut_fused_kernel(y_ref, w3_ref, x_ref, wsc_ref, shift_ref,
                                 o_ref):
    """out = relu(y @ w3 + x @ wsc + shift), shift = bn3.shift + bn_sc.shift.

    No K grid axis -> accumulate in registers (no VMEM scratch round trips)."""
    acc = jnp.dot(y_ref[...], w3_ref[...], preferred_element_type=jnp.float32)
    acc = acc + jnp.dot(x_ref[...], wsc_ref[...],
                        preferred_element_type=jnp.float32)
    o_ref[...] = jnp.maximum(acc + shift_ref[...], 0.0).astype(o_ref.dtype)


def _conv3_identity_fused_kernel(y_ref, w3_ref, res_ref, shift_ref, o_ref):
    """out = relu(y @ w3 + shift + res)   (identity shortcut path)."""
    acc = jnp.dot(y_ref[...], w3_ref[...], preferred_element_type=jnp.float32)
    acc = acc + shift_ref[...] + res_ref[...].astype(jnp.float32)
    o_ref[...] = jnp.maximum(acc, 0.0).astype(o_ref.dtype)


def _conv3x3_bn_relu_kernel(x_ref, w_ref, shift_ref, o_ref, pad_ref):
    # x_ref   : (1, H, W, Cin)   un-padded image, VMEM-resident across (c, t)
    # w_ref   : (3, 3, Cin, TCout) resident across the inner row-tile loop
    # shift   : (1, TCout)
    # o_ref   : (1, TH, W, TCout)
    # pad_ref : (H+2, W+2, Cin)  zero-padded slab, filled once per image
    th = o_ref.shape[1]
    w_out = o_ref.shape[2]
    tcout = o_ref.shape[3]
    h_in = x_ref.shape[1]
    w_in = x_ref.shape[2]

    # Build the 1-pixel halo in VMEM once per image (first cout-tile, first
    # row-tile).  This replaces the HBM jnp.pad round trip of the previous
    # version: the mid activation is only read once from HBM.
    @pl.when((pl.program_id(1) == 0) & (pl.program_id(2) == 0))
    def _():
        pad_ref[...] = jnp.zeros_like(pad_ref)
        pad_ref[pl.ds(1, h_in), pl.ds(1, w_in), :] = x_ref[0]

    row0 = pl.multiple_of(pl.program_id(2) * th, th)

    # Register accumulation: one output write per tile instead of 9 VMEM
    # read-modify-write passes through a scratch accumulator.
    acc = jnp.zeros((th, w_out, tcout), jnp.float32)
    # TODO(synk): fold the 3 kw taps into one fatter-K (3*Cin) matmul per kh
    # (and/or use pltpu.roll for the W shifts) to improve MXU cadence further.
    for kh in range(3):
        rows = pad_ref[pl.ds(row0 + kh, th), :, :]          # (TH, W+2, Cin)
        for kw in range(3):
            patch = rows[:, kw:kw + w_out, :]               # (TH, W, Cin)
            acc = acc + jnp.dot(patch, w_ref[kh, kw],
                                preferred_element_type=jnp.float32)

    out = jnp.maximum(acc + shift_ref[...], 0.0)
    o_ref[0] = out.astype(o_ref.dtype)


# ---------------------------------------------------------------------------
# Pallas wrappers
# ---------------------------------------------------------------------------
def conv1x1_bn(x, w, shift, *, relu, out_dtype):
    cfg = _chip_config()
    M, K = x.shape
    Cout = w.shape[1]
    tm = _tile(M, cfg["mm"], 16)          # 16-row alignment for bf16 packing
    tn = _tile(Cout, cfg["mm"], 128)
    tk = _tile(K, 512, 128)
    grid = (M // tm, Cout // tn, K // tk)
    return pl.pallas_call(
        functools.partial(_matmul_shift_kernel, relu=relu),
        out_shape=jax.ShapeDtypeStruct((M, Cout), out_dtype),
        grid_spec=pltpu.PrefetchScalarGridSpec(
            num_scalar_prefetch=0,
            grid=grid,
            in_specs=[
                pl.BlockSpec((tm, tk), lambda i, j, k: (i, k)),
                pl.BlockSpec((tk, tn), lambda i, j, k: (k, j)),
                pl.BlockSpec((1, tn), lambda i, j, k: (0, j)),
            ],
            out_specs=pl.BlockSpec((tm, tn), lambda i, j, k: (i, j)),
            scratch_shapes=[pltpu.VMEM((tm, tn), jnp.float32)],
        ),
        compiler_params=pltpu.CompilerParams(
            dimension_semantics=("parallel", "parallel", "arbitrary"),
            vmem_limit_bytes=cfg["vmem"]),
    )(x, w, shift)


def conv1x1_bn_residual_relu(y, w3, shift, x, wsc, *, out_dtype):
    """Fused final stage: conv3(1x1)+bn3 + shortcut(conv1x1+bn or identity)
    + residual add + ReLU, all in one pallas_call."""
    cfg = _chip_config()
    M, Kp = y.shape
    Cout = w3.shape[1]
    tm = _tile(M, cfg["mm"], 16)
    tn = _tile(Cout, cfg["mm"], 128)
    grid = (M // tm, Cout // tn)
    cparams = pltpu.CompilerParams(
        dimension_semantics=("parallel", "parallel"),
        vmem_limit_bytes=cfg["vmem"])

    if wsc is not None:
        Kin = x.shape[1]
        return pl.pallas_call(
            _conv3_shortcut_fused_kernel,
            out_shape=jax.ShapeDtypeStruct((M, Cout), out_dtype),
            grid_spec=pltpu.PrefetchScalarGridSpec(
                num_scalar_prefetch=0,
                grid=grid,
                in_specs=[
                    pl.BlockSpec((tm, Kp), lambda i, j: (i, 0)),
                    pl.BlockSpec((Kp, tn), lambda i, j: (0, j)),
                    pl.BlockSpec((tm, Kin), lambda i, j: (i, 0)),
                    pl.BlockSpec((Kin, tn), lambda i, j: (0, j)),
                    pl.BlockSpec((1, tn), lambda i, j: (0, j)),
                ],
                out_specs=pl.BlockSpec((tm, tn), lambda i, j: (i, j)),
            ),
            compiler_params=cparams,
        )(y, w3, x, wsc, shift)

    # Identity shortcut (in_planes == expansion * planes, stride == 1).
    return pl.pallas_call(
        _conv3_identity_fused_kernel,
        out_shape=jax.ShapeDtypeStruct((M, Cout), out_dtype),
        grid_spec=pltpu.PrefetchScalarGridSpec(
            num_scalar_prefetch=0,
            grid=grid,
            in_specs=[
                pl.BlockSpec((tm, Kp), lambda i, j: (i, 0)),
                pl.BlockSpec((Kp, tn), lambda i, j: (0, j)),
                pl.BlockSpec((tm, tn), lambda i, j: (i, j)),
                pl.BlockSpec((1, tn), lambda i, j: (0, j)),
            ],
            out_specs=pl.BlockSpec((tm, tn), lambda i, j: (i, j)),
        ),
        compiler_params=cparams,
    )(y, w3, x, shift)


def conv3x3_bn_relu(x_nhwc, w_hwio, shift, *, out_dtype):
    cfg = _chip_config()
    N, H, W, Cin = x_nhwc.shape
    Cout = w_hwio.shape[-1]

    tcout = _tile(Cout, cfg["cout"], 128)
    # Keep the live f32 register accumulator (th, W, tcout) in a sane range.
    if tcout > 128 and Cout % (tcout // 2) == 0 and 8 * W * tcout * 4 > (512 << 10):
        tcout //= 2
    if H % 16 == 0 and 16 * W * tcout * 4 <= (256 << 10):
        th = 16                         # bf16-friendly 16-row tiles
    elif H % 8 == 0:
        th = 8
    else:
        th = H

    # Grid order (image, cout-tile, row-tile): the weight/shift tiles (index
    # depends only on c) stay VMEM-resident across the inner row loop, and the
    # un-padded image slab (index depends only on n) stays resident across all
    # inner iterations.
    # TODO(synk): single-buffer the resident image slab (pl.Buffered(1)) to
    # halve its VMEM footprint on v7x.
    return pl.pallas_call(
        _conv3x3_bn_relu_kernel,
        out_shape=jax.ShapeDtypeStruct((N, H, W, Cout), out_dtype),
        grid_spec=pltpu.PrefetchScalarGridSpec(
            num_scalar_prefetch=0,
            grid=(N, Cout // tcout, H // th),
            in_specs=[
                pl.BlockSpec((1, H, W, Cin), lambda n, c, t: (n, 0, 0, 0)),
                pl.BlockSpec((3, 3, Cin, tcout), lambda n, c, t: (0, 0, 0, c)),
                pl.BlockSpec((1, tcout), lambda n, c, t: (0, c)),
            ],
            out_specs=pl.BlockSpec((1, th, W, tcout),
                                   lambda n, c, t: (n, t, 0, c)),
            # Zero-padded halo slab, filled once per image inside the kernel.
            scratch_shapes=[pltpu.VMEM((H + 2, W + 2, Cin), x_nhwc.dtype)],
        ),
        compiler_params=pltpu.CompilerParams(
            # Inner axes must stay on one core: they reuse the per-image
            # padded slab filled at (c == 0, t == 0).
            dimension_semantics=("parallel", "arbitrary", "arbitrary"),
            vmem_limit_bytes=cfg["vmem"]),
    )(x_nhwc, w_hwio, shift)


# ---------------------------------------------------------------------------
# Parameter construction (deterministic, matches nn.Module shapes; BN folded)
# ---------------------------------------------------------------------------
def _fold_bn(gamma, beta, mean, var):
    scale = gamma / jnp.sqrt(var + BN_EPS)
    shift = beta - mean * scale
    return scale, shift


def make_params(key, in_planes, planes):
    out_planes = EXPANSION * planes
    ks = jax.random.split(key, 8)

    def bn(k, c):
        k1, k2, k3, k4 = jax.random.split(k, 4)
        gamma = 1.0 + 0.1 * jax.random.normal(k1, (c,), jnp.float32)
        beta = 0.1 * jax.random.normal(k2, (c,), jnp.float32)
        mean = 0.1 * jax.random.normal(k3, (c,), jnp.float32)
        var = 1.0 + 0.1 * jnp.abs(jax.random.normal(k4, (c,), jnp.float32))
        return _fold_bn(gamma, beta, mean, var)

    w1 = 0.2 * jax.random.normal(ks[0], (in_planes, planes), jnp.float32)
    s1, b1 = bn(ks[1], planes)
    w2 = 0.2 * jax.random.normal(ks[2], (3, 3, planes, planes), jnp.float32)
    s2, b2 = bn(ks[3], planes)
    w3 = 0.2 * jax.random.normal(ks[4], (planes, out_planes), jnp.float32)
    s3, b3 = bn(ks[5], out_planes)

    p = {
        "w1": (w1 * s1[None, :]).astype(COMPUTE_DTYPE), "b1": b1[None, :],
        "w2": (w2 * s2[None, None, None, :]).astype(COMPUTE_DTYPE),
        "b2": b2[None, :],
        "w3": (w3 * s3[None, :]).astype(COMPUTE_DTYPE), "b3": b3[None, :],
    }
    if in_planes != out_planes:  # stride==1: downsample layer exists
        wsc = 0.2 * jax.random.normal(ks[6], (in_planes, out_planes),
                                      jnp.float32)
        ssc, bsc = bn(ks[7], out_planes)
        p["wsc"] = (wsc * ssc[None, :]).astype(COMPUTE_DTYPE)
        p["bsc"] = bsc[None, :]
        p["b3sc"] = p["b3"] + p["bsc"]   # combined shift for the fused kernel
    return p


# ---------------------------------------------------------------------------
# Forward pass (stride=1 path of the PyTorch module, BN in inference mode)
# ---------------------------------------------------------------------------
@jax.jit
def bottleneck_forward(x_nchw, p):
    # TODO(synk): stride != 1 path (strided conv1/conv2 + strided shortcut)
    # not implemented; the module's default stride=1 path is covered.
    N, Cin, H, W = x_nchw.shape
    planes = p["w1"].shape[1]
    out_planes = p["w3"].shape[1]

    x_nhwc = jnp.transpose(x_nchw, (0, 2, 3, 1)).astype(COMPUTE_DTYPE)
    x_flat = x_nhwc.reshape(N * H * W, Cin)

    # conv1 (1x1) + bn1 + relu
    out1 = conv1x1_bn(x_flat, p["w1"], p["b1"], relu=True,
                      out_dtype=COMPUTE_DTYPE)
    out1 = out1.reshape(N, H, W, planes)

    # conv2 (3x3, pad=1) + bn2 + relu   (halo handled in-kernel, no HBM pad)
    out2 = conv3x3_bn_relu(out1, p["w2"], p["b2"], out_dtype=COMPUTE_DTYPE)
    out2_flat = out2.reshape(N * H * W, planes)

    # conv3 (1x1) + bn3 + shortcut (conv1x1+bn or identity) + add + relu, fused
    # (kept in f32 to match the PyTorch module's output dtype; emit bf16 here
    # when chaining blocks to halve the writeback of the 4x-expanded tensor).
    if "wsc" in p:
        out3 = conv1x1_bn_residual_relu(out2_flat, p["w3"], p["b3sc"],
                                        x_flat, p["wsc"],
                                        out_dtype=jnp.float32)
    else:
        out3 = conv1x1_bn_residual_relu(out2_flat, p["w3"], p["b3"],
                                        x_flat, None, out_dtype=jnp.float32)

    out_nhwc = out3.reshape(N, H, W, out_planes)
    return jnp.transpose(out_nhwc, (0, 3, 1, 2))


# ---------------------------------------------------------------------------
# Pure-JAX reference (same bf16-folded weights) for correctness check
# ---------------------------------------------------------------------------
def _ref_forward(x_nchw, p):
    x = jnp.transpose(x_nchw, (0, 2, 3, 1)).astype(COMPUTE_DTYPE)
    dn = ("NHWC", "HWIO", "NHWC")

    def conv1x1(v, w):
        return lax.conv_general_dilated(v, w[None, None], (1, 1), "VALID",
                                        dimension_numbers=dn,
                                        preferred_element_type=jnp.float32)

    def conv3x3(v, w):
        return lax.conv_general_dilated(v, w, (1, 1), [(1, 1), (1, 1)],
                                        dimension_numbers=dn,
                                        preferred_element_type=jnp.float32)

    out = jnp.maximum(conv1x1(x, p["w1"]) + p["b1"], 0.0).astype(COMPUTE_DTYPE)
    out = jnp.maximum(conv3x3(out, p["w2"]) + p["b2"], 0.0).astype(COMPUTE_DTYPE)
    out = conv1x1(out, p["w3"]) + p["b3"]
    if "wsc" in p:
        sc = conv1x1(x, p["wsc"]) + p["bsc"]
    else:
        sc = x.astype(jnp.float32)
    out = jnp.maximum(out + sc, 0.0)
    return jnp.transpose(out, (0, 3, 1, 2))


# ---------------------------------------------------------------------------
if __name__ == "__main__":
    key = jax.random.PRNGKey(0)
    kx1, kp1, kx2, kp2 = jax.random.split(key, 4)

    N, H, W, planes = 2, 16, 16, 4

    # 1) Projection-shortcut path (in_planes != expansion * planes).
    in_planes = 4
    x1 = jax.random.normal(kx1, (N, in_planes, H, W), jnp.float32)
    p1 = make_params(kp1, in_planes, planes)
    out1 = jax.block_until_ready(bottleneck_forward(x1, p1))
    ref1 = jax.block_until_ready(_ref_forward(x1, p1))
    assert out1.shape == (N, EXPANSION * planes, H, W), out1.shape
    assert jnp.allclose(out1, ref1, atol=1e-2, rtol=1e-2), float(
        jnp.max(jnp.abs(out1 - ref1)))

    # 2) Identity-shortcut path (in_planes == expansion * planes).
    in_planes2 = EXPANSION * planes
    x2 = jax.random.normal(kx2, (N, in_planes2, H, W), jnp.float32)
    p2 = make_params(kp2, in_planes2, planes)
    out2 = jax.block_until_ready(bottleneck_forward(x2, p2))
    ref2 = jax.block_until_ready(_ref_forward(x2, p2))
    assert out2.shape == (N, EXPANSION * planes, H, W), out2.shape
    assert jnp.allclose(out2, ref2, atol=1e-2, rtol=1e-2), float(
        jnp.max(jnp.abs(out2 - ref2)))

    print("KERNEL_OK")
</pallas_src>

<mosaic_0001>
module attributes {stable_mosaic.version = 11 : i64} {
  func.func @_matmul_shift_kernel(%arg0: i32, %arg1: i32, %arg2: i32, %arg3: memref<512x4xbf16, #tpu.memory_space<vmem>>, %arg4: memref<4x4xbf16, #tpu.memory_space<vmem>>, %arg5: memref<1x4xf32, #tpu.memory_space<vmem>>, %arg6: memref<512x4xbf16, #tpu.memory_space<vmem>>, %arg7: memref<512x4xf32, #tpu.memory_space<vmem>>) attributes {dimension_semantics = [#tpu.dimension_semantics<parallel>, #tpu.dimension_semantics<parallel>, #tpu.dimension_semantics<arbitrary>], iteration_bounds = array<i64: 1, 1, 1>, scalar_prefetch = 0 : i64, scratch_operands = 1 : i64, tpu.core_type = #tpu.core_type<tc>, window_params = [{transform_indices = @transform_0, window_bounds = array<i64: 512, 4>}, {transform_indices = @transform_1, window_bounds = array<i64: 4, 4>}, {transform_indices = @transform_2, window_bounds = array<i64: 1, 4>}, {transform_indices = @transform_3, window_bounds = array<i64: 512, 4>}]} {
    %c0_i32 = arith.constant 0 : i32
    %0 = arith.cmpi eq, %arg2, %c0_i32 : i32
    %1 = arith.extui %0 : i1 to i32
    %c0_i32_0 = arith.constant 0 : i32
    %2 = arith.cmpi ne, %1, %c0_i32_0 : i32
    scf.if %2 {
      %cst_10 = arith.constant 0.000000e+00 : f32
      %12 = vector.broadcast %cst_10 : f32 to vector<512x4xf32>
      %c0_11 = arith.constant 0 : index
      %c0_12 = arith.constant 0 : index
      %13 = vector.load %arg7[%c0_11, %c0_12] : memref<512x4xf32, #tpu.memory_space<vmem>>, vector<512x4xf32>
      tpu.vector_store %arg7[%c0_11, %c0_12], %12 {strides = array<i32>} : memref<512x4xf32, #tpu.memory_space<vmem>>, vector<512x4xf32>,
    } else {
    }
    %c0 = arith.constant 0 : index
    %c0_1 = arith.constant 0 : index
    %3 = vector.load %arg7[%c0, %c0_1] : memref<512x4xf32, #tpu.memory_space<vmem>>, vector<512x4xf32>
    %c0_2 = arith.constant 0 : index
    %c0_3 = arith.constant 0 : index
    %4 = vector.load %arg3[%c0_2, %c0_3] : memref<512x4xbf16, #tpu.memory_space<vmem>>, vector<512x4xbf16>
    %c0_4 = arith.constant 0 : index
    %c0_5 = arith.constant 0 : index
    %5 = vector.load %arg4[%c0_4, %c0_5] : memref<4x4xbf16, #tpu.memory_space<vmem>>, vector<4x4xbf16>
    %cst = arith.constant dense<0.000000e+00> : vector<512x4xf32>
    %6 = tpu.matmul %4, %5, %cst {dimension_numbers = #tpu.dot_dimension_numbers<[1], [0], [0], [1], [0, 0, 1, 1], [], []>} : vector<512x4xbf16>, vector<4x4xbf16>, vector<512x4xf32> -> vector<512x4xf32>
    %7 = arith.addf %3, %6 : vector<512x4xf32>
    %c0_6 = arith.constant 0 : index
    %c0_7 = arith.constant 0 : index
    %8 = vector.load %arg7[%c0_6, %c0_7] : memref<512x4xf32, #tpu.memory_space<vmem>>, vector<512x4xf32>
    tpu.vector_store %arg7[%c0_6, %c0_7], %7 {strides = array<i32>} : memref<512x4xf32, #tpu.memory_space<vmem>>, vector<512x4xf32>,
    %c0_i32_8 = arith.constant 0 : i32
    %9 = arith.cmpi eq, %arg2, %c0_i32_8 : i32
    %10 = arith.extui %9 : i1 to i32
    %c0_i32_9 = arith.constant 0 : i32
    %11 = arith.cmpi ne, %10, %c0_i32_9 : i32
    scf.if %11 {
      %c0_10 = arith.constant 0 : index
      %c0_11 = arith.constant 0 : index
      %12 = vector.load %arg7[%c0_10, %c0_11] : memref<512x4xf32, #tpu.memory_space<vmem>>, vector<512x4xf32>
      %c0_12 = arith.constant 0 : index
      %c0_13 = arith.constant 0 : index
      %13 = vector.load %arg5[%c0_12, %c0_13] : memref<1x4xf32, #tpu.memory_space<vmem>>, vector<1x4xf32>
      %14 = vector.broadcast %13 : vector<1x4xf32> to vector<512x4xf32>
      %15 = arith.addf %12, %14 : vector<512x4xf32>
      %cst_14 = arith.constant 0.000000e+00 : f32
      %16 = vector.broadcast %cst_14 : f32 to vector<512x4xf32>
      %17 = arith.maximumf %15, %16 : vector<512x4xf32>
      %18 = arith.truncf %17 : vector<512x4xf32> to vector<512x4xbf16>
      %c0_15 = arith.constant 0 : index
      %c0_16 = arith.constant 0 : index
      %19 = vector.load %arg6[%c0_15, %c0_16] : memref<512x4xbf16, #tpu.memory_space<vmem>>, vector<512x4xbf16>
      tpu.vector_store %arg6[%c0_15, %c0_16], %18 {strides = array<i32>} : memref<512x4xbf16, #tpu.memory_space<vmem>>, vector<512x4xbf16>,
    } else {
    }
    return
  }
  func.func @transform_0(%arg0: i32, %arg1: i32, %arg2: i32) -> (i32, i32) {
    %c0_i32 = arith.constant 0 : i32
    return %arg0, %arg2 : i32, i32
  }
  func.func @transform_1(%arg0: i32, %arg1: i32, %arg2: i32) -> (i32, i32) {
    %c0_i32 = arith.constant 0 : i32
    return %arg2, %arg1 : i32, i32
  }
  func.func @transform_2(%arg0: i32, %arg1: i32, %arg2: i32) -> (i32, i32) {
    %c0_i32 = arith.constant 0 : i32
    %c0_i32_0 = arith.constant 0 : i32
    return %c0_i32, %arg1 : i32, i32
  }
  func.func @transform_3(%arg0: i32, %arg1: i32, %arg2: i32) -> (i32, i32) {
    %c0_i32 = arith.constant 0 : i32
    return %arg0, %arg1 : i32, i32
  }
}

module attributes {stable_mosaic.version = 11 : i64} {
  func.func @_conv3x3_bn_relu_kernel(%arg0: i32, %arg1: i32, %arg2: i32, %arg3: memref<1x16x16x4xbf16, #tpu.memory_space<vmem>>, %arg4: memref<3x3x4x4xbf16, #tpu.memory_space<vmem>>, %arg5: memref<1x4xf32, #tpu.memory_space<vmem>>, %arg6: memref<1x16x16x4xbf16, #tpu.memory_space<vmem>>, %arg7: memref<18x18x4xbf16, #tpu.memory_space<vmem>>) attributes {dimension_semantics = [#tpu.dimension_semantics<parallel>, #tpu.dimension_semantics<arbitrary>, #tpu.dimension_semantics<arbitrary>], iteration_bounds = array<i64: 2, 1, 1>, scalar_prefetch = 0 : i64, scratch_operands = 1 : i64, tpu.core_type = #tpu.core_type<tc>, window_params = [{transform_indices = @transform_0, window_bounds = array<i64: 1, 16, 16, 4>}, {transform_indices = @transform_1, window_bounds = array<i64: 3, 3, 4, 4>}, {transform_indices = @transform_2, window_bounds = array<i64: 1, 4>}, {transform_indices = @transform_3, window_bounds = array<i64: 1, 16, 16, 4>}]} {
    %c0_i32 = arith.constant 0 : i32
    %0 = arith.cmpi eq, %arg1, %c0_i32 : i32
    %c0_i32_0 = arith.constant 0 : i32
    %1 = arith.cmpi eq, %arg2, %c0_i32_0 : i32
    %2 = arith.andi %0, %1 : i1
    %3 = arith.extui %2 : i1 to i32
    %c0_i32_1 = arith.constant 0 : i32
    %4 = arith.cmpi ne, %3, %c0_i32_1 : i32
    scf.if %4 {
      %cst_58 = arith.constant 0.000000e+00 : bf16
      %72 = vector.broadcast %cst_58 : bf16 to vector<18x18x4xbf16>
      %c0_59 = arith.constant 0 : index
      %c0_60 = arith.constant 0 : index
      %c0_61 = arith.constant 0 : index
      %73 = vector.load %arg7[%c0_59, %c0_60, %c0_61] : memref<18x18x4xbf16, #tpu.memory_space<vmem>>, vector<18x18x4xbf16>
      tpu.vector_store %arg7[%c0_59, %c0_60, %c0_61], %72 {strides = array<i32>} : memref<18x18x4xbf16, #tpu.memory_space<vmem>>, vector<18x18x4xbf16>,
      %c0_62 = arith.constant 0 : index
      %c0_63 = arith.constant 0 : index
      %c0_64 = arith.constant 0 : index
      %c0_65 = arith.constant 0 : index
      %74 = vector.load %arg3[%c0_62, %c0_63, %c0_64, %c0_65] : memref<1x16x16x4xbf16, #tpu.memory_space<vmem>>, vector<1x16x16x4xbf16>
      %75 = vector.shape_cast %74 : vector<1x16x16x4xbf16> to vector<16x16x4xbf16>
      %c1_66 = arith.constant 1 : index
      %c1_67 = arith.constant 1 : index
      %c0_68 = arith.constant 0 : index
      %76 = vector.load %arg7[%c1_66, %c1_67, %c0_68] : memref<18x18x4xbf16, #tpu.memory_space<vmem>>, vector<16x16x4xbf16>
      tpu.vector_store %arg7[%c1_66, %c1_67, %c0_68], %75 {strides = array<i32>} : memref<18x18x4xbf16, #tpu.memory_space<vmem>>, vector<16x16x4xbf16>,
    } else {
    }
    %c16_i32 = arith.constant 16 : i32
    %5 = arith.muli %arg2, %c16_i32 : i32
    %6 = tpu.assume_multiple %5, 16 : i32
    %cst = arith.constant 0.000000e+00 : f32
    %7 = vector.broadcast %cst : f32 to vector<16x16x4xf32>
    %c0_i32_2 = arith.constant 0 : i32
    %8 = arith.addi %6, %c0_i32_2 : i32
    %9 = arith.index_cast %8 : i32 to index
    %c0 = arith.constant 0 : index
    %c0_3 = arith.constant 0 : index
    %10 = vector.load %arg7[%9, %c0, %c0_3] : memref<18x18x4xbf16, #tpu.memory_space<vmem>>, vector<16x18x4xbf16>
    %11 = vector.extract_strided_slice %10 {offsets = [0, 0, 0], sizes = [16, 16, 4], strides = [1, 1, 1]} : vector<16x18x4xbf16> to vector<16x16x4xbf16>
    %c0_4 = arith.constant 0 : index
    %c0_5 = arith.constant 0 : index
    %c0_6 = arith.constant 0 : index
    %c0_7 = arith.constant 0 : index
    %12 = vector.load %arg4[%c0_4, %c0_5, %c0_6, %c0_7] : memref<3x3x4x4xbf16, #tpu.memory_space<vmem>>, vector<1x1x4x4xbf16>
    %13 = vector.shape_cast %12 : vector<1x1x4x4xbf16> to vector<4x4xbf16>
    %cst_8 = arith.constant dense<0.000000e+00> : vector<16x16x4xf32>
    %14 = tpu.matmul %11, %13, %cst_8 {dimension_numbers = #tpu.dot_dimension_numbers<[2], [0], [0, 1], [1], [0, 0, 0, 1, 1, 1], [], []>} : vector<16x16x4xbf16>, vector<4x4xbf16>, vector<16x16x4xf32> -> vector<16x16x4xf32>
    %15 = arith.addf %7, %14 : vector<16x16x4xf32>
    %16 = vector.extract_strided_slice %10 {offsets = [0, 1, 0], sizes = [16, 16, 4], strides = [1, 1, 1]} : vector<16x18x4xbf16> to vector<16x16x4xbf16>
    %c0_9 = arith.constant 0 : index
    %c1 = arith.constant 1 : index
    %c0_10 = arith.constant 0 : index
    %c0_11 = arith.constant 0 : index
    %17 = vector.load %arg4[%c0_9, %c1, %c0_10, %c0_11] : memref<3x3x4x4xbf16, #tpu.memory_space<vmem>>, vector<1x1x4x4xbf16>
    %18 = vector.shape_cast %17 : vector<1x1x4x4xbf16> to vector<4x4xbf16>
    %cst_12 = arith.constant dense<0.000000e+00> : vector<16x16x4xf32>
    %19 = tpu.matmul %16, %18, %cst_12 {dimension_numbers = #tpu.dot_dimension_numbers<[2], [0], [0, 1], [1], [0, 0, 0, 1, 1, 1], [], []>} : vector<16x16x4xbf16>, vector<4x4xbf16>, vector<16x16x4xf32> -> vector<16x16x4xf32>
    %20 = arith.addf %15, %19 : vector<16x16x4xf32>
    %21 = vector.extract_strided_slice %10 {offsets = [0, 2, 0], sizes = [16, 16, 4], strides = [1, 1, 1]} : vector<16x18x4xbf16> to vector<16x16x4xbf16>
    %c0_13 = arith.constant 0 : index
    %c2 = arith.constant 2 : index
    %c0_14 = arith.constant 0 : index
    %c0_15 = arith.constant 0 : index
    %22 = vector.load %arg4[%c0_13, %c2, %c0_14, %c0_15] : memref<3x3x4x4xbf16, #tpu.memory_space<vmem>>, vector<1x1x4x4xbf16>
    %23 = vector.shape_cast %22 : vector<1x1x4x4xbf16> to vector<4x4xbf16>
    %cst_16 = arith.constant dense<0.000000e+00> : vector<16x16x4xf32>
    %24 = tpu.matmul %21, %23, %cst_16 {dimension_numbers = #tpu.dot_dimension_numbers<[2], [0], [0, 1], [1], [0, 0, 0, 1, 1, 1], [], []>} : vector<16x16x4xbf16>, vector<4x4xbf16>, vector<16x16x4xf32> -> vector<16x16x4xf32>
    %25 = arith.addf %20, %24 : vector<16x16x4xf32>
    %c1_i32 = arith.constant 1 : i32
    %26 = arith.addi %6, %c1_i32 : i32
    %27 = arith.index_cast %26 : i32 to index
    %c0_17 = arith.constant 0 : index
    %c0_18 = arith.constant 0 : index
    %28 = vector.load %arg7[%27, %c0_17, %c0_18] : memref<18x18x4xbf16, #tpu.memory_space<vmem>>, vector<16x18x4xbf16>
    %29 = vector.extract_strided_slice %28 {offsets = [0, 0, 0], sizes = [16, 16, 4], strides = [1, 1, 1]} : vector<16x18x4xbf16> to vector<16x16x4xbf16>
    %c1_19 = arith.constant 1 : index
    %c0_20 = arith.constant 0 : index
    %c0_21 = arith.constant 0 : index
    %c0_22 = arith.constant 0 : index
    %30 = vector.load %arg4[%c1_19, %c0_20, %c0_21, %c0_22] : memref<3x3x4x4xbf16, #tpu.memory_space<vmem>>, vector<1x1x4x4xbf16>
    %31 = vector.shape_cast %30 : vector<1x1x4x4xbf16> to vector<4x4xbf16>
    %cst_23 = arith.constant dense<0.000000e+00> : vector<16x16x4xf32>
    %32 = tpu.matmul %29, %31, %cst_23 {dimension_numbers = #tpu.dot_dimension_numbers<[2], [0], [0, 1], [1], [0, 0, 0, 1, 1, 1], [], []>} : vector<16x16x4xbf16>, vector<4x4xbf16>, vector<16x16x4xf32> -> vector<16x16x4xf32>
    %33 = arith.addf %25, %32 : vector<16x16x4xf32>
    %34 = vector.extract_strided_slice %28 {offsets = [0, 1, 0], sizes = [16, 16, 4], strides = [1, 1, 1]} : vector<16x18x4xbf16> to vector<16x16x4xbf16>
    %c1_24 = arith.constant 1 : index
    %c1_25 = arith.constant 1 : index
    %c0_26 = arith.constant 0 : index
    %c0_27 = arith.constant 0 : index
    %35 = vector.load %arg4[%c1_24, %c1_25, %c0_26, %c0_27] : memref<3x3x4x4xbf16, #tpu.memory_space<vmem>>, vector<1x1x4x4xbf16>
    %36 = vector.shape_cast %35 : vector<1x1x4x4xbf16> to vector<4x4xbf16>
    %cst_28 = arith.constant dense<0.000000e+00> : vector<16x16x4xf32>
    %37 = tpu.matmul %34, %36, %cst_28 {dimension_numbers = #tpu.dot_dimension_numbers<[2], [0], [0, 1], [1], [0, 0, 0, 1, 1, 1], [], []>} : vector<16x16x4xbf16>, vector<4x4xbf16>, vector<16x16x4xf32> -> vector<16x16x4xf32>
    %38 = arith.addf %33, %37 : vector<16x16x4xf32>
    %39 = vector.extract_strided_slice %28 {offsets = [0, 2, 0], sizes = [16, 16, 4], strides = [1, 1, 1]} : vector<16x18x4xbf16> to vector<16x16x4xbf16>
    %c1_29 = arith.constant 1 : index
    %c2_30 = arith.constant 2 : index
    %c0_31 = arith.constant 0 : index
    %c0_32 = arith.constant 0 : index
    %40 = vector.load %arg4[%c1_29, %c2_30, %c0_31, %c0_32] : memref<3x3x4x4xbf16, #tpu.memory_space<vmem>>, vector<1x1x4x4xbf16>
    %41 = vector.shape_cast %40 : vector<1x1x4x4xbf16> to vector<4x4xbf16>
    %cst_33 = arith.constant dense<0.000000e+00> : vector<16x16x4xf32>
    %42 = tpu.matmul %39, %41, %cst_33 {dimension_numbers = #tpu.dot_dimension_numbers<[2], [0], [0, 1], [1], [0, 0, 0, 1, 1, 1], [], []>} : vector<16x16x4xbf16>, vector<4x4xbf16>, vector<16x16x4xf32> -> vector<16x16x4xf32>
    %43 = arith.addf %38, %42 : vector<16x16x4xf32>
    %c2_i32 = arith.constant 2 : i32
    %44 = arith.addi %6, %c2_i32 : i32
    %45 = arith.index_cast %44 : i32 to index
    %c0_34 = arith.constant 0 : index
    %c0_35 = arith.constant 0 : index
    %46 = vector.load %arg7[%45, %c0_34, %c0_35] : memref<18x18x4xbf16, #tpu.memory_space<vmem>>, vector<16x18x4xbf16>
    %47 = vector.extract_strided_slice %46 {offsets = [0, 0, 0], sizes = [16, 16, 4], strides = [1, 1, 1]} : vector<16x18x4xbf16> to vector<16x16x4xbf16>
    %c2_36 = arith.constant 2 : index
    %c0_37 = arith.constant 0 : index
    %c0_38 = arith.constant 0 : index
    %c0_39 = arith.constant 0 : index
    %48 = vector.load %arg4[%c2_36, %c0_37, %c0_38, %c0_39] : memref<3x3x4x4xbf16, #tpu.memory_space<vmem>>, vector<1x1x4x4xbf16>
    %49 = vector.shape_cast %48 : vector<1x1x4x4xbf16> to vector<4x4xbf16>
    %cst_40 = arith.constant dense<0.000000e+00> : vector<16x16x4xf32>
    %50 = tpu.matmul %47, %49, %cst_40 {dimension_numbers = #tpu.dot_dimension_numbers<[2], [0], [0, 1], [1], [0, 0, 0, 1, 1, 1], [], []>} : vector<16x16x4xbf16>, vector<4x4xbf16>, vector<16x16x4xf32> -> vector<16x16x4xf32>
    %51 = arith.addf %43, %50 : vector<16x16x4xf32>
    %52 = vector.extract_strided_slice %46 {offsets = [0, 1, 0], sizes = [16, 16, 4], strides = [1, 1, 1]} : vector<16x18x4xbf16> to vector<16x16x4xbf16>
    %c2_41 = arith.constant 2 : index
    %c1_42 = arith.constant 1 : index
    %c0_43 = arith.constant 0 : index
    %c0_44 = arith.constant 0 : index
    %53 = vector.load %arg4[%c2_41, %c1_42, %c0_43, %c0_44] : memref<3x3x4x4xbf16, #tpu.memory_space<vmem>>, vector<1x1x4x4xbf16>
    %54 = vector.shape_cast %53 : vector<1x1x4x4xbf16> to vector<4x4xbf16>
    %cst_45 = arith.constant dense<0.000000e+00> : vector<16x16x4xf32>
    %55 = tpu.matmul %52, %54, %cst_45 {dimension_numbers = #tpu.dot_dimension_numbers<[2], [0], [0, 1], [1], [0, 0, 0, 1, 1, 1], [], []>} : vector<16x16x4xbf16>, vector<4x4xbf16>, vector<16x16x4xf32> -> vector<16x16x4xf32>
    %56 = arith.addf %51, %55 : vector<16x16x4xf32>
    %57 = vector.extract_strided_slice %46 {offsets = [0, 2, 0], sizes = [16, 16, 4], strides = [1, 1, 1]} : vector<16x18x4xbf16> to vector<16x16x4xbf16>
    %c2_46 = arith.constant 2 : index
    %c2_47 = arith.constant 2 : index
    %c0_48 = arith.constant 0 : index
    %c0_49 = arith.constant 0 : index
    %58 = vector.load %arg4[%c2_46, %c2_47, %c0_48, %c0_49] : memref<3x3x4x4xbf16, #tpu.memory_space<vmem>>, vector<1x1x4x4xbf16>
    %59 = vector.shape_cast %58 : vector<1x1x4x4xbf16> to vector<4x4xbf16>
    %cst_50 = arith.constant dense<0.000000e+00> : vector<16x16x4xf32>
    %60 = tpu.matmul %57, %59, %cst_50 {dimension_numbers = #tpu.dot_dimension_numbers<[2], [0], [0, 1], [1], [0, 0, 0, 1, 1, 1], [], []>} : vector<16x16x4xbf16>, vector<4x4xbf16>, vector<16x16x4xf32> -> vector<16x16x4xf32>
    %61 = arith.addf %56, %60 : vector<16x16x4xf32>
    %c0_51 = arith.constant 0 : index
    %c0_52 = arith.constant 0 : index
    %62 = vector.load %arg5[%c0_51, %c0_52] : memref<1x4xf32, #tpu.memory_space<vmem>>, vector<1x4xf32>
    %63 = vector.shape_cast %62 : vector<1x4xf32> to vector<1x1x4xf32>
    %64 = vector.broadcast %63 : vector<1x1x4xf32> to vector<16x16x4xf32>
    %65 = arith.addf %61, %64 : vector<16x16x4xf32>
    %cst_53 = arith.constant 0.000000e+00 : f32
    %66 = vector.broadcast %cst_53 : f32 to vector<16x16x4xf32>
    %67 = arith.maximumf %65, %66 : vector<16x16x4xf32>
    %68 = arith.truncf %67 : vector<16x16x4xf32> to vector<16x16x4xbf16>
    %c0_54 = arith.constant 0 : index
    %c0_55 = arith.constant 0 : index
    %c0_56 = arith.constant 0 : index
    %c0_57 = arith.constant 0 : index
    %69 = vector.load %arg6[%c0_54, %c0_55, %c0_56, %c0_57] : memref<1x16x16x4xbf16, #tpu.memory_space<vmem>>, vector<1x16x16x4xbf16>
    %70 = vector.shape_cast %69 : vector<1x16x16x4xbf16> to vector<16x16x4xbf16>
    %71 = vector.shape_cast %68 : vector<16x16x4xbf16> to vector<1x16x16x4xbf16>
    tpu.vector_store %arg6[%c0_54, %c0_55, %c0_56, %c0_57], %71 {strides = array<i32>} : memref<1x16x16x4xbf16, #tpu.memory_space<vmem>>, vector<1x16x16x4xbf16>,
    return
  }
  func.func @transform_0(%arg0: i32, %arg1: i32, %arg2: i32) -> (i32, i32, i32, i32) {
    %c0_i32 = arith.constant 0 : i32
    %c0_i32_0 = arith.constant 0 : i32
    %c0_i32_1 = arith.constant 0 : i32
    %c0_i32_2 = arith.constant 0 : i32
    return %arg0, %c0_i32, %c0_i32_0, %c0_i32_1 : i32, i32, i32, i32
  }
  func.func @transform_1(%arg0: i32, %arg1: i32, %arg2: i32) -> (i32, i32, i32, i32) {
    %c0_i32 = arith.constant 0 : i32
    %c0_i32_0 = arith.constant 0 : i32
    %c0_i32_1 = arith.constant 0 : i32
    %c0_i32_2 = arith.constant 0 : i32
    return %c0_i32, %c0_i32_0, %c0_i32_1, %arg1 : i32, i32, i32, i32
  }
  func.func @transform_2(%arg0: i32, %arg1: i32, %arg2: i32) -> (i32, i32) {
    %c0_i32 = arith.constant 0 : i32
    %c0_i32_0 = arith.constant 0 : i32
    return %c0_i32, %arg1 : i32, i32
  }
  func.func @transform_3(%arg0: i32, %arg1: i32, %arg2: i32) -> (i32, i32, i32, i32) {
    %c0_i32 = arith.constant 0 : i32
    %c0_i32_0 = arith.constant 0 : i32
    return %arg0, %arg2, %c0_i32, %arg1 : i32, i32, i32, i32
  }
}

module attributes {stable_mosaic.version = 11 : i64} {
  func.func @_conv3_shortcut_fused_kernel(%arg0: i32, %arg1: i32, %arg2: memref<512x4xbf16, #tpu.memory_space<vmem>>, %arg3: memref<4x16xbf16, #tpu.memory_space<vmem>>, %arg4: memref<512x4xbf16, #tpu.memory_space<vmem>>, %arg5: memref<4x16xbf16, #tpu.memory_space<vmem>>, %arg6: memref<1x16xf32, #tpu.memory_space<vmem>>, %arg7: memref<512x16xf32, #tpu.memory_space<vmem>>) attributes {dimension_semantics = [#tpu.dimension_semantics<parallel>, #tpu.dimension_semantics<parallel>], iteration_bounds = array<i64: 1, 1>, scalar_prefetch = 0 : i64, scratch_operands = 0 : i64, tpu.core_type = #tpu.core_type<tc>, window_params = [{transform_indices = @transform_0, window_bounds = array<i64: 512, 4>}, {transform_indices = @transform_1, window_bounds = array<i64: 4, 16>}, {transform_indices = @transform_2, window_bounds = array<i64: 512, 4>}, {transform_indices = @transform_3, window_bounds = array<i64: 4, 16>}, {transform_indices = @transform_4, window_bounds = array<i64: 1, 16>}, {transform_indices = @transform_5, window_bounds = array<i64: 512, 16>}]} {
    %c0 = arith.constant 0 : index
    %c0_0 = arith.constant 0 : index
    %0 = vector.load %arg2[%c0, %c0_0] : memref<512x4xbf16, #tpu.memory_space<vmem>>, vector<512x4xbf16>
    %c0_1 = arith.constant 0 : index
    %c0_2 = arith.constant 0 : index
    %1 = vector.load %arg3[%c0_1, %c0_2] : memref<4x16xbf16, #tpu.memory_space<vmem>>, vector<4x16xbf16>
    %cst = arith.constant dense<0.000000e+00> : vector<512x16xf32>
    %2 = tpu.matmul %0, %1, %cst {dimension_numbers = #tpu.dot_dimension_numbers<[1], [0], [0], [1], [0, 0, 1, 1], [], []>} : vector<512x4xbf16>, vector<4x16xbf16>, vector<512x16xf32> -> vector<512x16xf32>
    %c0_3 = arith.constant 0 : index
    %c0_4 = arith.constant 0 : index
    %3 = vector.load %arg4[%c0_3, %c0_4] : memref<512x4xbf16, #tpu.memory_space<vmem>>, vector<512x4xbf16>
    %c0_5 = arith.constant 0 : index
    %c0_6 = arith.constant 0 : index
    %4 = vector.load %arg5[%c0_5, %c0_6] : memref<4x16xbf16, #tpu.memory_space<vmem>>, vector<4x16xbf16>
    %cst_7 = arith.constant dense<0.000000e+00> : vector<512x16xf32>
    %5 = tpu.matmul %3, %4, %cst_7 {dimension_numbers = #tpu.dot_dimension_numbers<[1], [0], [0], [1], [0, 0, 1, 1], [], []>} : vector<512x4xbf16>, vector<4x16xbf16>, vector<512x16xf32> -> vector<512x16xf32>
    %6 = arith.addf %2, %5 : vector<512x16xf32>
    %c0_8 = arith.constant 0 : index
    %c0_9 = arith.constant 0 : index
    %7 = vector.load %arg6[%c0_8, %c0_9] : memref<1x16xf32, #tpu.memory_space<vmem>>, vector<1x16xf32>
    %8 = vector.broadcast %7 : vector<1x16xf32> to vector<512x16xf32>
    %9 = arith.addf %6, %8 : vector<512x16xf32>
    %cst_10 = arith.constant 0.000000e+00 : f32
    %10 = vector.broadcast %cst_10 : f32 to vector<512x16xf32>
    %11 = arith.maximumf %9, %10 : vector<512x16xf32>
    %c0_11 = arith.constant 0 : index
    %c0_12 = arith.constant 0 : index
    %12 = vector.load %arg7[%c0_11, %c0_12] : memref<512x16xf32, #tpu.memory_space<vmem>>, vector<512x16xf32>
    tpu.vector_store %arg7[%c0_11, %c0_12], %11 {strides = array<i32>} : memref<512x16xf32, #tpu.memory_space<vmem>>, vector<512x16xf32>,
    return
  }
  func.func @transform_0(%arg0: i32, %arg1: i32) -> (i32, i32) {
    %c0_i32 = arith.constant 0 : i32
    %c0_i32_0 = arith.constant 0 : i32
    return %arg0, %c0_i32 : i32, i32
  }
  func.func @transform_1(%arg0: i32, %arg1: i32) -> (i32, i32) {
    %c0_i32 = arith.constant 0 : i32
    %c0_i32_0 = arith.constant 0 : i32
    return %c0_i32, %arg1 : i32, i32
  }
  func.func @transform_2(%arg0: i32, %arg1: i32) -> (i32, i32) {
    %c0_i32 = arith.constant 0 : i32
    %c0_i32_0 = arith.constant 0 : i32
    return %arg0, %c0_i32 : i32, i32
  }
  func.func @transform_3(%arg0: i32, %arg1: i32) -> (i32, i32) {
    %c0_i32 = arith.constant 0 : i32
    %c0_i32_0 = arith.constant 0 : i32
    return %c0_i32, %arg1 : i32, i32
  }
  func.func @transform_4(%arg0: i32, %arg1: i32) -> (i32, i32) {
    %c0_i32 = arith.constant 0 : i32
    %c0_i32_0 = arith.constant 0 : i32
    return %c0_i32, %arg1 : i32, i32
  }
  func.func @transform_5(%arg0: i32, %arg1: i32) -> (i32, i32) {
    %c0_i32 = arith.constant 0 : i32
    return %arg0, %arg1 : i32, i32
  }
}

</mosaic_0001>

<bundles_post_ra>
// kernel: bottleneck_forward.5
= control target key start
LH: loop header
LB: loop body
LE: loop exit
PB: predicated region body
PF: predicated region fallthrough
CT: control target
= control target key end

     0   :  { %vm408_vm0 = vcmask 1041408   ;;  %vm311_vm1 = vcmask 31744   ;;  %vm1384_vm2 = vcmask 130048   ;;  %s2527_s3 = inlined_call_operand.vmem [shape: bf16[4,16], index: 3, kind: input, shape index: {}]   ;;  %s2528_s1 = inlined_call_operand.vmem [shape: bf16[4,16], index: 1, kind: input, shape index: {}]   ;;  %s2529_s2 = inlined_call_operand.vmem [shape: bf16[512,4], index: 2, kind: input, shape index: {}]   ;;  %s2530_s0 = inlined_call_operand.vmem [shape: bf16[512,4], index: 0, kind: input, shape index: {}]   ;;  %s2531_s4 = inlined_call_operand.vmem [shape: f32[1,16], index: 4, kind: input, shape index: {}]   ;;  %s2532_s5 = inlined_call_operand.vmem [shape: f32[512,16], index: 5, kind: output, shape index: {}]  }
   0x1   :  { %v150_v0 = vld [vmem:[%s2527_s3] sm:$0x3]  ;;  %v1848_v6 = vld [vmem:[%s2529_s2 + $0x8] sm:$0xff]   ;;  %v1850_v8 = vld [vmem:[%s2529_s2 + $0x10] sm:$0xff]  }
   0x2   :  { %v85_v1 = vld [vmem:[%s2528_s1] sm:$0x3]  ;;  %1844 = vmatprep.subr.msk.bf16.mxu1 %vm408_vm0, %v150_v0  ;;  %v410_v2 = vsel %vm408_vm0, %v150_v0, 0  ;;  %v1849_v7 = vld [vmem:[%s2530_s0 + $0x8] sm:$0xff]   ;;  %v1851_v9 = vld [vmem:[%s2530_s0 + $0x10] sm:$0xff]  }
   0x3   :  { %1845 = vmatprep.subr.msk.bf16.mxu0 %vm408_vm0, %v85_v1  ;;  %v958_v3 = vsel %vm408_vm0, %v85_v1, 0  ;;  %v1846_v4 = vld [vmem:[%s2529_s2] sm:$0xff]   ;;  %1649 = vmatpush3.bf16.msra.mxu1 %v410_v2  ;;  %v1852_v10 = vld [vmem:[%s2529_s2 + $0x18] sm:$0xff]   ;;  %v1856_v14 = vld [vmem:[%s2529_s2 + $0x28] sm:$0xff]  }
   0x4   :  { %v1847_v5 = vld [vmem:[%s2530_s0] sm:$0xff]   ;;  %1715 = vmatpush3.bf16.msra.mxu0 %v958_v3  ;;  %1650 = vmatprep.mubr.msk.bf16.mxu1 %vm311_vm1, %v1846_v4  ;;  %v1853_v11 = vld [vmem:[%s2530_s0 + $0x18] sm:$0xff]   ;;  %v1857_v15 = vld [vmem:[%s2530_s0 + $0x28] sm:$0xff]  }
   0x5   :  { %1716 = vmatprep.mubr.msk.bf16.mxu0 %vm311_vm1, %v1847_v5  ;;  %v1854_v12 = vld [vmem:[%s2529_s2 + $0x20] sm:$0xff]   ;;  %v1858_v16 = vld [vmem:[%s2529_s2 + $0x30] sm:$0xff]   ;;  %v1860_v18 = vld [vmem:[%s2529_s2 + $0x38] sm:$0xff]  }
   0x6   :  { %1651 = vmatmul.mubr.msk.bf16.vlgmr.msra.gmra.mrb[0].mxu1 %vm311_vm1, %v1848_v6  ;;  %v1855_v13 = vld [vmem:[%s2530_s0 + $0x20] sm:$0xff]   ;;  %v1859_v17 = vld [vmem:[%s2530_s0 + $0x30] sm:$0xff]   ;;  %v1861_v19 = vld [vmem:[%s2530_s0 + $0x38] sm:$0xff]  }
   0x7   :  { %1717 = vmatmul.mubr.msk.bf16.vlgmr.msra.gmra.mrb[0].mxu0 %vm311_vm1, %v1849_v7  ;;  %1654 = vmatprep.mubr.msk.bf16.mxu1 %vm311_vm1, %v1850_v8  ;;  %v1862_v20 = vld [vmem:[%s2529_s2 + $0x40] sm:$0xff]   ;;  %v1864_v22 = vld [vmem:[%s2529_s2 + $0x48] sm:$0xff]   ;;  %v1866_v24 = vld [vmem:[%s2529_s2 + $0x50] sm:$0xff]  }
   0x8   :  { %1720 = vmatprep.mubr.msk.bf16.mxu0 %vm311_vm1, %v1851_v9  ;;  %v1863_v21 = vld [vmem:[%s2530_s0 + $0x40] sm:$0xff]   ;;  %v1865_v23 = vld [vmem:[%s2530_s0 + $0x48] sm:$0xff]   ;;  %v1867_v25 = vld [vmem:[%s2530_s0 + $0x50] sm:$0xff]  }
   0x9   :  { %v1868_v26 = vld [vmem:[%s2529_s2 + $0x58] sm:$0xff]   ;;  %v1870_v28 = vld [vmem:[%s2529_s2 + $0x60] sm:$0xff]   ;;  %v1872_v30 = vld [vmem:[%s2529_s2 + $0x68] sm:$0xff]  }
   0xa   :  { %v1869_v27 = vld [vmem:[%s2530_s0 + $0x58] sm:$0xff]   ;;  %v1871_v29 = vld [vmem:[%s2530_s0 + $0x60] sm:$0xff]   ;;  %v1873_v31 = vld [vmem:[%s2530_s0 + $0x68] sm:$0xff]  }
   0xb   :  { %v1874_v32 = vld [vmem:[%s2529_s2 + $0x70] sm:$0xff]   ;;  %v1876_v34 = vld [vmem:[%s2529_s2 + $0x78] sm:$0xff]   ;;  %v1878_v36 = vld [vmem:[%s2529_s2 + $0x80] sm:$0xff]  }
   0xc   :  { %v1875_v33 = vld [vmem:[%s2530_s0 + $0x70] sm:$0xff]   ;;  %v1877_v35 = vld [vmem:[%s2530_s0 + $0x78] sm:$0xff]   ;;  %v1879_v37 = vld [vmem:[%s2530_s0 + $0x80] sm:$0xff]  }
   0xd   :  { %v1880_v38 = vld [vmem:[%s2529_s2 + $0x88] sm:$0xff]   ;;  %v1882_v40 = vld [vmem:[%s2529_s2 + $0x90] sm:$0xff]   ;;  %v1884_v42 = vld [vmem:[%s2529_s2 + $0x98] sm:$0xff]  }
   0xe   :  { %1655 = vmatmul.mubr.msk.bf16.gmra.mrb[4].mxu1 %vm311_vm1, %v1852_v10  ;;  %v1881_v39 = vld [vmem:[%s2530_s0 + $0x88] sm:$0xff]   ;;  %v1883_v41 = vld [vmem:[%s2530_s0 + $0x90] sm:$0xff]   ;;  %v1885_v43 = vld [vmem:[%s2530_s0 + $0x98] sm:$0xff]  }
   0xf   :  { %1721 = vmatmul.mubr.msk.bf16.gmra.mrb[4].mxu0 %vm311_vm1, %v1853_v11  ;;  %1658 = vmatprep.mubr.msk.bf16.mxu1 %vm311_vm1, %v1854_v12  ;;  %v1886_v44 = vld [vmem:[%s2529_s2 + $0xa0] sm:$0xff]   ;;  %v1888_v46 = vld [vmem:[%s2529_s2 + $0xa8] sm:$0xff]   ;;  %v1890_v48 = vld [vmem:[%s2529_s2 + $0xb0] sm:$0xff]  }
  0x10   :  { %1724 = vmatprep.mubr.msk.bf16.mxu0 %vm311_vm1, %v1855_v13  ;;  %v1887_v45 = vld [vmem:[%s2530_s0 + $0xa0] sm:$0xff]   ;;  %v1889_v47 = vld [vmem:[%s2530_s0 + $0xa8] sm:$0xff]   ;;  %v1891_v49 = vld [vmem:[%s2530_s0 + $0xb0] sm:$0xff]  }
  0x11   :  { %v1892_v50 = vld [vmem:[%s2529_s2 + $0xb8] sm:$0xff]   ;;  %v1894_v52 = vld [vmem:[%s2529_s2 + $0xc0] sm:$0xff]   ;;  %v1896_v54 = vld [vmem:[%s2529_s2 + $0xc8] sm:$0xff]  }
  0x12   :  { %v1893_v51 = vld [vmem:[%s2530_s0 + $0xb8] sm:$0xff]   ;;  %v1895_v53 = vld [vmem:[%s2530_s0 + $0xc0] sm:$0xff]   ;;  %v1897_v55 = vld [vmem:[%s2530_s0 + $0xc8] sm:$0xff]  }
  0x13   :  { %v1898_v56 = vld [vmem:[%s2529_s2 + $0xd0] sm:$0xff]   ;;  %v1900_v58 = vld [vmem:[%s2529_s2 + $0xd8] sm:$0xff]   ;;  %v1902_v60 = vld [vmem:[%s2529_s2 + $0xe0] sm:$0xff]  }
  0x14   :  { %v1899_v57 = vld [vmem:[%s2530_s0 + $0xd0] sm:$0xff]   ;;  %v1901_v59 = vld [vmem:[%s2530_s0 + $0xd8] sm:$0xff]   ;;  %v1903_v61 = vld [vmem:[%s2530_s0 + $0xe0] sm:$0xff]  }
  0x15   :  { %v1904_v62 = vld [vmem:[%s2529_s2 + $0xe8] sm:$0xff]   ;;  %v1906_v0 = vld [vmem:[%s2529_s2 + $0xf0] sm:$0xff]   ;;  %v1908_v2 = vld [vmem:[%s2529_s2 + $0xf8] sm:$0xff]  }
  0x16   :  { %1659 = vmatmul.mubr.msk.bf16.gmra.mrb[8].mxu1 %vm311_vm1, %v1856_v14  ;;  %v1905_v63 = vld [vmem:[%s2530_s0 + $0xe8] sm:$0xff]   ;;  %v1907_v1 = vld [vmem:[%s2530_s0 + $0xf0] sm:$0xff]   ;;  %v1909_v3 = vld [vmem:[%s2530_s0 + $0xf8] sm:$0xff]  }
  0x17   :  { %1725 = vmatmul.mubr.msk.bf16.gmra.mrb[8].mxu0 %vm311_vm1, %v1857_v15  ;;  %1662 = vmatprep.mubr.msk.bf16.mxu1 %vm311_vm1, %v1858_v16  ;;  %v2205_v6 = vld [vmem:[%s2531_s4] ss:$0 sm:$0xff] }
  0x18   :  { %1728 = vmatprep.mubr.msk.bf16.mxu0 %vm311_vm1, %v1859_v17 }
  0x1e   :  { %1663 = vmatmul.mubr.msk.bf16.gmra.mrb[12].mxu1 %vm311_vm1, %v1860_v18 }
  0x1f   :  { %1729 = vmatmul.mubr.msk.bf16.gmra.mrb[12].mxu0 %vm311_vm1, %v1861_v19  ;;  %1666 = vmatprep.mubr.msk.bf16.mxu1 %vm311_vm1, %v1862_v20 }
  0x20   :  { %1732 = vmatprep.mubr.msk.bf16.mxu0 %vm311_vm1, %v1863_v21 }
  0x26   :  { %1667 = vmatmul.mubr.msk.bf16.gmra.mrb[16].mxu1 %vm311_vm1, %v1864_v22 }
  0x27   :  { %1733 = vmatmul.mubr.msk.bf16.gmra.mrb[16].mxu0 %vm311_vm1, %v1865_v23  ;;  %1670 = vmatprep.mubr.msk.bf16.mxu1 %vm311_vm1, %v1866_v24 }
  0x28   :  { %1736 = vmatprep.mubr.msk.bf16.mxu0 %vm311_vm1, %v1867_v25 }
  0x2e   :  { %1671 = vmatmul.mubr.msk.bf16.gmra.mrb[20].mxu1 %vm311_vm1, %v1868_v26 }
  0x2f   :  { %1737 = vmatmul.mubr.msk.bf16.gmra.mrb[20].mxu0 %vm311_vm1, %v1869_v27  ;;  %1674 = vmatprep.mubr.msk.bf16.mxu1 %vm311_vm1, %v1870_v28 }
  0x30   :  { %1740 = vmatprep.mubr.msk.bf16.mxu0 %vm311_vm1, %v1871_v29 }
  0x36   :  { %1675 = vmatmul.mubr.msk.bf16.gmra.mrb[24].mxu1 %vm311_vm1, %v1872_v30 }
  0x37   :  { %1741 = vmatmul.mubr.msk.bf16.gmra.mrb[24].mxu0 %vm311_vm1, %v1873_v31  ;;  %1678 = vmatprep.mubr.msk.bf16.mxu1 %vm311_vm1, %v1874_v32 }
  0x38   :  { %1744 = vmatprep.mubr.msk.bf16.mxu0 %vm311_vm1, %v1875_v33 }
  0x3e   :  { %1679 = vmatmul.mubr.msk.bf16.gmra.mrb[28].mxu1 %vm311_vm1, %v1876_v34 }
  0x3f   :  { %1745 = vmatmul.mubr.msk.bf16.gmra.mrb[28].mxu0 %vm311_vm1, %v1877_v35  ;;  %1682 = vmatprep.mubr.msk.bf16.mxu1 %vm311_vm1, %v1878_v36 }
  0x40   :  { %1748 = vmatprep.mubr.msk.bf16.mxu0 %vm311_vm1, %v1879_v37 }
  0x46   :  { %1683 = vmatmul.mubr.msk.bf16.gmra.mrb[32].mxu1 %vm311_vm1, %v1880_v38 }
  0x47   :  { %1749 = vmatmul.mubr.msk.bf16.gmra.mrb[32].mxu0 %vm311_vm1, %v1881_v39  ;;  %1686 = vmatprep.mubr.msk.bf16.mxu1 %vm311_vm1, %v1882_v40 }
  0x48   :  { %1752 = vmatprep.mubr.msk.bf16.mxu0 %vm311_vm1, %v1883_v41 }
  0x4e   :  { %1687 = vmatmul.mubr.msk.bf16.gmra.mrb[36].mxu1 %vm311_vm1, %v1884_v42 }
  0x4f   :  { %1753 = vmatmul.mubr.msk.bf16.gmra.mrb[36].mxu0 %vm311_vm1, %v1885_v43  ;;  %1690 = vmatprep.mubr.msk.bf16.mxu1 %vm311_vm1, %v1886_v44 }
  0x50   :  { %1756 = vmatprep.mubr.msk.bf16.mxu0 %vm311_vm1, %v1887_v45 }
  0x56   :  { %1691 = vmatmul.mubr.msk.bf16.gmra.mrb[40].mxu1 %vm311_vm1, %v1888_v46 }
  0x57   :  { %1757 = vmatmul.mubr.msk.bf16.gmra.mrb[40].mxu0 %vm311_vm1, %v1889_v47  ;;  %1694 = vmatprep.mubr.msk.bf16.mxu1 %vm311_vm1, %v1890_v48 }
  0x58   :  { %1760 = vmatprep.mubr.msk.bf16.mxu0 %vm311_vm1, %v1891_v49 }
  0x5e   :  { %1695 = vmatmul.mubr.msk.bf16.gmra.mrb[44].mxu1 %vm311_vm1, %v1892_v50 }
  0x5f   :  { %1761 = vmatmul.mubr.msk.bf16.gmra.mrb[44].mxu0 %vm311_vm1, %v1893_v51  ;;  %1698 = vmatprep.mubr.msk.bf16.mxu1 %vm311_vm1, %v1894_v52 }
  0x60   :  { %1764 = vmatprep.mubr.msk.bf16.mxu0 %vm311_vm1, %v1895_v53 }
  0x66   :  { %1699 = vmatmul.mubr.msk.bf16.gmra.mrb[48].mxu1 %vm311_vm1, %v1896_v54 }
  0x67   :  { %1765 = vmatmul.mubr.msk.bf16.gmra.mrb[48].mxu0 %vm311_vm1, %v1897_v55  ;;  %1702 = vmatprep.mubr.msk.bf16.mxu1 %vm311_vm1, %v1898_v56 }
  0x68   :  { %1768 = vmatprep.mubr.msk.bf16.mxu0 %vm311_vm1, %v1899_v57 }
  0x6e   :  { %1703 = vmatmul.mubr.msk.bf16.gmra.mrb[52].mxu1 %vm311_vm1, %v1900_v58 }
  0x6f   :  { %1769 = vmatmul.mubr.msk.bf16.gmra.mrb[52].mxu0 %vm311_vm1, %v1901_v59  ;;  %1706 = vmatprep.mubr.msk.bf16.mxu1 %vm311_vm1, %v1902_v60 }
  0x70   :  { %1772 = vmatprep.mubr.msk.bf16.mxu0 %vm311_vm1, %v1903_v61 }
  0x76   :  { %1707 = vmatmul.mubr.msk.bf16.gmra.mrb[56].mxu1 %vm311_vm1, %v1904_v62 }
  0x77   :  { %1773 = vmatmul.mubr.msk.bf16.gmra.mrb[56].mxu0 %vm311_vm1, %v1905_v63  ;;  %1710 = vmatprep.mubr.msk.bf16.mxu1 %vm311_vm1, %v1906_v0 }
  0x78   :  { %1776 = vmatprep.mubr.msk.bf16.mxu0 %vm311_vm1, %v1907_v1 }
  0x7e   :  { %1711 = vmatmul.mubr.msk.bf16.gmra.mrb[60].mxu1 %vm311_vm1, %v1908_v2 }
  0x7f   :  { %1777 = vmatmul.mubr.msk.bf16.gmra.mrb[60].mxu0 %vm311_vm1, %v1909_v3 }
  0xd9   :  { %v1652_v4 = vpop.f32.mrb[0].mxu1 }
  0xda   :  { %v1718_v5 = vpop.f32.mrb[0].mxu0  ;;  %v446_v7 = vpop.f32.mrb[1].mxu1 }
  0xdb   :  { %v1003_v8 = vadd.f32 %v1718_v5, %v1652_v4  ;;  %v994_v9 = vpop.f32.mrb[1].mxu0  ;;  %v1653_v10 = vpop.f32.mrb[2].mxu1 }
  0xdc   :  { %v995_v11 = vadd.f32 %v994_v9, %v446_v7  ;;  %v1719_v12 = vpop.f32.mrb[2].mxu0  ;;  %v449_v13 = vpop.f32.mrb[3].mxu1 }
  0xdd   :  { %v1258_v14 = vadd.f32 %v2205_v6, %v1003_v8  ;;  %v1006_v15 = vadd.f32 %v1719_v12, %v1653_v10  ;;  %v997_v16 = vpop.f32.mrb[3].mxu0 }
  0xde   :  { %v1256_v17 = vadd.f32 %v2205_v6, %v995_v11  ;;  %v998_v18 = vadd.f32 %v997_v16, %v449_v13 }
  0xdf   :  { %v1322_v19 = vmax.f32 %v1258_v14, 0.0  ;;  %v1259_v20 = vadd.f32 %v2205_v6, %v1006_v15 }
  0xe0   :  { %v1320_v21 = vmax.f32 %v1256_v17, 0.0  ;;  %v1257_v22 = vadd.f32 %v2205_v6, %v998_v18 }
  0xe1   :  { %1387 = vst.msk [vmem:[%s2532_s5 + $0x10] sm:$0xff] %vm1384_vm2, %v1322_v19  ;;  %v1323_v23 = vmax.f32 %v1259_v20, 0.0  ;;  %v1656_v24 = vpop.f32.mrb[4].mxu1 }
  0xe2   :  { %1385 = vst.msk [vmem:[%s2532_s5] sm:$0xff] %vm1384_vm2, %v1320_v21  ;;  %v1321_v25 = vmax.f32 %v1257_v22, 0.0  ;;  %v1722_v26 = vpop.f32.mrb[4].mxu0  ;;  %v462_v27 = vpop.f32.mrb[5].mxu1 }
  0xe3   :  { %1388 = vst.msk [vmem:[%s2532_s5 + $0x18] sm:$0xff] %vm1384_vm2, %v1323_v23  ;;  %v1019_v28 = vadd.f32 %v1722_v26, %v1656_v24  ;;  %v1010_v29 = vpop.f32.mrb[5].mxu0  ;;  %v1657_v30 = vpop.f32.mrb[6].mxu1 }
  0xe4   :  { %1386 = vst.msk [vmem:[%s2532_s5 + $0x8] sm:$0xff] %vm1384_vm2, %v1321_v25  ;;  %v1011_v31 = vadd.f32 %v1010_v29, %v462_v27  ;;  %v1723_v32 = vpop.f32.mrb[6].mxu0  ;;  %v465_v33 = vpop.f32.mrb[7].mxu1 }
  0xe5   :  { %v1262_v34 = vadd.f32 %v2205_v6, %v1019_v28  ;;  %v1022_v35 = vadd.f32 %v1723_v32, %v1657_v30  ;;  %v1013_v36 = vpop.f32.mrb[7].mxu0 }
  0xe6   :  { %v1260_v37 = vadd.f32 %v2205_v6, %v1011_v31  ;;  %v1014_v38 = vadd.f32 %v1013_v36, %v465_v33 }
  0xe7   :  { %v1326_v39 = vmax.f32 %v1262_v34, 0.0  ;;  %v1263_v40 = vadd.f32 %v2205_v6, %v1022_v35 }
  0xe8   :  { %v1324_v41 = vmax.f32 %v1260_v37, 0.0  ;;  %v1261_v42 = vadd.f32 %v2205_v6, %v1014_v38 }
  0xe9   :  { %1391 = vst.msk [vmem:[%s2532_s5 + $0x30] sm:$0xff] %vm1384_vm2, %v1326_v39  ;;  %v1327_v43 = vmax.f32 %v1263_v40, 0.0  ;;  %v1660_v44 = vpop.f32.mrb[8].mxu1 }
  0xea   :  { %1389 = vst.msk [vmem:[%s2532_s5 + $0x20] sm:$0xff] %vm1384_vm2, %v1324_v41  ;;  %v1325_v45 = vmax.f32 %v1261_v42, 0.0  ;;  %v1726_v46 = vpop.f32.mrb[8].mxu0  ;;  %v478_v47 = vpop.f32.mrb[9].mxu1 }
  0xeb   :  { %1392 = vst.msk [vmem:[%s2532_s5 + $0x38] sm:$0xff] %vm1384_vm2, %v1327_v43  ;;  %v1035_v48 = vadd.f32 %v1726_v46, %v1660_v44  ;;  %v1026_v49 = vpop.f32.mrb[9].mxu0  ;;  %v1661_v50 = vpop.f32.mrb[10].mxu1 }
  0xec   :  { %1390 = vst.msk [vmem:[%s2532_s5 + $0x28] sm:$0xff] %vm1384_vm2, %v1325_v45  ;;  %v1027_v51 = vadd.f32 %v1026_v49, %v478_v47  ;;  %v1727_v52 = vpop.f32.mrb[10].mxu0  ;;  %v481_v53 = vpop.f32.mrb[11].mxu1 }
  0xed   :  { %v1266_v54 = vadd.f32 %v2205_v6, %v1035_v48  ;;  %v1038_v55 = vadd.f32 %v1727_v52, %v1661_v50  ;;  %v1029_v56 = vpop.f32.mrb[11].mxu0 }
  0xee   :  { %v1264_v57 = vadd.f32 %v2205_v6, %v1027_v51  ;;  %v1030_v58 = vadd.f32 %v1029_v56, %v481_v53 }
  0xef   :  { %v1330_v59 = vmax.f32 %v1266_v54, 0.0  ;;  %v1267_v60 = vadd.f32 %v2205_v6, %v1038_v55 }
  0xf0   :  { %v1328_v61 = vmax.f32 %v1264_v57, 0.0  ;;  %v1265_v62 = vadd.f32 %v2205_v6, %v1030_v58 }
  0xf1   :  { %1395 = vst.msk [vmem:[%s2532_s5 + $0x50] sm:$0xff] %vm1384_vm2, %v1330_v59  ;;  %v1331_v63 = vmax.f32 %v1267_v60, 0.0  ;;  %v1664_v0 = vpop.f32.mrb[12].mxu1 }
  0xf2   :  { %1393 = vst.msk [vmem:[%s2532_s5 + $0x40] sm:$0xff] %vm1384_vm2, %v1328_v61  ;;  %v1329_v1 = vmax.f32 %v1265_v62, 0.0  ;;  %v1730_v2 = vpop.f32.mrb[12].mxu0  ;;  %v494_v3 = vpop.f32.mrb[13].mxu1 }
  0xf3   :  { %1396 = vst.msk [vmem:[%s2532_s5 + $0x58] sm:$0xff] %vm1384_vm2, %v1331_v63  ;;  %v1051_v4 = vadd.f32 %v1730_v2, %v1664_v0  ;;  %v1042_v5 = vpop.f32.mrb[13].mxu0  ;;  %v1665_v7 = vpop.f32.mrb[14].mxu1 }
  0xf4   :  { %1394 = vst.msk [vmem:[%s2532_s5 + $0x48] sm:$0xff] %vm1384_vm2, %v1329_v1  ;;  %v1043_v8 = vadd.f32 %v1042_v5, %v494_v3  ;;  %v1731_v9 = vpop.f32.mrb[14].mxu0  ;;  %v497_v10 = vpop.f32.mrb[15].mxu1 }
  0xf5   :  { %v1270_v11 = vadd.f32 %v2205_v6, %v1051_v4  ;;  %v1054_v12 = vadd.f32 %v1731_v9, %v1665_v7  ;;  %v1045_v13 = vpop.f32.mrb[15].mxu0 }
  0xf6   :  { %v1268_v14 = vadd.f32 %v2205_v6, %v1043_v8  ;;  %v1046_v15 = vadd.f32 %v1045_v13, %v497_v10 }
  0xf7   :  { %v1334_v16 = vmax.f32 %v1270_v11, 0.0  ;;  %v1271_v17 = vadd.f32 %v2205_v6, %v1054_v12 }
  0xf8   :  { %v1332_v18 = vmax.f32 %v1268_v14, 0.0  ;;  %v1269_v19 = vadd.f32 %v2205_v6, %v1046_v15 }
  0xf9   :  { %1399 = vst.msk [vmem:[%s2532_s5 + $0x70] sm:$0xff] %vm1384_vm2, %v1334_v16  ;;  %v1335_v20 = vmax.f32 %v1271_v17, 0.0  ;;  %v1668_v21 = vpop.f32.mrb[16].mxu1 }
  0xfa   :  { %1397 = vst.msk [vmem:[%s2532_s5 + $0x60] sm:$0xff] %vm1384_vm2, %v1332_v18  ;;  %v1333_v22 = vmax.f32 %v1269_v19, 0.0  ;;  %v1734_v23 = vpop.f32.mrb[16].mxu0  ;;  %v510_v24 = vpop.f32.mrb[17].mxu1 }
  0xfb   :  { %1400 = vst.msk [vmem:[%s2532_s5 + $0x78] sm:$0xff] %vm1384_vm2, %v1335_v20  ;;  %v1067_v25 = vadd.f32 %v1734_v23, %v1668_v21  ;;  %v1058_v26 = vpop.f32.mrb[17].mxu0  ;;  %v1669_v27 = vpop.f32.mrb[18].mxu1 }
  0xfc   :  { %1398 = vst.msk [vmem:[%s2532_s5 + $0x68] sm:$0xff] %vm1384_vm2, %v1333_v22  ;;  %v1059_v28 = vadd.f32 %v1058_v26, %v510_v24  ;;  %v1735_v29 = vpop.f32.mrb[18].mxu0  ;;  %v513_v30 = vpop.f32.mrb[19].mxu1 }
  0xfd   :  { %v1274_v31 = vadd.f32 %v2205_v6, %v1067_v25  ;;  %v1070_v32 = vadd.f32 %v1735_v29, %v1669_v27  ;;  %v1061_v33 = vpop.f32.mrb[19].mxu0 }
  0xfe   :  { %v1272_v34 = vadd.f32 %v2205_v6, %v1059_v28  ;;  %v1062_v35 = vadd.f32 %v1061_v33, %v513_v30 }
  0xff   :  { %v1338_v36 = vmax.f32 %v1274_v31, 0.0  ;;  %v1275_v37 = vadd.f32 %v2205_v6, %v1070_v32 }
 0x100   :  { %v1336_v38 = vmax.f32 %v1272_v34, 0.0  ;;  %v1273_v39 = vadd.f32 %v2205_v6, %v1062_v35 }
 0x101   :  { %1403 = vst.msk [vmem:[%s2532_s5 + $0x90] sm:$0xff] %vm1384_vm2, %v1338_v36  ;;  %v1339_v40 = vmax.f32 %v1275_v37, 0.0  ;;  %v1672_v41 = vpop.f32.mrb[20].mxu1 }
 0x102   :  { %1401 = vst.msk [vmem:[%s2532_s5 + $0x80] sm:$0xff] %vm1384_vm2, %v1336_v38  ;;  %v1337_v42 = vmax.f32 %v1273_v39, 0.0  ;;  %v1738_v43 = vpop.f32.mrb[20].mxu0  ;;  %v526_v44 = vpop.f32.mrb[21].mxu1 }
 0x103   :  { %1404 = vst.msk [vmem:[%s2532_s5 + $0x98] sm:$0xff] %vm1384_vm2, %v1339_v40  ;;  %v1083_v45 = vadd.f32 %v1738_v43, %v1672_v41  ;;  %v1074_v46 = vpop.f32.mrb[21].mxu0  ;;  %v1673_v47 = vpop.f32.mrb[22].mxu1 }
 0x104   :  { %1402 = vst.msk [vmem:[%s2532_s5 + $0x88] sm:$0xff] %vm1384_vm2, %v1337_v42  ;;  %v1075_v48 = vadd.f32 %v1074_v46, %v526_v44  ;;  %v1739_v49 = vpop.f32.mrb[22].mxu0  ;;  %v529_v50 = vpop.f32.mrb[23].mxu1 }
 0x105   :  { %v1278_v51 = vadd.f32 %v2205_v6, %v1083_v45  ;;  %v1086_v52 = vadd.f32 %v1739_v49, %v1673_v47  ;;  %v1077_v53 = vpop.f32.mrb[23].mxu0 }
 0x106   :  { %v1276_v54 = vadd.f32 %v2205_v6, %v1075_v48  ;;  %v1078_v55 = vadd.f32 %v1077_v53, %v529_v50 }
 0x107   :  { %v1342_v56 = vmax.f32 %v1278_v51, 0.0  ;;  %v1279_v57 = vadd.f32 %v2205_v6, %v1086_v52 }
 0x108   :  { %v1340_v58 = vmax.f32 %v1276_v54, 0.0  ;;  %v1277_v59 = vadd.f32 %v2205_v6, %v1078_v55 }
 0x109   :  { %1407 = vst.msk [vmem:[%s2532_s5 + $0xb0] sm:$0xff] %vm1384_vm2, %v1342_v56  ;;  %v1343_v60 = vmax.f32 %v1279_v57, 0.0  ;;  %v1676_v61 = vpop.f32.mrb[24].mxu1 }
 0x10a   :  { %1405 = vst.msk [vmem:[%s2532_s5 + $0xa0] sm:$0xff] %vm1384_vm2, %v1340_v58  ;;  %v1341_v62 = vmax.f32 %v1277_v59, 0.0  ;;  %v1742_v63 = vpop.f32.mrb[24].mxu0  ;;  %v542_v0 = vpop.f32.mrb[25].mxu1 }
 0x10b   :  { %1408 = vst.msk [vmem:[%s2532_s5 + $0xb8] sm:$0xff] %vm1384_vm2, %v1343_v60  ;;  %v1099_v1 = vadd.f32 %v1742_v63, %v1676_v61  ;;  %v1090_v2 = vpop.f32.mrb[25].mxu0  ;;  %v1677_v3 = vpop.f32.mrb[26].mxu1 }
 0x10c   :  { %1406 = vst.msk [vmem:[%s2532_s5 + $0xa8] sm:$0xff] %vm1384_vm2, %v1341_v62  ;;  %v1091_v4 = vadd.f32 %v1090_v2, %v542_v0  ;;  %v1743_v5 = vpop.f32.mrb[26].mxu0  ;;  %v545_v7 = vpop.f32.mrb[27].mxu1 }
 0x10d   :  { %v1282_v8 = vadd.f32 %v2205_v6, %v1099_v1  ;;  %v1102_v9 = vadd.f32 %v1743_v5, %v1677_v3  ;;  %v1093_v10 = vpop.f32.mrb[27].mxu0 }
 0x10e   :  { %v1280_v11 = vadd.f32 %v2205_v6, %v1091_v4  ;;  %v1094_v12 = vadd.f32 %v1093_v10, %v545_v7 }
 0x10f   :  { %v1346_v13 = vmax.f32 %v1282_v8, 0.0  ;;  %v1283_v14 = vadd.f32 %v2205_v6, %v1102_v9 }
 0x110   :  { %v1344_v15 = vmax.f32 %v1280_v11, 0.0  ;;  %v1281_v16 = vadd.f32 %v2205_v6, %v1094_v12 }
 0x111   :  { %1411 = vst.msk [vmem:[%s2532_s5 + $0xd0] sm:$0xff] %vm1384_vm2, %v1346_v13  ;;  %v1347_v17 = vmax.f32 %v1283_v14, 0.0  ;;  %v1680_v18 = vpop.f32.mrb[28].mxu1 }
 0x112   :  { %1409 = vst.msk [vmem:[%s2532_s5 + $0xc0] sm:$0xff] %vm1384_vm2, %v1344_v15  ;;  %v1345_v19 = vmax.f32 %v1281_v16, 0.0  ;;  %v1746_v20 = vpop.f32.mrb[28].mxu0  ;;  %v558_v21 = vpop.f32.mrb[29].mxu1 }
 0x113   :  { %1412 = vst.msk [vmem:[%s2532_s5 + $0xd8] sm:$0xff] %vm1384_vm2, %v1347_v17  ;;  %v1115_v22 = vadd.f32 %v1746_v20, %v1680_v18  ;;  %v1106_v23 = vpop.f32.mrb[29].mxu0  ;;  %v1681_v24 = vpop.f32.mrb[30].mxu1 }
 0x114   :  { %1410 = vst.msk [vmem:[%s2532_s5 + $0xc8] sm:$0xff] %vm1384_vm2, %v1345_v19  ;;  %v1107_v25 = vadd.f32 %v1106_v23, %v558_v21  ;;  %v1747_v26 = vpop.f32.mrb[30].mxu0  ;;  %v561_v27 = vpop.f32.mrb[31].mxu1 }
 0x115   :  { %v1286_v28 = vadd.f32 %v2205_v6, %v1115_v22  ;;  %v1118_v29 = vadd.f32 %v1747_v26, %v1681_v24  ;;  %v1109_v30 = vpop.f32.mrb[31].mxu0 }
 0x116   :  { %v1284_v31 = vadd.f32 %v2205_v6, %v1107_v25  ;;  %v1110_v32 = vadd.f32 %v1109_v30, %v561_v27 }
 0x117   :  { %v1350_v33 = vmax.f32 %v1286_v28, 0.0  ;;  %v1287_v34 = vadd.f32 %v2205_v6, %v1118_v29 }
 0x118   :  { %v1348_v35 = vmax.f32 %v1284_v31, 0.0  ;;  %v1285_v36 = vadd.f32 %v2205_v6, %v1110_v32 }
 0x119   :  { %1415 = vst.msk [vmem:[%s2532_s5 + $0xf0] sm:$0xff] %vm1384_vm2, %v1350_v33  ;;  %v1351_v37 = vmax.f32 %v1287_v34, 0.0  ;;  %v1684_v38 = vpop.f32.mrb[32].mxu1 }
 0x11a   :  { %1413 = vst.msk [vmem:[%s2532_s5 + $0xe0] sm:$0xff] %vm1384_vm2, %v1348_v35  ;;  %v1349_v39 = vmax.f32 %v1285_v36, 0.0  ;;  %v1750_v40 = vpop.f32.mrb[32].mxu0  ;;  %v574_v41 = vpop.f32.mrb[33].mxu1 }
 0x11b   :  { %1416 = vst.msk [vmem:[%s2532_s5 + $0xf8] sm:$0xff] %vm1384_vm2, %v1351_v37  ;;  %v1131_v42 = vadd.f32 %v1750_v40, %v1684_v38  ;;  %v1122_v43 = vpop.f32.mrb[33].mxu0  ;;  %v1685_v44 = vpop.f32.mrb[34].mxu1 }
 0x11c   :  { %1414 = vst.msk [vmem:[%s2532_s5 + $0xe8] sm:$0xff] %vm1384_vm2, %v1349_v39  ;;  %v1123_v45 = vadd.f32 %v1122_v43, %v574_v41  ;;  %v1751_v46 = vpop.f32.mrb[34].mxu0  ;;  %v577_v47 = vpop.f32.mrb[35].mxu1 }
 0x11d   :  { %v1290_v48 = vadd.f32 %v2205_v6, %v1131_v42  ;;  %v1134_v49 = vadd.f32 %v1751_v46, %v1685_v44  ;;  %v1125_v50 = vpop.f32.mrb[35].mxu0 }
 0x11e   :  { %v1288_v51 = vadd.f32 %v2205_v6, %v1123_v45  ;;  %v1126_v52 = vadd.f32 %v1125_v50, %v577_v47 }
 0x11f   :  { %v1354_v53 = vmax.f32 %v1290_v48, 0.0  ;;  %v1291_v54 = vadd.f32 %v2205_v6, %v1134_v49 }
 0x120   :  { %v1352_v55 = vmax.f32 %v1288_v51, 0.0  ;;  %v1289_v56 = vadd.f32 %v2205_v6, %v1126_v52 }
 0x121   :  { %1419 = vst.msk [vmem:[%s2532_s5 + $0x110] sm:$0xff] %vm1384_vm2, %v1354_v53  ;;  %v1355_v57 = vmax.f32 %v1291_v54, 0.0  ;;  %v1688_v58 = vpop.f32.mrb[36].mxu1 }
 0x122   :  { %1417 = vst.msk [vmem:[%s2532_s5 + $0x100] sm:$0xff] %vm1384_vm2, %v1352_v55  ;;  %v1353_v59 = vmax.f32 %v1289_v56, 0.0  ;;  %v1754_v60 = vpop.f32.mrb[36].mxu0  ;;  %v590_v61 = vpop.f32.mrb[37].mxu1 }
 0x123   :  { %1420 = vst.msk [vmem:[%s2532_s5 + $0x118] sm:$0xff] %vm1384_vm2, %v1355_v57  ;;  %v1147_v62 = vadd.f32 %v1754_v60, %v1688_v58  ;;  %v1138_v63 = vpop.f32.mrb[37].mxu0  ;;  %v1689_v0 = vpop.f32.mrb[38].mxu1 }
 0x124   :  { %1418 = vst.msk [vmem:[%s2532_s5 + $0x108] sm:$0xff] %vm1384_vm2, %v1353_v59  ;;  %v1139_v1 = vadd.f32 %v1138_v63, %v590_v61  ;;  %v1755_v2 = vpop.f32.mrb[38].mxu0  ;;  %v593_v3 = vpop.f32.mrb[39].mxu1 }
 0x125   :  { %v1294_v4 = vadd.f32 %v2205_v6, %v1147_v62  ;;  %v1150_v5 = vadd.f32 %v1755_v2, %v1689_v0  ;;  %v1141_v7 = vpop.f32.mrb[39].mxu0 }
 0x126   :  { %v1292_v8 = vadd.f32 %v2205_v6, %v1139_v1  ;;  %v1142_v9 = vadd.f32 %v1141_v7, %v593_v3 }
 0x127   :  { %v1358_v10 = vmax.f32 %v1294_v4, 0.0  ;;  %v1295_v11 = vadd.f32 %v2205_v6, %v1150_v5 }
 0x128   :  { %v1356_v12 = vmax.f32 %v1292_v8, 0.0  ;;  %v1293_v13 = vadd.f32 %v2205_v6, %v1142_v9 }
 0x129   :  { %1423 = vst.msk [vmem:[%s2532_s5 + $0x130] sm:$0xff] %vm1384_vm2, %v1358_v10  ;;  %v1359_v14 = vmax.f32 %v1295_v11, 0.0  ;;  %v1692_v15 = vpop.f32.mrb[40].mxu1 }
 0x12a   :  { %1421 = vst.msk [vmem:[%s2532_s5 + $0x120] sm:$0xff] %vm1384_vm2, %v1356_v12  ;;  %v1357_v16 = vmax.f32 %v1293_v13, 0.0  ;;  %v1758_v17 = vpop.f32.mrb[40].mxu0  ;;  %v606_v18 = vpop.f32.mrb[41].mxu1 }
 0x12b   :  { %1424 = vst.msk [vmem:[%s2532_s5 + $0x138] sm:$0xff] %vm1384_vm2, %v1359_v14  ;;  %v1163_v19 = vadd.f32 %v1758_v17, %v1692_v15  ;;  %v1154_v20 = vpop.f32.mrb[41].mxu0  ;;  %v1693_v21 = vpop.f32.mrb[42].mxu1 }
 0x12c   :  { %1422 = vst.msk [vmem:[%s2532_s5 + $0x128] sm:$0xff] %vm1384_vm2, %v1357_v16  ;;  %v1155_v22 = vadd.f32 %v1154_v20, %v606_v18  ;;  %v1759_v23 = vpop.f32.mrb[42].mxu0  ;;  %v609_v24 = vpop.f32.mrb[43].mxu1 }
 0x12d   :  { %v1298_v25 = vadd.f32 %v2205_v6, %v1163_v19  ;;  %v1166_v26 = vadd.f32 %v1759_v23, %v1693_v21  ;;  %v1157_v27 = vpop.f32.mrb[43].mxu0 }
 0x12e   :  { %v1296_v28 = vadd.f32 %v2205_v6, %v1155_v22  ;;  %v1158_v29 = vadd.f32 %v1157_v27, %v609_v24 }
 0x12f   :  { %v1362_v30 = vmax.f32 %v1298_v25, 0.0  ;;  %v1299_v31 = vadd.f32 %v2205_v6, %v1166_v26 }
 0x130   :  { %v1360_v32 = vmax.f32 %v1296_v28, 0.0  ;;  %v1297_v33 = vadd.f32 %v2205_v6, %v1158_v29 }
 0x131   :  { %1427 = vst.msk [vmem:[%s2532_s5 + $0x150] sm:$0xff] %vm1384_vm2, %v1362_v30  ;;  %v1363_v34 = vmax.f32 %v1299_v31, 0.0  ;;  %v1696_v35 = vpop.f32.mrb[44].mxu1 }
 0x132   :  { %1425 = vst.msk [vmem:[%s2532_s5 + $0x140] sm:$0xff] %vm1384_vm2, %v1360_v32  ;;  %v1361_v36 = vmax.f32 %v1297_v33, 0.0  ;;  %v1762_v37 = vpop.f32.mrb[44].mxu0  ;;  %v622_v38 = vpop.f32.mrb[45].mxu1 }
 0x133   :  { %1428 = vst.msk [vmem:[%s2532_s5 + $0x158] sm:$0xff] %vm1384_vm2, %v1363_v34  ;;  %v1179_v39 = vadd.f32 %v1762_v37, %v1696_v35  ;;  %v1170_v40 = vpop.f32.mrb[45].mxu0  ;;  %v1697_v41 = vpop.f32.mrb[46].mxu1 }
 0x134   :  { %1426 = vst.msk [vmem:[%s2532_s5 + $0x148] sm:$0xff] %vm1384_vm2, %v1361_v36  ;;  %v1171_v42 = vadd.f32 %v1170_v40, %v622_v38  ;;  %v1763_v43 = vpop.f32.mrb[46].mxu0  ;;  %v625_v44 = vpop.f32.mrb[47].mxu1 }
 0x135   :  { %v1302_v45 = vadd.f32 %v2205_v6, %v1179_v39  ;;  %v1182_v46 = vadd.f32 %v1763_v43, %v1697_v41  ;;  %v1173_v47 = vpop.f32.mrb[47].mxu0 }
 0x136   :  { %v1300_v48 = vadd.f32 %v2205_v6, %v1171_v42  ;;  %v1174_v49 = vadd.f32 %v1173_v47, %v625_v44 }
 0x137   :  { %v1366_v50 = vmax.f32 %v1302_v45, 0.0  ;;  %v1303_v51 = vadd.f32 %v2205_v6, %v1182_v46 }
 0x138   :  { %v1364_v52 = vmax.f32 %v1300_v48, 0.0  ;;  %v1301_v53 = vadd.f32 %v2205_v6, %v1174_v49 }
 0x139   :  { %1431 = vst.msk [vmem:[%s2532_s5 + $0x170] sm:$0xff] %vm1384_vm2, %v1366_v50  ;;  %v1367_v54 = vmax.f32 %v1303_v51, 0.0  ;;  %v1700_v55 = vpop.f32.mrb[48].mxu1 }
 0x13a   :  { %1429 = vst.msk [vmem:[%s2532_s5 + $0x160] sm:$0xff] %vm1384_vm2, %v1364_v52  ;;  %v1365_v56 = vmax.f32 %v1301_v53, 0.0  ;;  %v1766_v57 = vpop.f32.mrb[48].mxu0  ;;  %v638_v58 = vpop.f32.mrb[49].mxu1 }
 0x13b   :  { %1432 = vst.msk [vmem:[%s2532_s5 + $0x178] sm:$0xff] %vm1384_vm2, %v1367_v54  ;;  %v1195_v59 = vadd.f32 %v1766_v57, %v1700_v55  ;;  %v1186_v60 = vpop.f32.mrb[49].mxu0  ;;  %v1701_v61 = vpop.f32.mrb[50].mxu1 }
 0x13c   :  { %1430 = vst.msk [vmem:[%s2532_s5 + $0x168] sm:$0xff] %vm1384_vm2, %v1365_v56  ;;  %v1187_v62 = vadd.f32 %v1186_v60, %v638_v58  ;;  %v1767_v63 = vpop.f32.mrb[50].mxu0  ;;  %v641_v0 = vpop.f32.mrb[51].mxu1 }
 0x13d   :  { %v1306_v1 = vadd.f32 %v2205_v6, %v1195_v59  ;;  %v1198_v2 = vadd.f32 %v1767_v63, %v1701_v61  ;;  %v1189_v3 = vpop.f32.mrb[51].mxu0 }
 0x13e   :  { %v1304_v4 = vadd.f32 %v2205_v6, %v1187_v62  ;;  %v1190_v5 = vadd.f32 %v1189_v3, %v641_v0 }
 0x13f   :  { %v1370_v7 = vmax.f32 %v1306_v1, 0.0  ;;  %v1307_v8 = vadd.f32 %v2205_v6, %v1198_v2 }
 0x140   :  { %v1368_v9 = vmax.f32 %v1304_v4, 0.0  ;;  %v1305_v10 = vadd.f32 %v2205_v6, %v1190_v5 }
 0x141   :  { %1435 = vst.msk [vmem:[%s2532_s5 + $0x190] sm:$0xff] %vm1384_vm2, %v1370_v7  ;;  %v1371_v11 = vmax.f32 %v1307_v8, 0.0  ;;  %v1704_v12 = vpop.f32.mrb[52].mxu1 }
 0x142   :  { %1433 = vst.msk [vmem:[%s2532_s5 + $0x180] sm:$0xff] %vm1384_vm2, %v1368_v9  ;;  %v1369_v13 = vmax.f32 %v1305_v10, 0.0  ;;  %v1770_v14 = vpop.f32.mrb[52].mxu0  ;;  %v654_v15 = vpop.f32.mrb[53].mxu1 }
 0x143   :  { %1436 = vst.msk [vmem:[%s2532_s5 + $0x198] sm:$0xff] %vm1384_vm2, %v1371_v11  ;;  %v1211_v16 = vadd.f32 %v1770_v14, %v1704_v12  ;;  %v1202_v17 = vpop.f32.mrb[53].mxu0  ;;  %v1705_v18 = vpop.f32.mrb[54].mxu1 }
 0x144   :  { %1434 = vst.msk [vmem:[%s2532_s5 + $0x188] sm:$0xff] %vm1384_vm2, %v1369_v13  ;;  %v1203_v19 = vadd.f32 %v1202_v17, %v654_v15  ;;  %v1771_v20 = vpop.f32.mrb[54].mxu0  ;;  %v657_v21 = vpop.f32.mrb[55].mxu1 }
 0x145   :  { %v1310_v22 = vadd.f32 %v2205_v6, %v1211_v16  ;;  %v1214_v23 = vadd.f32 %v1771_v20, %v1705_v18  ;;  %v1205_v24 = vpop.f32.mrb[55].mxu0 }
 0x146   :  { %v1308_v25 = vadd.f32 %v2205_v6, %v1203_v19  ;;  %v1206_v26 = vadd.f32 %v1205_v24, %v657_v21 }
 0x147   :  { %v1374_v27 = vmax.f32 %v1310_v22, 0.0  ;;  %v1311_v28 = vadd.f32 %v2205_v6, %v1214_v23 }
 0x148   :  { %v1372_v29 = vmax.f32 %v1308_v25, 0.0  ;;  %v1309_v30 = vadd.f32 %v2205_v6, %v1206_v26 }
 0x149   :  { %1439 = vst.msk [vmem:[%s2532_s5 + $0x1b0] sm:$0xff] %vm1384_vm2, %v1374_v27  ;;  %v1375_v31 = vmax.f32 %v1311_v28, 0.0  ;;  %v1708_v32 = vpop.f32.mrb[56].mxu1 }
 0x14a   :  { %1437 = vst.msk [vmem:[%s2532_s5 + $0x1a0] sm:$0xff] %vm1384_vm2, %v1372_v29  ;;  %v1373_v33 = vmax.f32 %v1309_v30, 0.0  ;;  %v1774_v34 = vpop.f32.mrb[56].mxu0  ;;  %v670_v35 = vpop.f32.mrb[57].mxu1 }
 0x14b   :  { %1440 = vst.msk [vmem:[%s2532_s5 + $0x1b8] sm:$0xff] %vm1384_vm2, %v1375_v31  ;;  %v1227_v36 = vadd.f32 %v1774_v34, %v1708_v32  ;;  %v1218_v37 = vpop.f32.mrb[57].mxu0  ;;  %v1709_v38 = vpop.f32.mrb[58].mxu1 }
 0x14c   :  { %1438 = vst.msk [vmem:[%s2532_s5 + $0x1a8] sm:$0xff] %vm1384_vm2, %v1373_v33  ;;  %v1219_v39 = vadd.f32 %v1218_v37, %v670_v35  ;;  %v1775_v40 = vpop.f32.mrb[58].mxu0  ;;  %v673_v41 = vpop.f32.mrb[59].mxu1 }
 0x14d   :  { %v1314_v42 = vadd.f32 %v2205_v6, %v1227_v36  ;;  %v1230_v43 = vadd.f32 %v1775_v40, %v1709_v38  ;;  %v1221_v44 = vpop.f32.mrb[59].mxu0 }
 0x14e   :  { %v1312_v45 = vadd.f32 %v2205_v6, %v1219_v39  ;;  %v1222_v46 = vadd.f32 %v1221_v44, %v673_v41 }
 0x14f   :  { %v1378_v47 = vmax.f32 %v1314_v42, 0.0  ;;  %v1315_v48 = vadd.f32 %v2205_v6, %v1230_v43 }
 0x150   :  { %v1376_v49 = vmax.f32 %v1312_v45, 0.0  ;;  %v1313_v50 = vadd.f32 %v2205_v6, %v1222_v46 }
 0x151   :  { %1443 = vst.msk [vmem:[%s2532_s5 + $0x1d0] sm:$0xff] %vm1384_vm2, %v1378_v47  ;;  %v1379_v51 = vmax.f32 %v1315_v48, 0.0  ;;  %v1712_v52 = vpop.f32.mrb[60].mxu1 }
 0x152   :  { %1441 = vst.msk [vmem:[%s2532_s5 + $0x1c0] sm:$0xff] %vm1384_vm2, %v1376_v49  ;;  %v1377_v53 = vmax.f32 %v1313_v50, 0.0  ;;  %v1778_v54 = vpop.f32.mrb[60].mxu0  ;;  %v686_v55 = vpop.f32.mrb[61].mxu1 }
 0x153   :  { %1444 = vst.msk [vmem:[%s2532_s5 + $0x1d8] sm:$0xff] %vm1384_vm2, %v1379_v51  ;;  %v1243_v56 = vadd.f32 %v1778_v54, %v1712_v52  ;;  %v1234_v57 = vpop.f32.mrb[61].mxu0  ;;  %v1713_v58 = vpop.f32.mrb[62].mxu1 }
 0x154   :  { %1442 = vst.msk [vmem:[%s2532_s5 + $0x1c8] sm:$0xff] %vm1384_vm2, %v1377_v53  ;;  %v1235_v59 = vadd.f32 %v1234_v57, %v686_v55  ;;  %v1779_v60 = vpop.f32.mrb[62].mxu0  ;;  %v689_v61 = vpop.f32.mrb[63].mxu1 }
 0x155   :  { %v1318_v62 = vadd.f32 %v2205_v6, %v1243_v56  ;;  %v1246_v63 = vadd.f32 %v1779_v60, %v1713_v58  ;;  %v1237_v0 = vpop.f32.mrb[63].mxu0 }
 0x156   :  { %v1316_v1 = vadd.f32 %v2205_v6, %v1235_v59  ;;  %v1238_v2 = vadd.f32 %v1237_v0, %v689_v61 }
 0x157   :  { %v1382_v3 = vmax.f32 %v1318_v62, 0.0  ;;  %v1319_v4 = vadd.f32 %v2205_v6, %v1246_v63 }
 0x158   :  { %v1380_v5 = vmax.f32 %v1316_v1, 0.0  ;;  %v1317_v7 = vadd.f32 %v2205_v6, %v1238_v2 }
 0x159   :  { %1447 = vst.msk [vmem:[%s2532_s5 + $0x1f0] sm:$0xff] %vm1384_vm2, %v1382_v3  ;;  %v1383_v8 = vmax.f32 %v1319_v4, 0.0 }
 0x15a   :  { %1445 = vst.msk [vmem:[%s2532_s5 + $0x1e0] sm:$0xff] %vm1384_vm2, %v1380_v5  ;;  %v1381_v9 = vmax.f32 %v1317_v7, 0.0 }
 0x15b   :  { %1448 = vst.msk [vmem:[%s2532_s5 + $0x1f8] sm:$0xff] %vm1384_vm2, %v1383_v8 }
 0x15c   :  { %1446 = vst.msk [vmem:[%s2532_s5 + $0x1e8] sm:$0xff] %vm1384_vm2, %v1381_v9 }

// kernel: bottleneck_forward.3
= control target key start
LH: loop header
LB: loop body
LE: loop exit
PB: predicated region body
PF: predicated region fallthrough
CT: control target
= control target key end

     0   :  { %vm470_vm0 = vcmask 1041408   ;;  %vm19_vm1 = vcmask 31744   ;;  %v1748_v1 = vmov 0.0   ;;  %vm1349_vm2 = vcmask 27648   ;;  %s2423_s1 = inlined_call_operand.vmem [shape: bf16[4,4], index: 1, kind: input, shape index: {}]   ;;  %s2424_s0 = inlined_call_operand.vmem [shape: bf16[512,4], index: 0, kind: input, shape index: {}]   ;;  %s2425_s2 = inlined_call_operand.vmem [shape: f32[1,4], index: 2, kind: input, shape index: {}]   ;;  %s2426_s3 = inlined_call_operand.vmem [shape: bf16[512,4], index: 3, kind: output, shape index: {}]  }
   0x1   :  { %v1772_v0 = vld [vmem:[%s2423_s1] sm:$0x3]  ;;  %22 = vst.msk [vmem:[#allocation2 + $0x10] sm:$0xff] %vm19_vm1, %v1748_v1  ;;  %20 = vst.msk [vmem:[#allocation2] sm:$0xff] %vm19_vm1, %v1748_v1  ;;  %v1717_v5 = vld [vmem:[%s2424_s0 + $0x8] sm:$0xff]  }
   0x2   :  { %21 = vst.msk [vmem:[#allocation2 + $0x8] sm:$0xff] %vm19_vm1, %v1748_v1  ;;  %23 = vst.msk [vmem:[#allocation2 + $0x18] sm:$0xff] %vm19_vm1, %v1748_v1  ;;  %1712 = vmatprep.subr.msk.bf16.mxu0 %vm470_vm0, %v1772_v0  ;;  %1713 = vmatprep.subr.msk.bf16.mxu1 %vm470_vm0, %v1772_v0  ;;  %v472_v2 = vsel %vm470_vm0, %v1772_v0, 0  ;;  %v1715_v3 = vld [vmem:[%s2424_s0] sm:$0xff]   ;;  %v1718_v6 = vld [vmem:[%s2424_s0 + $0x88] sm:$0xff]  }
   0x3   :  { %24 = vst.msk [vmem:[#allocation2 + $0x20] sm:$0xff] %vm19_vm1, %v1748_v1  ;;  %25 = vst.msk [vmem:[#allocation2 + $0x28] sm:$0xff] %vm19_vm1, %v1748_v1  ;;  %1645 = vmatpush3.bf16.msra.mxu0 %v472_v2  ;;  %1711 = vmatpush3.bf16.msra.mxu1 %v472_v2  ;;  %v1716_v4 = vld [vmem:[%s2424_s0 + $0x80] sm:$0xff]   ;;  %v1719_v7 = vld [vmem:[%s2424_s0 + $0x10] sm:$0xff]  }
   0x4   :  { %26 = vst.msk [vmem:[#allocation2 + $0x30] sm:$0xff] %vm19_vm1, %v1748_v1  ;;  %27 = vst.msk [vmem:[#allocation2 + $0x38] sm:$0xff] %vm19_vm1, %v1748_v1  ;;  %1646 = vmatprep.mubr.msk.bf16.mxu0 %vm19_vm1, %v1715_v3  ;;  %1678 = vmatprep.mubr.msk.bf16.mxu1 %vm19_vm1, %v1716_v4  ;;  %v1720_v8 = vld [vmem:[%s2424_s0 + $0x90] sm:$0xff]   ;;  %v1721_v9 = vld [vmem:[%s2424_s0 + $0x18] sm:$0xff]  }
   0x5   :  { %28 = vst.msk [vmem:[#allocation2 + $0x40] sm:$0xff] %vm19_vm1, %v1748_v1  ;;  %29 = vst.msk [vmem:[#allocation2 + $0x48] sm:$0xff] %vm19_vm1, %v1748_v1  ;;  %v1722_v10 = vld [vmem:[%s2424_s0 + $0x98] sm:$0xff]   ;;  %v1723_v11 = vld [vmem:[%s2424_s0 + $0x20] sm:$0xff]  }
   0x6   :  { %30 = vst.msk [vmem:[#allocation2 + $0x50] sm:$0xff] %vm19_vm1, %v1748_v1  ;;  %31 = vst.msk [vmem:[#allocation2 + $0x58] sm:$0xff] %vm19_vm1, %v1748_v1  ;;  %1647 = vmatmul.mubr.msk.bf16.vlgmr.msra.gmra.mrb[0].mxu0 %vm19_vm1, %v1717_v5  ;;  %1679 = vmatmul.mubr.msk.bf16.vlgmr.msra.gmra.mrb[0].mxu1 %vm19_vm1, %v1718_v6  ;;  %v1724_v12 = vld [vmem:[%s2424_s0 + $0xa0] sm:$0xff]   ;;  %v1725_v13 = vld [vmem:[%s2424_s0 + $0x28] sm:$0xff]  }
   0x7   :  { %32 = vst.msk [vmem:[#allocation2 + $0x60] sm:$0xff] %vm19_vm1, %v1748_v1  ;;  %33 = vst.msk [vmem:[#allocation2 + $0x68] sm:$0xff] %vm19_vm1, %v1748_v1  ;;  %1650 = vmatprep.mubr.msk.bf16.mxu0 %vm19_vm1, %v1719_v7  ;;  %1682 = vmatprep.mubr.msk.bf16.mxu1 %vm19_vm1, %v1720_v8  ;;  %v1726_v14 = vld [vmem:[%s2424_s0 + $0xa8] sm:$0xff]   ;;  %v1727_v15 = vld [vmem:[%s2424_s0 + $0x30] sm:$0xff]  }
   0x8   :  { %34 = vst.msk [vmem:[#allocation2 + $0x70] sm:$0xff] %vm19_vm1, %v1748_v1  ;;  %35 = vst.msk [vmem:[#allocation2 + $0x78] sm:$0xff] %vm19_vm1, %v1748_v1  ;;  %v1728_v16 = vld [vmem:[%s2424_s0 + $0xb0] sm:$0xff]   ;;  %v1729_v17 = vld [vmem:[%s2424_s0 + $0x38] sm:$0xff]  }
   0x9   :  { %36 = vst.msk [vmem:[#allocation2 + $0x80] sm:$0xff] %vm19_vm1, %v1748_v1  ;;  %37 = vst.msk [vmem:[#allocation2 + $0x88] sm:$0xff] %vm19_vm1, %v1748_v1  ;;  %v1730_v18 = vld [vmem:[%s2424_s0 + $0xb8] sm:$0xff]   ;;  %v1731_v19 = vld [vmem:[%s2424_s0 + $0x40] sm:$0xff]  }
   0xa   :  { %38 = vst.msk [vmem:[#allocation2 + $0x90] sm:$0xff] %vm19_vm1, %v1748_v1  ;;  %39 = vst.msk [vmem:[#allocation2 + $0x98] sm:$0xff] %vm19_vm1, %v1748_v1  ;;  %v1732_v20 = vld [vmem:[%s2424_s0 + $0xc0] sm:$0xff]   ;;  %v1733_v21 = vld [vmem:[%s2424_s0 + $0x48] sm:$0xff]  }
   0xb   :  { %40 = vst.msk [vmem:[#allocation2 + $0xa0] sm:$0xff] %vm19_vm1, %v1748_v1  ;;  %41 = vst.msk [vmem:[#allocation2 + $0xa8] sm:$0xff] %vm19_vm1, %v1748_v1  ;;  %v1734_v22 = vld [vmem:[%s2424_s0 + $0xc8] sm:$0xff]   ;;  %v1735_v23 = vld [vmem:[%s2424_s0 + $0x50] sm:$0xff]  }
   0xc   :  { %42 = vst.msk [vmem:[#allocation2 + $0xb0] sm:$0xff] %vm19_vm1, %v1748_v1  ;;  %43 = vst.msk [vmem:[#allocation2 + $0xb8] sm:$0xff] %vm19_vm1, %v1748_v1  ;;  %v1736_v24 = vld [vmem:[%s2424_s0 + $0xd0] sm:$0xff]   ;;  %v1737_v25 = vld [vmem:[%s2424_s0 + $0x58] sm:$0xff]  }
   0xd   :  { %44 = vst.msk [vmem:[#allocation2 + $0xc0] sm:$0xff] %vm19_vm1, %v1748_v1  ;;  %45 = vst.msk [vmem:[#allocation2 + $0xc8] sm:$0xff] %vm19_vm1, %v1748_v1  ;;  %v1738_v26 = vld [vmem:[%s2424_s0 + $0xd8] sm:$0xff]   ;;  %v1739_v27 = vld [vmem:[%s2424_s0 + $0x60] sm:$0xff]  }
   0xe   :  { %46 = vst.msk [vmem:[#allocation2 + $0xd0] sm:$0xff] %vm19_vm1, %v1748_v1  ;;  %47 = vst.msk [vmem:[#allocation2 + $0xd8] sm:$0xff] %vm19_vm1, %v1748_v1  ;;  %1651 = vmatmul.mubr.msk.bf16.gmra.mrb[4].mxu0 %vm19_vm1, %v1721_v9  ;;  %1683 = vmatmul.mubr.msk.bf16.gmra.mrb[4].mxu1 %vm19_vm1, %v1722_v10  ;;  %v1740_v28 = vld [vmem:[%s2424_s0 + $0xe0] sm:$0xff]   ;;  %v1741_v29 = vld [vmem:[%s2424_s0 + $0x68] sm:$0xff]  }
   0xf   :  { %48 = vst.msk [vmem:[#allocation2 + $0xe0] sm:$0xff] %vm19_vm1, %v1748_v1  ;;  %49 = vst.msk [vmem:[#allocation2 + $0xe8] sm:$0xff] %vm19_vm1, %v1748_v1  ;;  %1654 = vmatprep.mubr.msk.bf16.mxu0 %vm19_vm1, %v1723_v11  ;;  %1686 = vmatprep.mubr.msk.bf16.mxu1 %vm19_vm1, %v1724_v12  ;;  %v1742_v30 = vld [vmem:[%s2424_s0 + $0xe8] sm:$0xff]   ;;  %v1743_v31 = vld [vmem:[%s2424_s0 + $0x70] sm:$0xff]  }
  0x10   :  { %50 = vst.msk [vmem:[#allocation2 + $0xf0] sm:$0xff] %vm19_vm1, %v1748_v1  ;;  %51 = vst.msk [vmem:[#allocation2 + $0xf8] sm:$0xff] %vm19_vm1, %v1748_v1  ;;  %v1744_v32 = vld [vmem:[%s2424_s0 + $0xf0] sm:$0xff]   ;;  %v1745_v33 = vld [vmem:[%s2424_s0 + $0x78] sm:$0xff]  }
  0x11   :  { %52 = vst.msk [vmem:[#allocation2 + $0x100] sm:$0xff] %vm19_vm1, %v1748_v1  ;;  %53 = vst.msk [vmem:[#allocation2 + $0x108] sm:$0xff] %vm19_vm1, %v1748_v1  ;;  %v1746_v34 = vld [vmem:[%s2424_s0 + $0xf8] sm:$0xff]   ;;  %v86_v35 = vld [vmem:[#allocation2 + $0x10] sm:$0xff] }
  0x12   :  { %54 = vst.msk [vmem:[#allocation2 + $0x110] sm:$0xff] %vm19_vm1, %v1748_v1  ;;  %55 = vst.msk [vmem:[#allocation2 + $0x118] sm:$0xff] %vm19_vm1, %v1748_v1  ;;  %v84_v37 = vld [vmem:[#allocation2] sm:$0xff]  ;;  %v87_v40 = vld [vmem:[#allocation2 + $0x18] sm:$0xff] }
  0x13   :  { %56 = vst.msk [vmem:[#allocation2 + $0x120] sm:$0xff] %vm19_vm1, %v1748_v1  ;;  %57 = vst.msk [vmem:[#allocation2 + $0x128] sm:$0xff] %vm19_vm1, %v1748_v1  ;;  %v85_v45 = vld [vmem:[#allocation2 + $0x8] sm:$0xff]  ;;  %v90_v59 = vld [vmem:[#allocation2 + $0x30] sm:$0xff] }
  0x14   :  { %58 = vst.msk [vmem:[#allocation2 + $0x130] sm:$0xff] %vm19_vm1, %v1748_v1  ;;  %59 = vst.msk [vmem:[#allocation2 + $0x138] sm:$0xff] %vm19_vm1, %v1748_v1  ;;  %v88_v61 = vld [vmem:[#allocation2 + $0x20] sm:$0xff]  ;;  %v89_v6 = vld [vmem:[#allocation2 + $0x28] sm:$0xff] }
  0x15   :  { %60 = vst.msk [vmem:[#allocation2 + $0x140] sm:$0xff] %vm19_vm1, %v1748_v1  ;;  %61 = vst.msk [vmem:[#allocation2 + $0x148] sm:$0xff] %vm19_vm1, %v1748_v1  ;;  %v2047_v62 = vld [vmem:[%s2425_s2] ss:$0 sm:$0xff] }
  0x16   :  { %62 = vst.msk [vmem:[#allocation2 + $0x150] sm:$0xff] %vm19_vm1, %v1748_v1  ;;  %63 = vst.msk [vmem:[#allocation2 + $0x158] sm:$0xff] %vm19_vm1, %v1748_v1  ;;  %1655 = vmatmul.mubr.msk.bf16.gmra.mrb[8].mxu0 %vm19_vm1, %v1725_v13  ;;  %1687 = vmatmul.mubr.msk.bf16.gmra.mrb[8].mxu1 %vm19_vm1, %v1726_v14 }
  0x17   :  { %64 = vst.msk [vmem:[#allocation2 + $0x160] sm:$0xff] %vm19_vm1, %v1748_v1  ;;  %65 = vst.msk [vmem:[#allocation2 + $0x168] sm:$0xff] %vm19_vm1, %v1748_v1  ;;  %1658 = vmatprep.mubr.msk.bf16.mxu0 %vm19_vm1, %v1727_v15  ;;  %1690 = vmatprep.mubr.msk.bf16.mxu1 %vm19_vm1, %v1728_v16 }
  0x18   :  { %66 = vst.msk [vmem:[#allocation2 + $0x170] sm:$0xff] %vm19_vm1, %v1748_v1  ;;  %67 = vst.msk [vmem:[#allocation2 + $0x178] sm:$0xff] %vm19_vm1, %v1748_v1  ;;  %v116_v39 = vld [vmem:[#allocation2 + $0x100] sm:$0xff]  ;;  %v117_v50 = vld [vmem:[#allocation2 + $0x108] sm:$0xff] }
  0x19   :  { %68 = vst.msk [vmem:[#allocation2 + $0x180] sm:$0xff] %vm19_vm1, %v1748_v1  ;;  %69 = vst.msk [vmem:[#allocation2 + $0x188] sm:$0xff] %vm19_vm1, %v1748_v1  ;;  %v118_v36 = vld [vmem:[#allocation2 + $0x110] sm:$0xff]  ;;  %v119_v44 = vld [vmem:[#allocation2 + $0x118] sm:$0xff] }
  0x1a   :  { %70 = vst.msk [vmem:[#allocation2 + $0x190] sm:$0xff] %vm19_vm1, %v1748_v1  ;;  %71 = vst.msk [vmem:[#allocation2 + $0x198] sm:$0xff] %vm19_vm1, %v1748_v1  ;;  %v120_v0 = vld [vmem:[#allocation2 + $0x120] sm:$0xff]  ;;  %v121_v12 = vld [vmem:[#allocation2 + $0x128] sm:$0xff] }
  0x1b   :  { %72 = vst.msk [vmem:[#allocation2 + $0x1a0] sm:$0xff] %vm19_vm1, %v1748_v1  ;;  %73 = vst.msk [vmem:[#allocation2 + $0x1a8] sm:$0xff] %vm19_vm1, %v1748_v1  ;;  %v122_v60 = vld [vmem:[#allocation2 + $0x130] sm:$0xff]  ;;  %v123_v5 = vld [vmem:[#allocation2 + $0x138] sm:$0xff] }
  0x1c   :  { %74 = vst.msk [vmem:[#allocation2 + $0x1b0] sm:$0xff] %vm19_vm1, %v1748_v1  ;;  %75 = vst.msk [vmem:[#allocation2 + $0x1b8] sm:$0xff] %vm19_vm1, %v1748_v1 }
  0x1d   :  { %76 = vst.msk [vmem:[#allocation2 + $0x1c0] sm:$0xff] %vm19_vm1, %v1748_v1  ;;  %77 = vst.msk [vmem:[#allocation2 + $0x1c8] sm:$0xff] %vm19_vm1, %v1748_v1 }
  0x1e   :  { %78 = vst.msk [vmem:[#allocation2 + $0x1d0] sm:$0xff] %vm19_vm1, %v1748_v1  ;;  %79 = vst.msk [vmem:[#allocation2 + $0x1d8] sm:$0xff] %vm19_vm1, %v1748_v1  ;;  %1659 = vmatmul.mubr.msk.bf16.gmra.mrb[12].mxu0 %vm19_vm1, %v1729_v17  ;;  %1691 = vmatmul.mubr.msk.bf16.gmra.mrb[12].mxu1 %vm19_vm1, %v1730_v18 }
  0x1f   :  { %80 = vst.msk [vmem:[#allocation2 + $0x1e0] sm:$0xff] %vm19_vm1, %v1748_v1  ;;  %81 = vst.msk [vmem:[#allocation2 + $0x1e8] sm:$0xff] %vm19_vm1, %v1748_v1  ;;  %1662 = vmatprep.mubr.msk.bf16.mxu0 %vm19_vm1, %v1731_v19  ;;  %1694 = vmatprep.mubr.msk.bf16.mxu1 %vm19_vm1, %v1732_v20 }
  0x20   :  { %82 = vst.msk [vmem:[#allocation2 + $0x1f0] sm:$0xff] %vm19_vm1, %v1748_v1  ;;  %83 = vst.msk [vmem:[#allocation2 + $0x1f8] sm:$0xff] %vm19_vm1, %v1748_v1  ;;  %v91_v1 = vld [vmem:[#allocation2 + $0x38] sm:$0xff] }
  0x26   :  { %1663 = vmatmul.mubr.msk.bf16.gmra.mrb[16].mxu0 %vm19_vm1, %v1733_v21  ;;  %1695 = vmatmul.mubr.msk.bf16.gmra.mrb[16].mxu1 %vm19_vm1, %v1734_v22 }
  0x27   :  { %1666 = vmatprep.mubr.msk.bf16.mxu0 %vm19_vm1, %v1735_v23  ;;  %1698 = vmatprep.mubr.msk.bf16.mxu1 %vm19_vm1, %v1736_v24 }
  0x2e   :  { %1667 = vmatmul.mubr.msk.bf16.gmra.mrb[20].mxu0 %vm19_vm1, %v1737_v25  ;;  %1699 = vmatmul.mubr.msk.bf16.gmra.mrb[20].mxu1 %vm19_vm1, %v1738_v26 }
  0x2f   :  { %1670 = vmatprep.mubr.msk.bf16.mxu0 %vm19_vm1, %v1739_v27  ;;  %1702 = vmatprep.mubr.msk.bf16.mxu1 %vm19_vm1, %v1740_v28 }
  0x36   :  { %1671 = vmatmul.mubr.msk.bf16.gmra.mrb[24].mxu0 %vm19_vm1, %v1741_v29  ;;  %1703 = vmatmul.mubr.msk.bf16.gmra.mrb[24].mxu1 %vm19_vm1, %v1742_v30 }
  0x37   :  { %1674 = vmatprep.mubr.msk.bf16.mxu0 %vm19_vm1, %v1743_v31  ;;  %1706 = vmatprep.mubr.msk.bf16.mxu1 %vm19_vm1, %v1744_v32 }
  0x3e   :  { %1675 = vmatmul.mubr.msk.bf16.gmra.mrb[28].mxu0 %vm19_vm1, %v1745_v33  ;;  %1707 = vmatmul.mubr.msk.bf16.gmra.mrb[28].mxu1 %vm19_vm1, %v1746_v34 }
  0xd9   :  { %v1648_v38 = vpop.f32.mrb[0].mxu0  ;;  %v1680_v42 = vpop.f32.mrb[0].mxu1 }
  0xda   :  { %v765_v41 = vadd.f32 %v1648_v38, %v86_v35  ;;  %v508_v43 = vpop.f32.mrb[1].mxu0  ;;  %v797_v46 = vadd.f32 %v1680_v42, %v118_v36  ;;  %v636_v48 = vpop.f32.mrb[1].mxu1  ;;  %v94_v38 = vld [vmem:[#allocation2 + $0x50] sm:$0xff] }
  0xdb   :  { %v763_v47 = vadd.f32 %v508_v43, %v84_v37  ;;  %v1649_v49 = vpop.f32.mrb[2].mxu0  ;;  %v795_v51 = vadd.f32 %v636_v48, %v116_v39  ;;  %v1681_v53 = vpop.f32.mrb[2].mxu1  ;;  %v126_v43 = vld [vmem:[#allocation2 + $0x150] sm:$0xff] }
  0xdc   :  { %829 = vst.msk [vmem:[#allocation2 + $0x10] sm:$0xff] %vm19_vm1, %v765_v41  ;;  %v766_v52 = vadd.f32 %v1649_v49, %v87_v40  ;;  %v511_v54 = vpop.f32.mrb[3].mxu0  ;;  %861 = vst.msk [vmem:[#allocation2 + $0x110] sm:$0xff] %vm19_vm1, %v797_v46  ;;  %v798_v55 = vadd.f32 %v1681_v53, %v119_v44  ;;  %v639_v57 = vpop.f32.mrb[3].mxu1  ;;  %v92_v44 = vld [vmem:[#allocation2 + $0x40] sm:$0xff] }
  0xdd   :  { %827 = vst.msk [vmem:[#allocation2] sm:$0xff] %vm19_vm1, %v763_v47  ;;  %v764_v56 = vadd.f32 %v511_v54, %v85_v45  ;;  %859 = vst.msk [vmem:[#allocation2 + $0x100] sm:$0xff] %vm19_vm1, %v795_v51  ;;  %v796_v58 = vadd.f32 %v639_v57, %v117_v50  ;;  %v124_v50 = vld [vmem:[#allocation2 + $0x140] sm:$0xff]  ;;  %v95_v51 = vld [vmem:[#allocation2 + $0x58] sm:$0xff] }
  0xde   :  { %830 = vst.msk [vmem:[#allocation2 + $0x18] sm:$0xff] %vm19_vm1, %v766_v52  ;;  %862 = vst.msk [vmem:[#allocation2 + $0x118] sm:$0xff] %vm19_vm1, %v798_v55 }
  0xdf   :  { %828 = vst.msk [vmem:[#allocation2 + $0x8] sm:$0xff] %vm19_vm1, %v764_v56  ;;  %860 = vst.msk [vmem:[#allocation2 + $0x108] sm:$0xff] %vm19_vm1, %v796_v58  ;;  %v127_v58 = vld [vmem:[#allocation2 + $0x158] sm:$0xff] }
  0xe1   :  { %v1652_v63 = vpop.f32.mrb[4].mxu0  ;;  %v1684_v3 = vpop.f32.mrb[4].mxu1 }
  0xe2   :  { %v769_v2 = vadd.f32 %v1652_v63, %v90_v59  ;;  %v524_v4 = vpop.f32.mrb[5].mxu0  ;;  %v801_v8 = vadd.f32 %v1684_v3, %v122_v60  ;;  %v652_v10 = vpop.f32.mrb[5].mxu1  ;;  %v93_v59 = vld [vmem:[#allocation2 + $0x48] sm:$0xff] }
  0xe3   :  { %v896_v7 = vld [vmem:[#allocation2 + $0x10] sm:$0xff]  ;;  %v767_v9 = vadd.f32 %v524_v4, %v88_v61  ;;  %v1653_v11 = vpop.f32.mrb[6].mxu0  ;;  %v799_v16 = vadd.f32 %v652_v10, %v120_v0  ;;  %v1685_v18 = vpop.f32.mrb[6].mxu1  ;;  %v125_v4 = vld [vmem:[#allocation2 + $0x148] sm:$0xff] }
  0xe4   :  { %v967_v13 = vadd.f32 %v2047_v62, %v896_v7  ;;  %v928_v14 = vld [vmem:[#allocation2 + $0x110] sm:$0xff]  ;;  %v894_v15 = vld [vmem:[#allocation2] sm:$0xff]  ;;  %833 = vst.msk [vmem:[#allocation2 + $0x30] sm:$0xff] %vm19_vm1, %v769_v2  ;;  %v770_v17 = vadd.f32 %v1653_v11, %v91_v1  ;;  %v527_v19 = vpop.f32.mrb[7].mxu0  ;;  %865 = vst.msk [vmem:[#allocation2 + $0x130] sm:$0xff] %vm19_vm1, %v801_v8  ;;  %v802_v24 = vadd.f32 %v1685_v18, %v123_v5  ;;  %v655_v26 = vpop.f32.mrb[7].mxu1 }
  0xe5   :  { %v999_v20 = vadd.f32 %v2047_v62, %v928_v14  ;;  %v965_v21 = vadd.f32 %v2047_v62, %v894_v15  ;;  %v926_v22 = vld [vmem:[#allocation2 + $0x100] sm:$0xff]  ;;  %v897_v23 = vld [vmem:[#allocation2 + $0x18] sm:$0xff]  ;;  %831 = vst.msk [vmem:[#allocation2 + $0x20] sm:$0xff] %vm19_vm1, %v767_v9  ;;  %v768_v25 = vadd.f32 %v527_v19, %v89_v6  ;;  %863 = vst.msk [vmem:[#allocation2 + $0x120] sm:$0xff] %vm19_vm1, %v799_v16 }
  0xe6   :  { %v1031_v27 = vmax.f32 %v967_v13, 0.0  ;;  %v997_v28 = vadd.f32 %v2047_v62, %v926_v22  ;;  %v968_v29 = vadd.f32 %v2047_v62, %v897_v23  ;;  %v929_v30 = vld [vmem:[#allocation2 + $0x118] sm:$0xff]  ;;  %v895_v31 = vld [vmem:[#allocation2 + $0x8] sm:$0xff]  ;;  %834 = vst.msk [vmem:[#allocation2 + $0x38] sm:$0xff] %vm19_vm1, %v770_v17  ;;  %v800_v32 = vadd.f32 %v655_v26, %v121_v12  ;;  %866 = vst.msk [vmem:[#allocation2 + $0x138] sm:$0xff] %vm19_vm1, %v802_v24 }
  0xe7   :  { %v1063_v33 = vmax.f32 %v999_v20, 0.0  ;;  %v1029_v34 = vmax.f32 %v965_v21, 0.0  ;;  %v1000_v35 = vadd.f32 %v2047_v62, %v929_v30  ;;  %v966_v36 = vadd.f32 %v2047_v62, %v895_v31  ;;  %v927_v37 = vld [vmem:[#allocation2 + $0x108] sm:$0xff]  ;;  %832 = vst.msk [vmem:[#allocation2 + $0x28] sm:$0xff] %vm19_vm1, %v768_v25  ;;  %v98_v31 = vld [vmem:[#allocation2 + $0x70] sm:$0xff] }
  0xe8   :  { %v1549_v39 = vpack.c.bf16 %v1031_v27, %v1031_v27  ;;  %v1061_v40 = vmax.f32 %v997_v28, 0.0  ;;  %v1032_v41 = vmax.f32 %v968_v29, 0.0  ;;  %v998_v42 = vadd.f32 %v2047_v62, %v927_v37  ;;  %864 = vst.msk [vmem:[#allocation2 + $0x128] sm:$0xff] %vm19_vm1, %v800_v32  ;;  %v96_v37 = vld [vmem:[#allocation2 + $0x60] sm:$0xff] }
  0xe9   :  { %v1581_v45 = vpack.c.bf16 %v1063_v33, %v1063_v33  ;;  %v1547_v46 = vpack.c.bf16 %v1029_v34, %v1029_v34  ;;  %v1064_v47 = vmax.f32 %v1000_v35, 0.0  ;;  %v1030_v48 = vmax.f32 %v966_v36, 0.0  ;;  %v1656_v49 = vpop.f32.mrb[8].mxu0  ;;  %v1688_v56 = vpop.f32.mrb[8].mxu1  ;;  %v130_v36 = vld [vmem:[#allocation2 + $0x170] sm:$0xff] }
  0xea   :  { %1352 = vst.msk [vmem:[%s2426_s3 + $0x8] sm:$0xf] %vm1349_vm2, %v1549_v39  ;;  %v1579_v52 = vpack.c.bf16 %v1061_v40, %v1061_v40  ;;  %v1550_v53 = vpack.c.bf16 %v1032_v41, %v1032_v41  ;;  %v1062_v54 = vmax.f32 %v998_v42, 0.0  ;;  %v773_v55 = vadd.f32 %v1656_v49, %v94_v38  ;;  %v540_v57 = vpop.f32.mrb[9].mxu0  ;;  %v668_v2 = vpop.f32.mrb[9].mxu1 }
  0xeb   :  { %1384 = vst.msk [vmem:[%s2426_s3 + $0x88] sm:$0xf] %vm1349_vm2, %v1581_v45  ;;  %1350 = vst.msk [vmem:[%s2426_s3] sm:$0xf] %vm1349_vm2, %v1547_v46  ;;  %v1582_v60 = vpack.c.bf16 %v1064_v47, %v1064_v47  ;;  %v1548_v61 = vpack.c.bf16 %v1030_v48, %v1030_v48  ;;  %v900_v63 = vld [vmem:[#allocation2 + $0x30] sm:$0xff]  ;;  %v805_v0 = vadd.f32 %v1688_v56, %v126_v43  ;;  %v1657_v3 = vpop.f32.mrb[10].mxu0 }
  0xec   :  { %v771_v1 = vadd.f32 %v540_v57, %v92_v44  ;;  %1382 = vst.msk [vmem:[%s2426_s3 + $0x80] sm:$0xf] %vm1349_vm2, %v1579_v52  ;;  %1353 = vst.msk [vmem:[%s2426_s3 + $0xc] sm:$0xf] %vm1349_vm2, %v1550_v53  ;;  %v1580_v5 = vpack.c.bf16 %v1062_v54, %v1062_v54  ;;  %v971_v6 = vadd.f32 %v2047_v62, %v900_v63  ;;  %v932_v7 = vld [vmem:[#allocation2 + $0x130] sm:$0xff]  ;;  %v898_v8 = vld [vmem:[#allocation2 + $0x20] sm:$0xff] }
  0xed   :  { %837 = vst.msk [vmem:[#allocation2 + $0x50] sm:$0xff] %vm19_vm1, %v773_v55  ;;  %v803_v9 = vadd.f32 %v668_v2, %v124_v50  ;;  %v774_v10 = vadd.f32 %v1657_v3, %v95_v51  ;;  %v1689_v11 = vpop.f32.mrb[10].mxu1  ;;  %v543_v12 = vpop.f32.mrb[11].mxu0  ;;  %v1003_v13 = vadd.f32 %v2047_v62, %v932_v7  ;;  %v969_v14 = vadd.f32 %v2047_v62, %v898_v8  ;;  %v930_v15 = vld [vmem:[#allocation2 + $0x120] sm:$0xff]  ;;  %v901_v16 = vld [vmem:[#allocation2 + $0x38] sm:$0xff]  ;;  %v97_v52 = vld [vmem:[#allocation2 + $0x68] sm:$0xff] }
  0xee   :  { %1385 = vst.msk [vmem:[%s2426_s3 + $0x8c] sm:$0xf] %vm1349_vm2, %v1582_v60  ;;  %1351 = vst.msk [vmem:[%s2426_s3 + $0x4] sm:$0xf] %vm1349_vm2, %v1548_v61  ;;  %v806_v17 = vadd.f32 %v1689_v11, %v127_v58  ;;  %v772_v18 = vadd.f32 %v543_v12, %v93_v59  ;;  %v671_v19 = vpop.f32.mrb[11].mxu1  ;;  %v1035_v20 = vmax.f32 %v971_v6, 0.0  ;;  %v1001_v21 = vadd.f32 %v2047_v62, %v930_v15 }
  0xef   :  { %869 = vst.msk [vmem:[#allocation2 + $0x150] sm:$0xff] %vm19_vm1, %v805_v0  ;;  %835 = vst.msk [vmem:[#allocation2 + $0x40] sm:$0xff] %vm19_vm1, %v771_v1  ;;  %v972_v22 = vadd.f32 %v2047_v62, %v901_v16  ;;  %v933_v23 = vld [vmem:[#allocation2 + $0x138] sm:$0xff]  ;;  %v899_v24 = vld [vmem:[#allocation2 + $0x28] sm:$0xff]  ;;  %v804_v25 = vadd.f32 %v671_v19, %v125_v4  ;;  %v1067_v26 = vmax.f32 %v1003_v13, 0.0  ;;  %v1033_v27 = vmax.f32 %v969_v14, 0.0 }
  0xf0   :  { %1383 = vst.msk [vmem:[%s2426_s3 + $0x84] sm:$0xf] %vm1349_vm2, %v1580_v5  ;;  %v1004_v28 = vadd.f32 %v2047_v62, %v933_v23  ;;  %v970_v29 = vadd.f32 %v2047_v62, %v899_v24  ;;  %v931_v30 = vld [vmem:[#allocation2 + $0x128] sm:$0xff]  ;;  %v1553_v32 = vpack.c.bf16 %v1035_v20, %v1035_v20  ;;  %v1065_v33 = vmax.f32 %v1001_v21, 0.0  ;;  %v128_v43 = vld [vmem:[#allocation2 + $0x160] sm:$0xff]  ;;  %v99_v44 = vld [vmem:[#allocation2 + $0x78] sm:$0xff] }
  0xf1   :  { %867 = vst.msk [vmem:[#allocation2 + $0x140] sm:$0xff] %vm19_vm1, %v803_v9  ;;  %838 = vst.msk [vmem:[#allocation2 + $0x58] sm:$0xff] %vm19_vm1, %v774_v10  ;;  %v1036_v34 = vmax.f32 %v972_v22, 0.0  ;;  %v1002_v35 = vadd.f32 %v2047_v62, %v931_v30  ;;  %v1585_v38 = vpack.c.bf16 %v1067_v26, %v1067_v26  ;;  %v1551_v39 = vpack.c.bf16 %v1033_v27, %v1033_v27  ;;  %v1660_v42 = vpop.f32.mrb[12].mxu0  ;;  %v1692_v49 = vpop.f32.mrb[12].mxu1  ;;  %v131_v51 = vld [vmem:[#allocation2 + $0x178] sm:$0xff] }
  0xf2   :  { %870 = vst.msk [vmem:[#allocation2 + $0x158] sm:$0xff] %vm19_vm1, %v806_v17  ;;  %836 = vst.msk [vmem:[#allocation2 + $0x48] sm:$0xff] %vm19_vm1, %v772_v18  ;;  %v1068_v40 = vmax.f32 %v1004_v28, 0.0  ;;  %v1034_v41 = vmax.f32 %v970_v29, 0.0  ;;  %v1583_v45 = vpack.c.bf16 %v1065_v33, %v1065_v33  ;;  %v777_v48 = vadd.f32 %v1660_v42, %v98_v31  ;;  %v556_v50 = vpop.f32.mrb[13].mxu0  ;;  %v684_v58 = vpop.f32.mrb[13].mxu1 }
  0xf3   :  { %868 = vst.msk [vmem:[#allocation2 + $0x148] sm:$0xff] %vm19_vm1, %v804_v25  ;;  %v1554_v46 = vpack.c.bf16 %v1036_v34, %v1036_v34  ;;  %v1066_v47 = vmax.f32 %v1002_v35, 0.0  ;;  %v809_v56 = vadd.f32 %v1692_v49, %v130_v36  ;;  %v775_v57 = vadd.f32 %v556_v50, %v96_v37  ;;  %v1661_v59 = vpop.f32.mrb[14].mxu0  ;;  %v129_v60 = vld [vmem:[#allocation2 + $0x168] sm:$0xff]  ;;  %v1693_v4 = vpop.f32.mrb[14].mxu1  ;;  %v102_v24 = vld [vmem:[#allocation2 + $0x90] sm:$0xff] }
  0xf4   :  { %1356 = vst.msk [vmem:[%s2426_s3 + $0x18] sm:$0xf] %vm1349_vm2, %v1553_v32  ;;  %1388 = vst.msk [vmem:[%s2426_s3 + $0x98] sm:$0xf] %vm1349_vm2, %v1585_v38  ;;  %v1586_v53 = vpack.c.bf16 %v1068_v40, %v1068_v40  ;;  %v1552_v54 = vpack.c.bf16 %v1034_v41, %v1034_v41  ;;  %v904_v55 = vld [vmem:[#allocation2 + $0x50] sm:$0xff]  ;;  %v807_v2 = vadd.f32 %v684_v58, %v128_v43  ;;  %v559_v5 = vpop.f32.mrb[15].mxu0 }
  0xf5   :  { %1354 = vst.msk [vmem:[%s2426_s3 + $0x10] sm:$0xf] %vm1349_vm2, %v1551_v39  ;;  %1386 = vst.msk [vmem:[%s2426_s3 + $0x90] sm:$0xf] %vm1349_vm2, %v1583_v45  ;;  %v1584_v61 = vpack.c.bf16 %v1066_v47, %v1066_v47  ;;  %v975_v63 = vadd.f32 %v2047_v62, %v904_v55  ;;  %v778_v3 = vadd.f32 %v1661_v59, %v99_v44  ;;  %v687_v12 = vpop.f32.mrb[15].mxu1  ;;  %v134_v29 = vld [vmem:[#allocation2 + $0x190] sm:$0xff] }
  0xf6   :  { %1357 = vst.msk [vmem:[%s2426_s3 + $0x1c] sm:$0xf] %vm1349_vm2, %v1554_v46  ;;  %v936_v0 = vld [vmem:[#allocation2 + $0x150] sm:$0xff]  ;;  %v902_v1 = vld [vmem:[#allocation2 + $0x40] sm:$0xff]  ;;  %1389 = vst.msk [vmem:[%s2426_s3 + $0x9c] sm:$0xf] %vm1349_vm2, %v1586_v53  ;;  %v810_v10 = vadd.f32 %v1693_v4, %v131_v51  ;;  %v776_v11 = vadd.f32 %v559_v5, %v97_v52  ;;  %v808_v18 = vadd.f32 %v687_v12, %v129_v60 }
  0xf7   :  { %841 = vst.msk [vmem:[#allocation2 + $0x70] sm:$0xff] %vm19_vm1, %v777_v48  ;;  %v1007_v6 = vadd.f32 %v2047_v62, %v936_v0  ;;  %v973_v7 = vadd.f32 %v2047_v62, %v902_v1  ;;  %873 = vst.msk [vmem:[#allocation2 + $0x170] sm:$0xff] %vm19_vm1, %v809_v56  ;;  %v1039_v13 = vmax.f32 %v975_v63, 0.0  ;;  %v100_v30 = vld [vmem:[#allocation2 + $0x80] sm:$0xff]  ;;  %v103_v37 = vld [vmem:[#allocation2 + $0x98] sm:$0xff] }
  0xf8   :  { %1355 = vst.msk [vmem:[%s2426_s3 + $0x14] sm:$0xf] %vm1349_vm2, %v1552_v54  ;;  %v934_v8 = vld [vmem:[#allocation2 + $0x140] sm:$0xff]  ;;  %v905_v9 = vld [vmem:[#allocation2 + $0x58] sm:$0xff]  ;;  %1387 = vst.msk [vmem:[%s2426_s3 + $0x94] sm:$0xf] %vm1349_vm2, %v1584_v61 }
  0xf9   :  { %839 = vst.msk [vmem:[#allocation2 + $0x60] sm:$0xff] %vm19_vm1, %v775_v57  ;;  %v1005_v14 = vadd.f32 %v2047_v62, %v934_v8  ;;  %v976_v15 = vadd.f32 %v2047_v62, %v905_v9  ;;  %v937_v16 = vld [vmem:[#allocation2 + $0x158] sm:$0xff]  ;;  %v903_v17 = vld [vmem:[#allocation2 + $0x48] sm:$0xff]  ;;  %871 = vst.msk [vmem:[#allocation2 + $0x160] sm:$0xff] %vm19_vm1, %v807_v2  ;;  %v1071_v19 = vmax.f32 %v1007_v6, 0.0  ;;  %v1037_v20 = vmax.f32 %v973_v7, 0.0 }
  0xfa   :  { %842 = vst.msk [vmem:[#allocation2 + $0x78] sm:$0xff] %vm19_vm1, %v778_v3  ;;  %v1008_v21 = vadd.f32 %v2047_v62, %v937_v16  ;;  %v974_v22 = vadd.f32 %v2047_v62, %v903_v17  ;;  %v935_v23 = vld [vmem:[#allocation2 + $0x148] sm:$0xff]  ;;  %874 = vst.msk [vmem:[#allocation2 + $0x178] sm:$0xff] %vm19_vm1, %v810_v10  ;;  %v1557_v25 = vpack.c.bf16 %v1039_v13, %v1039_v13  ;;  %v1664_v35 = vpop.f32.mrb[16].mxu0  ;;  %v132_v36 = vld [vmem:[#allocation2 + $0x180] sm:$0xff]  ;;  %v1696_v42 = vpop.f32.mrb[16].mxu1 }
  0xfb   :  { %840 = vst.msk [vmem:[#allocation2 + $0x68] sm:$0xff] %vm19_vm1, %v776_v11  ;;  %v1069_v26 = vmax.f32 %v1005_v14, 0.0  ;;  %v1040_v27 = vmax.f32 %v976_v15, 0.0  ;;  %v1006_v28 = vadd.f32 %v2047_v62, %v935_v23  ;;  %872 = vst.msk [vmem:[#allocation2 + $0x168] sm:$0xff] %vm19_vm1, %v808_v18  ;;  %v1589_v31 = vpack.c.bf16 %v1071_v19, %v1071_v19  ;;  %v572_v43 = vpop.f32.mrb[17].mxu0  ;;  %v135_v44 = vld [vmem:[#allocation2 + $0x198] sm:$0xff] }
  0xfc   :  { %v1555_v32 = vpack.c.bf16 %v1037_v20, %v1037_v20  ;;  %v1072_v33 = vmax.f32 %v1008_v21, 0.0  ;;  %v1038_v34 = vmax.f32 %v974_v22, 0.0  ;;  %1360 = vst.msk [vmem:[%s2426_s3 + $0x28] sm:$0xf] %vm1349_vm2, %v1557_v25  ;;  %v781_v41 = vadd.f32 %v1664_v35, %v102_v24  ;;  %v101_v45 = vld [vmem:[#allocation2 + $0x88] sm:$0xff]  ;;  %v700_v51 = vpop.f32.mrb[17].mxu1 }
  0xfd   :  { %v1587_v38 = vpack.c.bf16 %v1069_v26, %v1069_v26  ;;  %v1558_v39 = vpack.c.bf16 %v1040_v27, %v1040_v27  ;;  %v1070_v40 = vmax.f32 %v1006_v28, 0.0  ;;  %1392 = vst.msk [vmem:[%s2426_s3 + $0xa8] sm:$0xf] %vm1349_vm2, %v1589_v31  ;;  %v813_v49 = vadd.f32 %v1696_v42, %v134_v29  ;;  %v1665_v52 = vpop.f32.mrb[18].mxu0  ;;  %v133_v53 = vld [vmem:[#allocation2 + $0x188] sm:$0xff]  ;;  %v1697_v60 = vpop.f32.mrb[18].mxu1 }
  0xfe   :  { %1358 = vst.msk [vmem:[%s2426_s3 + $0x20] sm:$0xf] %vm1349_vm2, %v1555_v32  ;;  %v1590_v46 = vpack.c.bf16 %v1072_v33, %v1072_v33  ;;  %v1556_v47 = vpack.c.bf16 %v1038_v34, %v1038_v34  ;;  %v908_v48 = vld [vmem:[#allocation2 + $0x70] sm:$0xff]  ;;  %v779_v50 = vadd.f32 %v572_v43, %v100_v30  ;;  %v811_v58 = vadd.f32 %v700_v51, %v132_v36  ;;  %v575_v61 = vpop.f32.mrb[19].mxu0  ;;  %v703_v5 = vpop.f32.mrb[19].mxu1  ;;  %v104_v23 = vld [vmem:[#allocation2 + $0xa0] sm:$0xff] }
  0xff   :  { %1390 = vst.msk [vmem:[%s2426_s3 + $0xa0] sm:$0xf] %vm1349_vm2, %v1587_v38  ;;  %1361 = vst.msk [vmem:[%s2426_s3 + $0x2c] sm:$0xf] %vm1349_vm2, %v1558_v39  ;;  %v1588_v54 = vpack.c.bf16 %v1070_v40, %v1070_v40  ;;  %v979_v55 = vadd.f32 %v2047_v62, %v908_v48  ;;  %v940_v56 = vld [vmem:[#allocation2 + $0x170] sm:$0xff]  ;;  %v782_v59 = vadd.f32 %v1665_v52, %v103_v37  ;;  %v136_v29 = vld [vmem:[#allocation2 + $0x1a0] sm:$0xff] }
 0x100   :  { %v906_v57 = vld [vmem:[#allocation2 + $0x60] sm:$0xff]  ;;  %845 = vst.msk [vmem:[#allocation2 + $0x90] sm:$0xff] %vm19_vm1, %v781_v41  ;;  %v1011_v63 = vadd.f32 %v2047_v62, %v940_v56  ;;  %877 = vst.msk [vmem:[#allocation2 + $0x190] sm:$0xff] %vm19_vm1, %v813_v49  ;;  %v814_v3 = vadd.f32 %v1697_v60, %v135_v44  ;;  %v780_v4 = vadd.f32 %v575_v61, %v101_v45  ;;  %v106_v17 = vld [vmem:[#allocation2 + $0xb0] sm:$0xff] }
 0x101   :  { %1393 = vst.msk [vmem:[%s2426_s3 + $0xac] sm:$0xf] %vm1349_vm2, %v1590_v46  ;;  %1359 = vst.msk [vmem:[%s2426_s3 + $0x24] sm:$0xf] %vm1349_vm2, %v1556_v47  ;;  %v977_v0 = vadd.f32 %v2047_v62, %v906_v57  ;;  %v938_v1 = vld [vmem:[#allocation2 + $0x160] sm:$0xff]  ;;  %v909_v2 = vld [vmem:[#allocation2 + $0x78] sm:$0xff]  ;;  %v812_v11 = vadd.f32 %v703_v5, %v133_v53 }
 0x102   :  { %843 = vst.msk [vmem:[#allocation2 + $0x80] sm:$0xff] %vm19_vm1, %v779_v50  ;;  %v1043_v6 = vmax.f32 %v979_v55, 0.0  ;;  %v1009_v7 = vadd.f32 %v2047_v62, %v938_v1  ;;  %v980_v8 = vadd.f32 %v2047_v62, %v909_v2  ;;  %v941_v9 = vld [vmem:[#allocation2 + $0x178] sm:$0xff]  ;;  %v907_v10 = vld [vmem:[#allocation2 + $0x68] sm:$0xff]  ;;  %875 = vst.msk [vmem:[#allocation2 + $0x180] sm:$0xff] %vm19_vm1, %v811_v58  ;;  %v1075_v12 = vmax.f32 %v1011_v63, 0.0 }
 0x103   :  { %1391 = vst.msk [vmem:[%s2426_s3 + $0xa4] sm:$0xf] %vm1349_vm2, %v1588_v54  ;;  %v1041_v13 = vmax.f32 %v977_v0, 0.0  ;;  %v1012_v14 = vadd.f32 %v2047_v62, %v941_v9  ;;  %v978_v15 = vadd.f32 %v2047_v62, %v907_v10  ;;  %v939_v16 = vld [vmem:[#allocation2 + $0x168] sm:$0xff]  ;;  %v138_v22 = vld [vmem:[#allocation2 + $0x1b0] sm:$0xff]  ;;  %v1668_v28 = vpop.f32.mrb[20].mxu0 }
 0x104   :  { %846 = vst.msk [vmem:[#allocation2 + $0x98] sm:$0xff] %vm19_vm1, %v782_v59  ;;  %878 = vst.msk [vmem:[#allocation2 + $0x198] sm:$0xff] %vm19_vm1, %v814_v3  ;;  %v1561_v18 = vpack.c.bf16 %v1043_v6, %v1043_v6  ;;  %v1073_v19 = vmax.f32 %v1009_v7, 0.0  ;;  %v1044_v20 = vmax.f32 %v980_v8, 0.0  ;;  %v1010_v21 = vadd.f32 %v2047_v62, %v939_v16  ;;  %v107_v30 = vld [vmem:[#allocation2 + $0xb8] sm:$0xff]  ;;  %v1700_v35 = vpop.f32.mrb[20].mxu1 }
 0x105   :  { %844 = vst.msk [vmem:[#allocation2 + $0x88] sm:$0xff] %vm19_vm1, %v780_v4  ;;  %876 = vst.msk [vmem:[#allocation2 + $0x188] sm:$0xff] %vm19_vm1, %v812_v11  ;;  %v1593_v24 = vpack.c.bf16 %v1075_v12, %v1075_v12  ;;  %v1559_v25 = vpack.c.bf16 %v1041_v13, %v1041_v13  ;;  %v1076_v26 = vmax.f32 %v1012_v14, 0.0  ;;  %v1042_v27 = vmax.f32 %v978_v15, 0.0  ;;  %v588_v36 = vpop.f32.mrb[21].mxu0  ;;  %v139_v37 = vld [vmem:[#allocation2 + $0x1b8] sm:$0xff] }
 0x106   :  { %1364 = vst.msk [vmem:[%s2426_s3 + $0x38] sm:$0xf] %vm1349_vm2, %v1561_v18  ;;  %v1591_v31 = vpack.c.bf16 %v1073_v19, %v1073_v19  ;;  %v1562_v32 = vpack.c.bf16 %v1044_v20, %v1044_v20  ;;  %v1074_v33 = vmax.f32 %v1010_v21, 0.0  ;;  %v785_v34 = vadd.f32 %v1668_v28, %v106_v17  ;;  %v105_v38 = vld [vmem:[#allocation2 + $0xa8] sm:$0xff]  ;;  %v716_v44 = vpop.f32.mrb[21].mxu1  ;;  %v1669_v45 = vpop.f32.mrb[22].mxu0 }
 0x107   :  { %1396 = vst.msk [vmem:[%s2426_s3 + $0xb8] sm:$0xf] %vm1349_vm2, %v1593_v24  ;;  %1362 = vst.msk [vmem:[%s2426_s3 + $0x30] sm:$0xf] %vm1349_vm2, %v1559_v25  ;;  %v1594_v39 = vpack.c.bf16 %v1076_v26, %v1076_v26  ;;  %v1560_v40 = vpack.c.bf16 %v1042_v27, %v1042_v27  ;;  %v912_v41 = vld [vmem:[#allocation2 + $0x90] sm:$0xff]  ;;  %v817_v42 = vadd.f32 %v1700_v35, %v138_v22  ;;  %v137_v46 = vld [vmem:[#allocation2 + $0x1a8] sm:$0xff] }
 0x108   :  { %v783_v43 = vadd.f32 %v588_v36, %v104_v23  ;;  %1394 = vst.msk [vmem:[%s2426_s3 + $0xb0] sm:$0xf] %vm1349_vm2, %v1591_v31  ;;  %1365 = vst.msk [vmem:[%s2426_s3 + $0x3c] sm:$0xf] %vm1349_vm2, %v1562_v32  ;;  %v1592_v47 = vpack.c.bf16 %v1074_v33, %v1074_v33  ;;  %v983_v48 = vadd.f32 %v2047_v62, %v912_v41  ;;  %v944_v49 = vld [vmem:[#allocation2 + $0x190] sm:$0xff]  ;;  %v1701_v53 = vpop.f32.mrb[22].mxu1 }
 0x109   :  { %v910_v50 = vld [vmem:[#allocation2 + $0x80] sm:$0xff]  ;;  %849 = vst.msk [vmem:[#allocation2 + $0xb0] sm:$0xff] %vm19_vm1, %v785_v34  ;;  %v815_v51 = vadd.f32 %v716_v44, %v136_v29  ;;  %v786_v52 = vadd.f32 %v1669_v45, %v107_v30  ;;  %v591_v54 = vpop.f32.mrb[23].mxu0  ;;  %v1015_v55 = vadd.f32 %v2047_v62, %v944_v49  ;;  %881 = vst.msk [vmem:[#allocation2 + $0x1b0] sm:$0xff] %vm19_vm1, %v817_v42  ;;  %v719_v61 = vpop.f32.mrb[23].mxu1  ;;  %v110_v10 = vld [vmem:[#allocation2 + $0xd0] sm:$0xff] }
 0x10a   :  { %1397 = vst.msk [vmem:[%s2426_s3 + $0xbc] sm:$0xf] %vm1349_vm2, %v1594_v39  ;;  %1363 = vst.msk [vmem:[%s2426_s3 + $0x34] sm:$0xf] %vm1349_vm2, %v1560_v40  ;;  %v981_v56 = vadd.f32 %v2047_v62, %v910_v50  ;;  %v942_v57 = vld [vmem:[#allocation2 + $0x180] sm:$0xff]  ;;  %v818_v59 = vadd.f32 %v1701_v53, %v139_v37  ;;  %v784_v60 = vadd.f32 %v591_v54, %v105_v38  ;;  %v1047_v63 = vmax.f32 %v983_v48, 0.0 }
 0x10b   :  { %v913_v58 = vld [vmem:[#allocation2 + $0x98] sm:$0xff]  ;;  %847 = vst.msk [vmem:[#allocation2 + $0xa0] sm:$0xff] %vm19_vm1, %v783_v43  ;;  %v1013_v0 = vadd.f32 %v2047_v62, %v942_v57  ;;  %879 = vst.msk [vmem:[#allocation2 + $0x1a0] sm:$0xff] %vm19_vm1, %v815_v51  ;;  %v816_v4 = vadd.f32 %v719_v61, %v137_v46  ;;  %v1079_v5 = vmax.f32 %v1015_v55, 0.0  ;;  %v142_v15 = vld [vmem:[#allocation2 + $0x1d0] sm:$0xff]  ;;  %v1672_v21 = vpop.f32.mrb[24].mxu0 }
 0x10c   :  { %1395 = vst.msk [vmem:[%s2426_s3 + $0xb4] sm:$0xf] %vm1349_vm2, %v1592_v47  ;;  %v984_v1 = vadd.f32 %v2047_v62, %v913_v58  ;;  %v945_v2 = vld [vmem:[#allocation2 + $0x198] sm:$0xff]  ;;  %v911_v3 = vld [vmem:[#allocation2 + $0x88] sm:$0xff]  ;;  %v1045_v6 = vmax.f32 %v981_v56, 0.0  ;;  %v1565_v11 = vpack.c.bf16 %v1047_v63, %v1047_v63  ;;  %v108_v16 = vld [vmem:[#allocation2 + $0xc0] sm:$0xff]  ;;  %v789_v27 = vadd.f32 %v1672_v21, %v110_v10 }
 0x10d   :  { %850 = vst.msk [vmem:[#allocation2 + $0xb8] sm:$0xff] %vm19_vm1, %v786_v52  ;;  %v1016_v7 = vadd.f32 %v2047_v62, %v945_v2  ;;  %v982_v8 = vadd.f32 %v2047_v62, %v911_v3  ;;  %v943_v9 = vld [vmem:[#allocation2 + $0x188] sm:$0xff]  ;;  %882 = vst.msk [vmem:[#allocation2 + $0x1b8] sm:$0xff] %vm19_vm1, %v818_v59  ;;  %v1077_v12 = vmax.f32 %v1013_v0, 0.0  ;;  %v1597_v17 = vpack.c.bf16 %v1079_v5, %v1079_v5  ;;  %v140_v22 = vld [vmem:[#allocation2 + $0x1c0] sm:$0xff]  ;;  %v1704_v28 = vpop.f32.mrb[24].mxu1 }
 0x10e   :  { %848 = vst.msk [vmem:[#allocation2 + $0xa8] sm:$0xff] %vm19_vm1, %v784_v60  ;;  %v1048_v13 = vmax.f32 %v984_v1, 0.0  ;;  %v1014_v14 = vadd.f32 %v2047_v62, %v943_v9  ;;  %880 = vst.msk [vmem:[#allocation2 + $0x1a8] sm:$0xff] %vm19_vm1, %v816_v4  ;;  %v1563_v18 = vpack.c.bf16 %v1045_v6, %v1045_v6  ;;  %v111_v23 = vld [vmem:[#allocation2 + $0xd8] sm:$0xff]  ;;  %v604_v29 = vpop.f32.mrb[25].mxu0  ;;  %v109_v31 = vld [vmem:[#allocation2 + $0xc8] sm:$0xff]  ;;  %v821_v35 = vadd.f32 %v1704_v28, %v142_v15 }
 0x10f   :  { %v1080_v19 = vmax.f32 %v1016_v7, 0.0  ;;  %v1046_v20 = vmax.f32 %v982_v8, 0.0  ;;  %1368 = vst.msk [vmem:[%s2426_s3 + $0x48] sm:$0xf] %vm1349_vm2, %v1565_v11  ;;  %v1595_v24 = vpack.c.bf16 %v1077_v12, %v1077_v12  ;;  %v143_v30 = vld [vmem:[#allocation2 + $0x1d8] sm:$0xff]  ;;  %v787_v36 = vadd.f32 %v604_v29, %v108_v16  ;;  %v732_v37 = vpop.f32.mrb[25].mxu1 }
 0x110   :  { %v1566_v25 = vpack.c.bf16 %v1048_v13, %v1048_v13  ;;  %v1078_v26 = vmax.f32 %v1014_v14, 0.0  ;;  %1400 = vst.msk [vmem:[%s2426_s3 + $0xc8] sm:$0xf] %vm1349_vm2, %v1597_v17  ;;  %1366 = vst.msk [vmem:[%s2426_s3 + $0x40] sm:$0xf] %vm1349_vm2, %v1563_v18  ;;  %v916_v34 = vld [vmem:[#allocation2 + $0xb0] sm:$0xff]  ;;  %v819_v44 = vadd.f32 %v732_v37, %v140_v22 }
 0x111   :  { %v1598_v32 = vpack.c.bf16 %v1080_v19, %v1080_v19  ;;  %v1564_v33 = vpack.c.bf16 %v1046_v20, %v1046_v20  ;;  %v1673_v38 = vpop.f32.mrb[26].mxu0  ;;  %v141_v39 = vld [vmem:[#allocation2 + $0x1c8] sm:$0xff]  ;;  %1398 = vst.msk [vmem:[%s2426_s3 + $0xc0] sm:$0xf] %vm1349_vm2, %v1595_v24  ;;  %v987_v41 = vadd.f32 %v2047_v62, %v916_v34  ;;  %v948_v42 = vld [vmem:[#allocation2 + $0x1b0] sm:$0xff]  ;;  %v1705_v46 = vpop.f32.mrb[26].mxu1 }
 0x112   :  { %1369 = vst.msk [vmem:[%s2426_s3 + $0x4c] sm:$0xf] %vm1349_vm2, %v1566_v25  ;;  %v1596_v40 = vpack.c.bf16 %v1078_v26, %v1078_v26  ;;  %v914_v43 = vld [vmem:[#allocation2 + $0xa0] sm:$0xff]  ;;  %v790_v45 = vadd.f32 %v1673_v38, %v111_v23  ;;  %v607_v47 = vpop.f32.mrb[27].mxu0  ;;  %v1019_v48 = vadd.f32 %v2047_v62, %v948_v42  ;;  %v822_v52 = vadd.f32 %v1705_v46, %v143_v30  ;;  %v735_v54 = vpop.f32.mrb[27].mxu1  ;;  %v114_v3 = vld [vmem:[#allocation2 + $0xf0] sm:$0xff] }
 0x113   :  { %853 = vst.msk [vmem:[#allocation2 + $0xd0] sm:$0xff] %vm19_vm1, %v789_v27  ;;  %v985_v49 = vadd.f32 %v2047_v62, %v914_v43  ;;  %v946_v50 = vld [vmem:[#allocation2 + $0x1a0] sm:$0xff]  ;;  %885 = vst.msk [vmem:[#allocation2 + $0x1d0] sm:$0xff] %vm19_vm1, %v821_v35  ;;  %v788_v53 = vadd.f32 %v607_v47, %v109_v31  ;;  %v1051_v55 = vmax.f32 %v987_v41, 0.0  ;;  %v820_v60 = vadd.f32 %v735_v54, %v141_v39  ;;  %v146_v8 = vld [vmem:[#allocation2 + $0x1f0] sm:$0xff]  ;;  %v1676_v14 = vpop.f32.mrb[28].mxu0 }
 0x114   :  { %1401 = vst.msk [vmem:[%s2426_s3 + $0xcc] sm:$0xf] %vm1349_vm2, %v1598_v32  ;;  %1367 = vst.msk [vmem:[%s2426_s3 + $0x44] sm:$0xf] %vm1349_vm2, %v1564_v33  ;;  %v917_v51 = vld [vmem:[#allocation2 + $0xb8] sm:$0xff]  ;;  %v1017_v56 = vadd.f32 %v2047_v62, %v946_v50  ;;  %v1083_v61 = vmax.f32 %v1019_v48, 0.0  ;;  %v793_v20 = vadd.f32 %v1676_v14, %v114_v3 }
 0x115   :  { %851 = vst.msk [vmem:[#allocation2 + $0xc0] sm:$0xff] %vm19_vm1, %v787_v36  ;;  %v988_v57 = vadd.f32 %v2047_v62, %v917_v51  ;;  %v949_v58 = vld [vmem:[#allocation2 + $0x1b8] sm:$0xff]  ;;  %v915_v59 = vld [vmem:[#allocation2 + $0xa8] sm:$0xff]  ;;  %883 = vst.msk [vmem:[#allocation2 + $0x1c0] sm:$0xff] %vm19_vm1, %v819_v44  ;;  %v1049_v63 = vmax.f32 %v985_v49, 0.0  ;;  %v1569_v4 = vpack.c.bf16 %v1051_v55, %v1051_v55  ;;  %v1708_v21 = vpop.f32.mrb[28].mxu1 }
 0x116   :  { %1399 = vst.msk [vmem:[%s2426_s3 + $0xc4] sm:$0xf] %vm1349_vm2, %v1596_v40  ;;  %v1020_v0 = vadd.f32 %v2047_v62, %v949_v58  ;;  %v986_v1 = vadd.f32 %v2047_v62, %v915_v59  ;;  %v947_v2 = vld [vmem:[#allocation2 + $0x1a8] sm:$0xff]  ;;  %v1081_v5 = vmax.f32 %v1017_v56, 0.0  ;;  %v112_v9 = vld [vmem:[#allocation2 + $0xe0] sm:$0xff]  ;;  %v1601_v10 = vpack.c.bf16 %v1083_v61, %v1083_v61  ;;  %v115_v16 = vld [vmem:[#allocation2 + $0xf8] sm:$0xff] }
 0x117   :  { %854 = vst.msk [vmem:[#allocation2 + $0xd8] sm:$0xff] %vm19_vm1, %v790_v45  ;;  %886 = vst.msk [vmem:[#allocation2 + $0x1d8] sm:$0xff] %vm19_vm1, %v822_v52  ;;  %v1052_v6 = vmax.f32 %v988_v57, 0.0  ;;  %v1018_v7 = vadd.f32 %v2047_v62, %v947_v2  ;;  %v1567_v11 = vpack.c.bf16 %v1049_v63, %v1049_v63  ;;  %v144_v15 = vld [vmem:[#allocation2 + $0x1e0] sm:$0xff]  ;;  %v620_v22 = vpop.f32.mrb[29].mxu0  ;;  %v147_v23 = vld [vmem:[#allocation2 + $0x1f8] sm:$0xff]  ;;  %v825_v28 = vadd.f32 %v1708_v21, %v146_v8 }
 0x118   :  { %852 = vst.msk [vmem:[#allocation2 + $0xc8] sm:$0xff] %vm19_vm1, %v788_v53  ;;  %884 = vst.msk [vmem:[#allocation2 + $0x1c8] sm:$0xff] %vm19_vm1, %v820_v60  ;;  %v1084_v12 = vmax.f32 %v1020_v0, 0.0  ;;  %v1050_v13 = vmax.f32 %v986_v1, 0.0  ;;  %v1599_v17 = vpack.c.bf16 %v1081_v5, %v1081_v5  ;;  %v113_v24 = vld [vmem:[#allocation2 + $0xe8] sm:$0xff]  ;;  %v791_v29 = vadd.f32 %v620_v22, %v112_v9  ;;  %v748_v30 = vpop.f32.mrb[29].mxu1 }
 0x119   :  { %1372 = vst.msk [vmem:[%s2426_s3 + $0x58] sm:$0xf] %vm1349_vm2, %v1569_v4  ;;  %v1570_v18 = vpack.c.bf16 %v1052_v6, %v1052_v6  ;;  %v1082_v19 = vmax.f32 %v1018_v7, 0.0  ;;  %1404 = vst.msk [vmem:[%s2426_s3 + $0xd8] sm:$0xf] %vm1349_vm2, %v1601_v10  ;;  %v1677_v31 = vpop.f32.mrb[30].mxu0  ;;  %v823_v37 = vadd.f32 %v748_v30, %v144_v15 }
 0x11a   :  { %1370 = vst.msk [vmem:[%s2426_s3 + $0x50] sm:$0xf] %vm1349_vm2, %v1567_v11  ;;  %v1602_v25 = vpack.c.bf16 %v1084_v12, %v1084_v12  ;;  %v1568_v26 = vpack.c.bf16 %v1050_v13, %v1050_v13  ;;  %v920_v27 = vld [vmem:[#allocation2 + $0xd0] sm:$0xff]  ;;  %v145_v32 = vld [vmem:[#allocation2 + $0x1e8] sm:$0xff]  ;;  %1402 = vst.msk [vmem:[%s2426_s3 + $0xd0] sm:$0xf] %vm1349_vm2, %v1599_v17  ;;  %v794_v38 = vadd.f32 %v1677_v31, %v115_v16 }
 0x11b   :  { %1373 = vst.msk [vmem:[%s2426_s3 + $0x5c] sm:$0xf] %vm1349_vm2, %v1570_v18  ;;  %v1600_v33 = vpack.c.bf16 %v1082_v19, %v1082_v19  ;;  %v991_v34 = vadd.f32 %v2047_v62, %v920_v27  ;;  %v952_v35 = vld [vmem:[#allocation2 + $0x1d0] sm:$0xff]  ;;  %v1709_v39 = vpop.f32.mrb[30].mxu1  ;;  %v623_v40 = vpop.f32.mrb[31].mxu0 }
 0x11c   :  { %v918_v36 = vld [vmem:[#allocation2 + $0xc0] sm:$0xff]  ;;  %857 = vst.msk [vmem:[#allocation2 + $0xf0] sm:$0xff] %vm19_vm1, %v793_v20  ;;  %v1023_v41 = vadd.f32 %v2047_v62, %v952_v35  ;;  %889 = vst.msk [vmem:[#allocation2 + $0x1f0] sm:$0xff] %vm19_vm1, %v825_v28  ;;  %v826_v45 = vadd.f32 %v1709_v39, %v147_v23  ;;  %v792_v46 = vadd.f32 %v623_v40, %v113_v24  ;;  %v751_v47 = vpop.f32.mrb[31].mxu1 }
 0x11d   :  { %1405 = vst.msk [vmem:[%s2426_s3 + $0xdc] sm:$0xf] %vm1349_vm2, %v1602_v25  ;;  %1371 = vst.msk [vmem:[%s2426_s3 + $0x54] sm:$0xf] %vm1349_vm2, %v1568_v26  ;;  %v989_v42 = vadd.f32 %v2047_v62, %v918_v36  ;;  %v950_v43 = vld [vmem:[#allocation2 + $0x1c0] sm:$0xff]  ;;  %v1055_v48 = vmax.f32 %v991_v34, 0.0  ;;  %v824_v53 = vadd.f32 %v751_v47, %v145_v32 }
 0x11e   :  { %v921_v44 = vld [vmem:[#allocation2 + $0xd8] sm:$0xff]  ;;  %855 = vst.msk [vmem:[#allocation2 + $0xe0] sm:$0xff] %vm19_vm1, %v791_v29  ;;  %v1021_v49 = vadd.f32 %v2047_v62, %v950_v43  ;;  %887 = vst.msk [vmem:[#allocation2 + $0x1e0] sm:$0xff] %vm19_vm1, %v823_v37  ;;  %v1087_v54 = vmax.f32 %v1023_v41, 0.0  ;;  %v1747_v19 = vld [vmem:[%s2425_s2] ss:$0 sm:$0xff] }
 0x11f   :  { %1403 = vst.msk [vmem:[%s2426_s3 + $0xd4] sm:$0xf] %vm1349_vm2, %v1600_v33  ;;  %v992_v50 = vadd.f32 %v2047_v62, %v921_v44  ;;  %v953_v51 = vld [vmem:[#allocation2 + $0x1d8] sm:$0xff]  ;;  %v919_v52 = vld [vmem:[#allocation2 + $0xc8] sm:$0xff]  ;;  %v1053_v55 = vmax.f32 %v989_v42, 0.0  ;;  %v1573_v59 = vpack.c.bf16 %v1055_v48, %v1055_v48 }
 0x120   :  { %858 = vst.msk [vmem:[#allocation2 + $0xf8] sm:$0xff] %vm19_vm1, %v794_v38  ;;  %v1024_v56 = vadd.f32 %v2047_v62, %v953_v51  ;;  %v990_v57 = vadd.f32 %v2047_v62, %v919_v52  ;;  %v951_v58 = vld [vmem:[#allocation2 + $0x1c8] sm:$0xff]  ;;  %890 = vst.msk [vmem:[#allocation2 + $0x1f8] sm:$0xff] %vm19_vm1, %v826_v45  ;;  %v1085_v60 = vmax.f32 %v1021_v49, 0.0  ;;  %v1605_v0 = vpack.c.bf16 %v1087_v54, %v1087_v54 }
 0x121   :  { %856 = vst.msk [vmem:[#allocation2 + $0xe8] sm:$0xff] %vm19_vm1, %v792_v46  ;;  %v1056_v61 = vmax.f32 %v992_v50, 0.0  ;;  %v1022_v63 = vadd.f32 %v2047_v62, %v951_v58  ;;  %888 = vst.msk [vmem:[#allocation2 + $0x1e8] sm:$0xff] %vm19_vm1, %v824_v53  ;;  %v1571_v1 = vpack.c.bf16 %v1053_v55, %v1053_v55 }
 0x122   :  { %v1088_v2 = vmax.f32 %v1024_v56, 0.0  ;;  %v1054_v3 = vmax.f32 %v990_v57, 0.0  ;;  %1376 = vst.msk [vmem:[%s2426_s3 + $0x68] sm:$0xf] %vm1349_vm2, %v1573_v59  ;;  %v1603_v4 = vpack.c.bf16 %v1085_v60, %v1085_v60  ;;  %1408 = vst.msk [vmem:[%s2426_s3 + $0xe8] sm:$0xf] %vm1349_vm2, %v1605_v0 }
 0x123   :  { %v1574_v5 = vpack.c.bf16 %v1056_v61, %v1056_v61  ;;  %v1086_v6 = vmax.f32 %v1022_v63, 0.0  ;;  %1374 = vst.msk [vmem:[%s2426_s3 + $0x60] sm:$0xf] %vm1349_vm2, %v1571_v1  ;;  %v924_v9 = vld [vmem:[#allocation2 + $0xf0] sm:$0xff] }
 0x124   :  { %v1606_v7 = vpack.c.bf16 %v1088_v2, %v1088_v2  ;;  %v1572_v8 = vpack.c.bf16 %v1054_v3, %v1054_v3  ;;  %1406 = vst.msk [vmem:[%s2426_s3 + $0xe0] sm:$0xf] %vm1349_vm2, %v1603_v4  ;;  %v995_v11 = vadd.f32 %v2047_v62, %v924_v9  ;;  %v956_v12 = vld [vmem:[#allocation2 + $0x1f0] sm:$0xff] }
 0x125   :  { %1377 = vst.msk [vmem:[%s2426_s3 + $0x6c] sm:$0xf] %vm1349_vm2, %v1574_v5  ;;  %v1604_v10 = vpack.c.bf16 %v1086_v6, %v1086_v6  ;;  %v922_v13 = vld [vmem:[#allocation2 + $0xe0] sm:$0xff]  ;;  %v1027_v14 = vadd.f32 %v2047_v62, %v956_v12 }
 0x126   :  { %1409 = vst.msk [vmem:[%s2426_s3 + $0xec] sm:$0xf] %vm1349_vm2, %v1606_v7  ;;  %1375 = vst.msk [vmem:[%s2426_s3 + $0x64] sm:$0xf] %vm1349_vm2, %v1572_v8  ;;  %v993_v15 = vadd.f32 %v2047_v62, %v922_v13  ;;  %v954_v16 = vld [vmem:[#allocation2 + $0x1e0] sm:$0xff]  ;;  %v1059_v18 = vmax.f32 %v995_v11, 0.0 }
 0x127   :  { %v925_v17 = vld [vmem:[#allocation2 + $0xf8] sm:$0xff]  ;;  %1407 = vst.msk [vmem:[%s2426_s3 + $0xe4] sm:$0xf] %vm1349_vm2, %v1604_v10  ;;  %v1025_v20 = vadd.f32 %v1747_v19, %v954_v16  ;;  %v1091_v24 = vmax.f32 %v1027_v14, 0.0 }
 0x128   :  { %v996_v21 = vadd.f32 %v1747_v19, %v925_v17  ;;  %v957_v22 = vld [vmem:[#allocation2 + $0x1f8] sm:$0xff]  ;;  %v923_v23 = vld [vmem:[#allocation2 + $0xe8] sm:$0xff]  ;;  %v1057_v25 = vmax.f32 %v993_v15, 0.0  ;;  %v1577_v28 = vpack.c.bf16 %v1059_v18, %v1059_v18 }
 0x129   :  { %v1028_v26 = vadd.f32 %v1747_v19, %v957_v22  ;;  %v994_v62 = vadd.f32 %v1747_v19, %v923_v23  ;;  %v955_v27 = vld [vmem:[#allocation2 + $0x1e8] sm:$0xff]  ;;  %v1089_v29 = vmax.f32 %v1025_v20, 0.0  ;;  %v1609_v32 = vpack.c.bf16 %v1091_v24, %v1091_v24 }
 0x12a   :  { %v1060_v30 = vmax.f32 %v996_v21, 0.0  ;;  %v1026_v31 = vadd.f32 %v1747_v19, %v955_v27  ;;  %v1575_v33 = vpack.c.bf16 %v1057_v25, %v1057_v25  ;;  %1380 = vst.msk [vmem:[%s2426_s3 + $0x78] sm:$0xf] %vm1349_vm2, %v1577_v28 }
 0x12b   :  { %v1092_v34 = vmax.f32 %v1028_v26, 0.0  ;;  %v1058_v35 = vmax.f32 %v994_v62, 0.0  ;;  %v1607_v36 = vpack.c.bf16 %v1089_v29, %v1089_v29  ;;  %1412 = vst.msk [vmem:[%s2426_s3 + $0xf8] sm:$0xf] %vm1349_vm2, %v1609_v32 }
 0x12c   :  { %v1578_v37 = vpack.c.bf16 %v1060_v30, %v1060_v30  ;;  %v1090_v38 = vmax.f32 %v1026_v31, 0.0  ;;  %1378 = vst.msk [vmem:[%s2426_s3 + $0x70] sm:$0xf] %vm1349_vm2, %v1575_v33 }
 0x12d   :  { %v1610_v39 = vpack.c.bf16 %v1092_v34, %v1092_v34  ;;  %v1576_v40 = vpack.c.bf16 %v1058_v35, %v1058_v35  ;;  %1410 = vst.msk [vmem:[%s2426_s3 + $0xf0] sm:$0xf] %vm1349_vm2, %v1607_v36 }
 0x12e   :  { %1381 = vst.msk [vmem:[%s2426_s3 + $0x7c] sm:$0xf] %vm1349_vm2, %v1578_v37  ;;  %v1608_v41 = vpack.c.bf16 %v1090_v38, %v1090_v38 }
 0x12f   :  { %1413 = vst.msk [vmem:[%s2426_s3 + $0xfc] sm:$0xf] %vm1349_vm2, %v1610_v39  ;;  %1379 = vst.msk [vmem:[%s2426_s3 + $0x74] sm:$0xf] %vm1349_vm2, %v1576_v40 }
 0x130   :  { %1411 = vst.msk [vmem:[%s2426_s3 + $0xf4] sm:$0xf] %vm1349_vm2, %v1608_v41 }

// kernel: bottleneck_forward.4
= control target key start
LH: loop header
LB: loop body
LE: loop exit
PB: predicated region body
PF: predicated region fallthrough
CT: control target
= control target key end

     0   :  { %s6977_s12 = smov 0   ;;  %s6979_s13 = smov 0   ;;  %s8993_s0 = inlined_call_operand.vmem [shape: bf16[2,16,16,4], index: 0, kind: input, shape index: {}]   ;;  %s8994_s1 = inlined_call_operand.vmem [shape: bf16[3,3,4,4], index: 1, kind: input, shape index: {}]   ;;  %s8995_s2 = inlined_call_operand.vmem [shape: f32[1,4], index: 2, kind: input, shape index: {}]   ;;  %s8996_s3 = inlined_call_operand.vmem [shape: bf16[2,16,16,4], index: 3, kind: output, shape index: {}]  }
   0x1   :  { %s6981_s14 = smov 0  }
   0x2 LB: > { %s32_s15 = sadd.s32 1, %s6950_s13  ;;  %p5530_p0 = scmp.ge.s32.totalorder %s6954_s14, 1  ;;  %s6954_s14 = sphi %s6981_s14, %s13_s14   ;;  %s6950_s13 = sphi %s6979_s13, %s9109_s13   ;;  %s6946_s12 = sphi %s6977_s12, %s9108_s12  }
   0x3   : > { %p34_p1 = scmp.ge.s32.totalorder %s32_s15, 2  ;;  %p177_p2 = scmp.lt.s32.totalorder %s6954_s14, 3 }
   0x5   : > { %s9111_s15 = smov (%p34_p1, %s32_s15), 0  ;;  %p178_p3 = pnand %p5530_p0, %p177_p2 }
   0x7   : > { %181 = sbr.rel (%p178_p3) target bundleno = 667 (0x29b), region = 32 }
   0xe   : > { %v5535_v0 = vld [vmem:[%s8994_s1 + $0x2] sm:$0x3]  ;;  %vm1317_vm0 = vcmask 1041408   ;;  %v5730_v1 = vld [vmem:[%s8994_s1 + $0x8] sm:$0x3]  ;;  %vm249_vm1 = vcmask 27648  }
   0xf   : > { %6761 = vmatprep.subr.msk.bf16.mxu1 %vm1317_vm0, %v5535_v0  ;;  %6765 = vmatprep.subr.msk.bf16.mxu0 %vm1317_vm0, %v5730_v1  ;;  %v1319_v2 = vsel %vm1317_vm0, %v5535_v0, 0  ;;  %v7007_v3 = vsel %vm1317_vm0, %v5730_v1, 0  ;;  %vm252_vm2 = vcmask 24576   ;;  %p216_p4 = scmp.lt.s32.totalorder %s6946_s12, 1  ;;  %v6956_v4 = vmov 0  }
  0x10   : > { %9017 = vst [vmem:[#allocation3_spill] sm:$0xff] %v7007_v3  ;;  %6198 = vmatpush3.bf16.msra.mxu1 %v1319_v2  ;;  %6334 = vmatpush3.bf16.msra.mxu0 %v7007_v3  ;;  %250 = vst.msk [vmem:[#allocation2] sm:$0xf] %vm249_vm1, %v6956_v4  ;;  %v7073_v5 = vld [vmem:[%s8994_s1] sm:$0x3]  ;;  %vm1268_vm8 = vcmask 31744  }
  0x11   : > { %251 = vst.msk [vmem:[#allocation2 + $0x4] sm:$0xf] %vm249_vm1, %v6956_v4  ;;  %254 = vst.msk [vmem:[#allocation2 + $0xc] sm:$0xf] %vm249_vm1, %v6956_v4  ;;  %s9113_s12 = smov (!%p216_p4, %s6946_s12), 1  ;;  %6762 = vmatprep.subr.msk.bf16.mxu1 %vm1317_vm0, %v7073_v5  ;;  %vm1792_vm13 = vcmask 1042432  }
  0x12   : > { %253 = vst.msk [vmem:[#allocation2 + $0x8] sm:$0x1] %vm252_vm2, %v6956_v4  ;;  %256 = vst.msk [vmem:[#allocation2 + $0x14] sm:$0x1] %vm252_vm2, %v6956_v4  ;;  %v7078_v6 = vld [vmem:[%s8994_s1 + $0xa] sm:$0x3] }
  0x13   : > { %255 = vst.msk [vmem:[#allocation2 + $0x10] sm:$0xf] %vm249_vm1, %v6956_v4  ;;  %257 = vst.msk [vmem:[#allocation2 + $0x18] sm:$0xf] %vm249_vm1, %v6956_v4  ;;  %vm833_vm3 = vsmask.f32 3328  ;;  %6767 = vmatprep.subr.msk.bf16.mxu0 %vm1317_vm0, %v7078_v6 }
  0x14   : > { %258 = vst.msk [vmem:[#allocation2 + $0x1c] sm:$0xf] %vm249_vm1, %v6956_v4  ;;  %260 = vst.msk [vmem:[#allocation2 + $0x24] sm:$0xf] %vm249_vm1, %v6956_v4  ;;  %s6010_s24 = sshll.u32 %s9113_s12, 7  ;;  %vm1793_vm14 = vcmask 1046532  }
  0x15   : > { %259 = vst.msk [vmem:[#allocation2 + $0x20] sm:$0x1] %vm252_vm2, %v6956_v4  ;;  %262 = vst.msk [vmem:[#allocation2 + $0x2c] sm:$0x1] %vm252_vm2, %v6956_v4  ;;  %vm834_vm4 = vsmask.f32 7440  ;;  %s7090_s27 = scalar_lea.vmem %s8993_s0, %s6010_s24  ;;  %s8884_s23 = scalar_lea.vmem %s8996_s3, %s6010_s24 }
  0x16   : > { %261 = vst.msk [vmem:[#allocation2 + $0x28] sm:$0xf] %vm249_vm1, %v6956_v4  ;;  %263 = vst.msk [vmem:[#allocation2 + $0x30] sm:$0xf] %vm249_vm1, %v6956_v4  ;;  %vm337_vm5 = vsmask.f32 256 }
  0x17   : > { %264 = vst.msk [vmem:[#allocation2 + $0x34] sm:$0xf] %vm249_vm1, %v6956_v4  ;;  %266 = vst.msk [vmem:[#allocation2 + $0x3c] sm:$0xf] %vm249_vm1, %v6956_v4  ;;  %vm338_vm6 = vsmask.f32 4368 }
  0x18   : > { %265 = vst.msk [vmem:[#allocation2 + $0x38] sm:$0x1] %vm252_vm2, %v6956_v4  ;;  %268 = vst.msk [vmem:[#allocation2 + $0x44] sm:$0x1] %vm252_vm2, %v6956_v4  ;;  %v305_v7 = vld [vmem:[%s7090_s27] sm:$0xf] }
  0x19   : > { %267 = vst.msk [vmem:[#allocation2 + $0x40] sm:$0xf] %vm249_vm1, %v6956_v4  ;;  %269 = vst.msk [vmem:[#allocation2 + $0x48] sm:$0xf] %vm249_vm1, %v6956_v4  ;;  %v306_v8 = vld [vmem:[%s7090_s27 + $0x4] sm:$0xf] }
  0x1a   : > { %270 = vst.msk [vmem:[#allocation2 + $0x4c] sm:$0xf] %vm249_vm1, %v6956_v4  ;;  %272 = vst.msk [vmem:[#allocation2 + $0x54] sm:$0xf] %vm249_vm1, %v6956_v4  ;;  %vm662_vm7 = vsmask.f32 7938 }
  0x1b   : > { %271 = vst.msk [vmem:[#allocation2 + $0x50] sm:$0x1] %vm252_vm2, %v6956_v4  ;;  %274 = vst.msk [vmem:[#allocation2 + $0x5c] sm:$0x1] %vm252_vm2, %v6956_v4  ;;  %v341_v9 = vshrl.u32 %v305_v7, 16  ;;  %v344_v10 = vshll.u32 %v305_v7, 16 }
  0x1c   : > { %273 = vst.msk [vmem:[#allocation2 + $0x58] sm:$0xf] %vm249_vm1, %v6956_v4  ;;  %275 = vst.msk [vmem:[#allocation2 + $0x60] sm:$0xf] %vm249_vm1, %v6956_v4  ;;  %v349_v11 = vshrl.u32 %v306_v8, 16  ;;  %v352_v12 = vshll.u32 %v306_v8, 16 }
  0x1d   : > { %276 = vst.msk [vmem:[#allocation2 + $0x64] sm:$0xf] %vm249_vm1, %v6956_v4  ;;  %278 = vst.msk [vmem:[#allocation2 + $0x6c] sm:$0xf] %vm249_vm1, %v6956_v4  ;;  %v782_v13 = vld [vmem:[#allocation2] sm:$0xf] }
  0x1e   : > { %277 = vst.msk [vmem:[#allocation2 + $0x68] sm:$0x1] %vm252_vm2, %v6956_v4  ;;  %280 = vst.msk [vmem:[#allocation2 + $0x74] sm:$0x1] %vm252_vm2, %v6956_v4  ;;  %v783_v14 = vld [vmem:[#allocation2 + $0x4] sm:$0xf] }
  0x1f   : > { %279 = vst.msk [vmem:[#allocation2 + $0x70] sm:$0xf] %vm249_vm1, %v6956_v4  ;;  %281 = vst.msk [vmem:[#allocation2 + $0x78] sm:$0xf] %vm249_vm1, %v6956_v4  ;;  %v784_v15 = vld [vmem:[#allocation2 + $0x8] sm:$0x1] }
  0x20   : > { %282 = vst.msk [vmem:[#allocation2 + $0x7c] sm:$0xf] %vm249_vm1, %v6956_v4  ;;  %284 = vst.msk [vmem:[#allocation2 + $0x84] sm:$0xf] %vm249_vm1, %v6956_v4  ;;  %v837_v16 = vshrl.u32 %v782_v13, 16  ;;  %v840_v17 = vshll.u32 %v782_v13, 16 }
  0x21   : > { %283 = vst.msk [vmem:[#allocation2 + $0x80] sm:$0x1] %vm252_vm2, %v6956_v4  ;;  %286 = vst.msk [vmem:[#allocation2 + $0x8c] sm:$0x1] %vm252_vm2, %v6956_v4  ;;  %v846_v18 = vshll.u32 %v783_v14, 16  ;;  %v850_v19 = vshrl.u32 %v783_v14, 16 }
  0x22   : > { %285 = vst.msk [vmem:[#allocation2 + $0x88] sm:$0xf] %vm249_vm1, %v6956_v4  ;;  %287 = vst.msk [vmem:[#allocation2 + $0x90] sm:$0xf] %vm249_vm1, %v6956_v4  ;;  %v307_v20 = vld [vmem:[%s7090_s27 + $0x8] sm:$0xf] }
  0x23   : > { %288 = vst.msk [vmem:[#allocation2 + $0x94] sm:$0xf] %vm249_vm1, %v6956_v4  ;;  %290 = vst.msk [vmem:[#allocation2 + $0x9c] sm:$0xf] %vm249_vm1, %v6956_v4  ;;  %v856_v21 = vshll.u32 %v784_v15, 16  ;;  %v343_v23 = vrot.slane %v341_v9, 7 }
  0x24   : > { %289 = vst.msk [vmem:[#allocation2 + $0x98] sm:$0x1] %vm252_vm2, %v6956_v4  ;;  %292 = vst.msk [vmem:[#allocation2 + $0xa4] sm:$0x1] %vm252_vm2, %v6956_v4  ;;  %v351_v24 = vrot.slane %v349_v11, 7  ;;  %v839_v26 = vrot.slane %v837_v16, 4 }
  0x25   : > { %291 = vst.msk [vmem:[#allocation2 + $0xa0] sm:$0xf] %vm249_vm1, %v6956_v4  ;;  %293 = vst.msk [vmem:[#allocation2 + $0xa8] sm:$0xf] %vm249_vm1, %v6956_v4  ;;  %v308_v25 = vld [vmem:[%s7090_s27 + $0xc] sm:$0xf]  ;;  %v346_v33 = vor.u32 %v344_v10, %v343_v23 }
  0x26   : > { %294 = vst.msk [vmem:[#allocation2 + $0xac] sm:$0xf] %vm249_vm1, %v6956_v4  ;;  %296 = vst.msk [vmem:[#allocation2 + $0xb4] sm:$0xf] %vm249_vm1, %v6956_v4  ;;  %v842_v27 = vrot.slane %v840_v17, 5  ;;  %v848_v28 = vrot.slane %v846_v18, 5  ;;  %v354_v35 = vor.u32 %v352_v12, %v351_v24 }
  0x27   : > { %295 = vst.msk [vmem:[#allocation2 + $0xb0] sm:$0x1] %vm252_vm2, %v6956_v4  ;;  %298 = vst.msk [vmem:[#allocation2 + $0xbc] sm:$0x1] %vm252_vm2, %v6956_v4  ;;  %v852_v29 = vrot.slane %v850_v19, 4  ;;  %v858_v32 = vrot.slane %v856_v21, 5 }
  0x28   : > { %297 = vst.msk [vmem:[#allocation2 + $0xb8] sm:$0xf] %vm249_vm1, %v6956_v4  ;;  %299 = vst.msk [vmem:[#allocation2 + $0xc0] sm:$0xf] %vm249_vm1, %v6956_v4  ;;  %v664_v31 = vld [vmem:[#allocation2 + $0xc] sm:$0xf]  ;;  %v843_v38 = vor.u32 %v842_v27, %v839_v26 }
  0x29   : > { %300 = vst.msk [vmem:[#allocation2 + $0xc4] sm:$0xf] %vm249_vm1, %v6956_v4  ;;  %302 = vst.msk [vmem:[#allocation2 + $0xcc] sm:$0xf] %vm249_vm1, %v6956_v4  ;;  %v347_v34 = vrot.slane %v343_v23, 4  ;;  %v853_v39 = vor.u32 %v852_v29, %v848_v28  ;;  %v356_v40 = vrot.slane %v351_v24, 4 }
  0x2a   : > { %301 = vst.msk [vmem:[#allocation2 + $0xc8] sm:$0x1] %vm252_vm2, %v6956_v4  ;;  %304 = vst.msk [vmem:[#allocation2 + $0xd4] sm:$0x1] %vm252_vm2, %v6956_v4  ;;  %v670_v37 = vld [vmem:[#allocation2 + $0x14] sm:$0x1] }
  0x2b   : > { %303 = vst.msk [vmem:[#allocation2 + $0xd0] sm:$0xf] %vm249_vm1, %v6956_v4  ;;  %vm7097_vm9 = vmor %vm337_vm5, %vm338_vm6  ;;  %v358_v41 = vshrl.u32 %v307_v20, 16  ;;  %v309_v42 = vld [vmem:[%s7090_s27 + $0x10] sm:$0xf]  ;;  %v361_v46 = vshll.u32 %v307_v20, 16 }
  0x2c   : > { %vm7104_vm10 = vmand %vm249_vm1, %vm662_vm7  ;;  %v355_v44 = vsel %vm7097_vm9, %v347_v34, %v354_v35  ;;  %v366_v47 = vshrl.u32 %v308_v25, 16  ;;  %v844_v48 = vrot.slane %v843_v38, 4  ;;  %v854_v49 = vrot.slane %v853_v39, 4  ;;  %v673_v52 = vld [vmem:[#allocation2 + $0x18] sm:$0xf] }
  0x2d   : > { %vm7110_vm11 = vmand %vm252_vm2, %vm337_vm5  ;;  %v665_v45 = vsel %vm7104_vm10, %v346_v33, %v664_v31  ;;  %667 = vst.msk [vmem:[#allocation2 + $0x10] sm:$0xf] %vm249_vm1, %v355_v44  ;;  %v360_v51 = vrot.slane %v358_v41, 7  ;;  %v369_v54 = vshll.u32 %v308_v25, 16  ;;  %v7129_v55 = vld [vmem:[%s7090_s27 + $0x14] sm:$0xf] }
  0x2e   : > { %vm7117_vm12 = vmor %vm833_vm3, %vm834_vm4  ;;  %666 = vst [vmem:[#allocation2 + $0xc] sm:$0xf] %v665_v45  ;;  %v671_v50 = vsel %vm7110_vm11, %v356_v40, %v670_v37  ;;  %v368_v53 = vrot.slane %v366_v47, 7  ;;  %v375_v56 = vshrl.u32 %v309_v42, 16  ;;  %v378_v57 = vshll.u32 %v309_v42, 16 }
  0x2f   : > { %672 = vst [vmem:[#allocation2 + $0x14] sm:$0x1] %v671_v50  ;;  %v849_v58 = vsel %vm7117_vm12, %v844_v48, %v848_v28  ;;  %v859_v59 = vsel %vm7117_vm12, %v854_v49, %v858_v32  ;;  %v363_v60 = vor.u32 %v361_v46, %v360_v51  ;;  %v364_v61 = vrot.slane %v360_v51, 4  ;;  %v677_v62 = vld [vmem:[#allocation2 + $0x20] sm:$0x1]  ;;  %vm7416_vm15 = vmor %vm1792_vm13, %vm1793_vm14 }
  0x30   : > { %v7136_v63 = vld [vmem:[%s7090_s27 + $0x18] sm:$0xf]  ;;  %v5536_v0 = vcombine.low %v849_v58, %v859_v59  ;;  %v371_v1 = vor.u32 %v369_v54, %v368_v53  ;;  %v373_v2 = vrot.slane %v368_v53, 4  ;;  %v7138_v4 = vrot.slane %v375_v56, 7  ;;  %v7143_v7 = vld [vmem:[%s8994_s1 + $0xc] sm:$0x3] }
  0x31   : > { %v7147_v8 = vsel %vm1317_vm0, %v7073_v5, 0  ;;  %v674_v9 = vsel %vm7104_vm10, %v363_v60, %v673_v52  ;;  %v7153_v10 = vsel %vm1317_vm0, %v7078_v6, 0  ;;  %v383_v11 = vshrl.u32 %v7129_v55, 16  ;;  %v680_v12 = vld [vmem:[#allocation2 + $0x24] sm:$0xf] }
  0x32   : > { %6199 = vmatprep.mubr.msk.bf16.mxu1 %vm1268_vm8, %v5536_v0  ;;  %v372_v13 = vsel %vm7097_vm9, %v364_v61, %v371_v1  ;;  %675 = vst [vmem:[#allocation2 + $0x18] sm:$0xf] %v674_v9  ;;  %v678_v5 = vsel %vm7110_vm11, %v373_v2, %v677_v62  ;;  %v380_v14 = vor.u32 %v378_v57, %v7138_v4  ;;  %v392_v15 = vshrl.u32 %v7136_v63, 16  ;;  %v7177_v29 = vld [vmem:[%s7090_s27 + $0x1c] sm:$0xf] }
  0x33   : > { %676 = vst.msk [vmem:[#allocation2 + $0x1c] sm:$0xf] %vm249_vm1, %v372_v13  ;;  %679 = vst [vmem:[#allocation2 + $0x20] sm:$0x1] %v678_v5  ;;  %v381_v6 = vrot.slane %v7138_v4, 4  ;;  %v7165_v16 = vrot.slane %v383_v11, 7 }
  0x34   : > { %v386_v17 = vshll.u32 %v7129_v55, 16  ;;  %v7170_v18 = vsel %vm1317_vm0, %v7143_v7, 0  ;;  %v786_v20 = vld [vmem:[#allocation2 + $0x10] sm:$0xf]  ;;  %v681_v23 = vsel %vm7104_vm10, %v380_v14, %v680_v12  ;;  %v7182_v34 = vrot.slane %v392_v15, 7 }
  0x35   : > { %v785_v19 = vld [vmem:[#allocation2 + $0xc] sm:$0xf]  ;;  %v870_v27 = vshll.u32 %v786_v20, 16  ;;  %v874_v28 = vshrl.u32 %v786_v20, 16  ;;  %682 = vst [vmem:[#allocation2 + $0x24] sm:$0xf] %v681_v23 }
  0x36   : > { %v7172_v21 = vld [vmem:[#allocation2 + $0xc] sm:$0xf]  ;;  %v787_v24 = vld [vmem:[#allocation2 + $0x14] sm:$0x1]  ;;  %v861_v25 = vshrl.u32 %v785_v19, 16  ;;  %v864_v26 = vshll.u32 %v785_v19, 16 }
  0x37   : > { %v880_v31 = vshll.u32 %v787_v24, 16  ;;  %v7179_v32 = vld [vmem:[#allocation2 + $0x10] sm:$0xf]  ;;  %v2580_v33 = vshrl.u32 %v7172_v21, 16  ;;  %v395_v35 = vshll.u32 %v7136_v63, 16  ;;  %v872_v39 = vrot.slane %v870_v27, 5 }
  0x38   : > { %v863_v37 = vrot.slane %v861_v25, 4  ;;  %v866_v38 = vrot.slane %v864_v26, 5  ;;  %v876_v40 = vrot.slane %v874_v28, 4  ;;  %v7185_v41 = vld [vmem:[#allocation2 + $0x14] sm:$0x1]  ;;  %v2583_v45 = vshll.u32 %v7172_v21, 16 }
  0x39   : > { %v882_v42 = vrot.slane %v880_v31, 5  ;;  %v2582_v44 = vrot.slane %v2580_v33, 4  ;;  %v2589_v46 = vshll.u32 %v7179_v32, 16  ;;  %v2593_v49 = vshrl.u32 %v7179_v32, 16  ;;  %v7191_v51 = vld [vmem:[#allocation2 + $0x18] sm:$0xf] }
  0x3a   : > { %v867_v47 = vor.u32 %v866_v38, %v863_v37  ;;  %v877_v48 = vor.u32 %v876_v40, %v872_v39  ;;  %v2599_v50 = vshll.u32 %v7185_v41, 16  ;;  %v2585_v52 = vrot.slane %v2583_v45, 5  ;;  %v7193_v54 = vld [vmem:[#allocation2 + $0x1c] sm:$0xf]  ;;  %v7197_v0 = vld [vmem:[#allocation2 + $0x20] sm:$0x1] }
  0x3b   : > { %v2591_v53 = vrot.slane %v2589_v46, 5  ;;  %v2604_v56 = vshrl.u32 %v7191_v51, 16  ;;  %v400_v57 = vshrl.u32 %v7177_v29, 16  ;;  %v2595_v60 = vrot.slane %v2593_v49, 4  ;;  %v788_v14 = vld [vmem:[#allocation2 + $0x18] sm:$0xf] }
  0x3c   : > { %v868_v58 = vrot.slane %v867_v47, 4  ;;  %v878_v59 = vrot.slane %v877_v48, 4  ;;  %v2601_v61 = vrot.slane %v2599_v50, 5  ;;  %v2586_v62 = vor.u32 %v2585_v52, %v2582_v44  ;;  %v789_v28 = vld [vmem:[#allocation2 + $0x1c] sm:$0xf] }
  0x3d   : > { %v2606_v1 = vrot.slane %v2604_v56, 4  ;;  %v2607_v2 = vshll.u32 %v7191_v51, 16  ;;  %v2613_v9 = vshll.u32 %v7193_v54, 16  ;;  %v2596_v13 = vor.u32 %v2595_v60, %v2591_v53  ;;  %v790_v38 = vld [vmem:[#allocation2 + $0x20] sm:$0x1] }
  0x3e   : > { %v873_v11 = vsel %vm7117_vm12, %v868_v58, %v872_v39  ;;  %v883_v12 = vsel %vm7117_vm12, %v878_v59, %v882_v42  ;;  %v2617_v5 = vshrl.u32 %v7193_v54, 16  ;;  %v2587_v19 = vrot.slane %v2586_v62, 4  ;;  %v684_v50 = vld [vmem:[#allocation2 + $0x2c] sm:$0x1]  ;;  %v791_v59 = vld [vmem:[#allocation2 + $0x24] sm:$0xf] }
  0x3f   : > { %v5537_v15 = vcombine.low %v873_v11, %v883_v12  ;;  %v2609_v20 = vrot.slane %v2607_v2, 5  ;;  %v2615_v23 = vrot.slane %v2613_v9, 5  ;;  %v2597_v24 = vrot.slane %v2596_v13, 4 }
  0x40   : > { %v3278_v25 = vrot.slane %v7185_v41, 5  ;;  %v2619_v26 = vrot.slane %v2617_v5, 4  ;;  %v2623_v27 = vshll.u32 %v7197_v0, 16  ;;  %v2592_v31 = vsel %vm7117_vm12, %v2587_v19, %v2591_v53 }
  0x41   : > { %6200 = vmatmul.mubr.msk.bf16.vlgmr.msra.gmra.mrb[0].mxu1 %vm1268_vm8, %v5537_v15  ;;  %v2610_v33 = vor.u32 %v2609_v20, %v2606_v1  ;;  %v3282_v37 = vrot.slane %v7193_v54, 5  ;;  %v885_v39 = vshrl.u32 %v788_v14, 16  ;;  %v2602_v40 = vsel %vm7117_vm12, %v2597_v24, %v2601_v61  ;;  %v7222_v1 = vld [vmem:[#allocation2 + $0x24] sm:$0xf]  ;;  %v687_v20 = vld [vmem:[#allocation2 + $0x30] sm:$0xf] }
  0x42   : > { %6232 = vmatpush3.bf16.msra.mxu1 %v7147_v8  ;;  %v2620_v42 = vor.u32 %v2619_v26, %v2615_v23  ;;  %v2625_v44 = vrot.slane %v2623_v27, 5  ;;  %v888_v45 = vshll.u32 %v788_v14, 16  ;;  %v5731_v46 = vcombine.low %v2592_v31, %v2602_v40  ;;  %v313_v26 = vld [vmem:[%s7090_s27 + $0x20] sm:$0xf] }
  0x43   : > { %v2611_v47 = vrot.slane %v2610_v33, 4  ;;  %v887_v48 = vrot.slane %v885_v39, 4  ;;  %v894_v49 = vshll.u32 %v789_v28, 16  ;;  %v898_v56 = vshrl.u32 %v789_v28, 16 }
  0x44   : > { %v2621_v52 = vrot.slane %v2620_v42, 4  ;;  %v890_v53 = vrot.slane %v888_v45, 5  ;;  %v904_v58 = vshll.u32 %v790_v38, 16  ;;  %6335 = vmatprep.mubr.msk.bf16.mxu0 %vm1268_vm8, %v5731_v46  ;;  %v388_v8 = vor.u32 %v386_v17, %v7165_v16 }
  0x45   : > { %v2616_v60 = vsel %vm7117_vm12, %v2611_v47, %v2615_v23  ;;  %v896_v61 = vrot.slane %v894_v49, 5  ;;  %v390_v62 = vrot.slane %v7165_v16, 4  ;;  %v900_v11 = vrot.slane %v898_v56, 4 }
  0x46   : > { %v2626_v2 = vsel %vm7117_vm12, %v2621_v52, %v2625_v44  ;;  %v891_v9 = vor.u32 %v890_v53, %v887_v48  ;;  %v906_v12 = vrot.slane %v904_v58, 5  ;;  %v389_v5 = vsel %vm7097_vm9, %v381_v6, %v388_v8  ;;  %v691_v44 = vld [vmem:[#allocation2 + $0x38] sm:$0x1] }
  0x47   : > { %v5732_v13 = vcombine.low %v2616_v60, %v2626_v2  ;;  %v685_v55 = vsel %vm7110_vm11, %v390_v62, %v684_v50  ;;  %v909_v17 = vshrl.u32 %v791_v59, 16  ;;  %v901_v14 = vor.u32 %v900_v11, %v896_v61  ;;  %683 = vst.msk [vmem:[#allocation2 + $0x28] sm:$0xf] %vm249_vm1, %v389_v5 }
  0x48   : > { %v892_v16 = vrot.slane %v891_v9, 4  ;;  %686 = vst [vmem:[#allocation2 + $0x2c] sm:$0x1] %v685_v55  ;;  %v912_v15 = vshll.u32 %v791_v59, 16  ;;  %v2628_v19 = vshrl.u32 %v7222_v1, 16  ;;  %v2631_v23 = vshll.u32 %v7222_v1, 16 }
  0x49   : > { %6336 = vmatmul.mubr.msk.bf16.vlgmr.msra.gmra.mrb[0].mxu0 %vm1268_vm8, %v5732_v13  ;;  %v911_v4 = vrot.slane %v909_v17, 4  ;;  %v397_v6 = vor.u32 %v395_v35, %v7182_v34  ;;  %v398_v24 = vrot.slane %v7182_v34, 4  ;;  %v902_v28 = vrot.slane %v901_v14, 4  ;;  %v314_v35 = vld [vmem:[%s7090_s27 + $0x24] sm:$0xf] }
  0x4a   : > { %6368 = vmatpush3.bf16.msra.mxu0 %v7153_v10  ;;  %v897_v27 = vsel %vm7117_vm12, %v892_v16, %v896_v61  ;;  %v914_v31 = vrot.slane %v912_v15, 5  ;;  %v2630_v33 = vrot.slane %v2628_v19, 4  ;;  %v2633_v38 = vrot.slane %v2631_v23, 5  ;;  %v694_v14 = vld [vmem:[#allocation2 + $0x3c] sm:$0xf] }
  0x4b   : > { %v402_v39 = vrot.slane %v400_v57, 7  ;;  %v403_v40 = vshll.u32 %v7177_v29, 16  ;;  %v688_v63 = vsel %vm7104_vm10, %v397_v6, %v687_v20  ;;  %6768 = vmatprep.subr.msk.bf16.mxu0 %vm1317_vm0, %v7143_v7  ;;  %v3285_v10 = vrot.slane %v7197_v0, 5 }
  0x4c   : > { %v907_v34 = vsel %vm7117_vm12, %v902_v28, %v906_v12  ;;  %v915_v42 = vor.u32 %v914_v31, %v911_v4  ;;  %689 = vst [vmem:[#allocation2 + $0x30] sm:$0xf] %v688_v63  ;;  %v409_v45 = vshrl.u32 %v313_v26, 16  ;;  %v2634_v57 = vor.u32 %v2633_v38, %v2630_v33 }
  0x4d   : > { %v5538_v46 = vcombine.low %v897_v27, %v907_v34  ;;  %v405_v47 = vor.u32 %v403_v40, %v402_v39  ;;  %v407_v29 = vrot.slane %v402_v39, 4  ;;  %v412_v50 = vshll.u32 %v313_v26, 16 }
  0x4e   : > { %v916_v48 = vrot.slane %v915_v42, 4  ;;  %v7255_v49 = vrot.slane %v409_v45, 7  ;;  %v417_v52 = vshrl.u32 %v314_v35, 16  ;;  %v792_v7 = vld [vmem:[#allocation2 + $0x28] sm:$0xf]  ;;  %v420_v2 = vshll.u32 %v314_v35, 16 }
  0x4f   : > { %6203 = vmatprep.mubr.msk.bf16.mxu1 %vm1268_vm8, %v5538_v46  ;;  %v793_v53 = vld [vmem:[#allocation2 + $0x2c] sm:$0x1]  ;;  %v7258_v56 = vld [vmem:[#allocation2 + $0x28] sm:$0xf]  ;;  %v406_v58 = vsel %vm7097_vm9, %v398_v24, %v405_v47  ;;  %v692_v59 = vsel %vm7110_vm11, %v407_v29, %v691_v44  ;;  %v918_v60 = vshll.u32 %v792_v7, 16  ;;  %v922_v61 = vshrl.u32 %v792_v7, 16 }
  0x50   : > { %v928_v8 = vshll.u32 %v793_v53, 16  ;;  %v7264_v62 = vld [vmem:[#allocation2 + $0x2c] sm:$0x1]  ;;  %690 = vst.msk [vmem:[#allocation2 + $0x34] sm:$0xf] %vm249_vm1, %v406_v58  ;;  %v2635_v9 = vrot.slane %v2634_v57, 4  ;;  %v414_v16 = vor.u32 %v412_v50, %v7255_v49 }
  0x51   : > { %693 = vst [vmem:[#allocation2 + $0x38] sm:$0x1] %v692_v59  ;;  %v2637_v11 = vshll.u32 %v7258_v56, 16  ;;  %v2641_v12 = vshrl.u32 %v7258_v56, 16  ;;  %v2647_v13 = vshll.u32 %v7264_v62, 16  ;;  %v920_v5 = vrot.slane %v918_v60, 5 }
  0x52   : > { %v924_v55 = vrot.slane %v922_v61, 4  ;;  %v930_v17 = vrot.slane %v928_v8, 5  ;;  %v415_v4 = vrot.slane %v7255_v49, 4  ;;  %v419_v23 = vrot.slane %v417_v52, 7 }
  0x53   : > { %v2639_v15 = vrot.slane %v2637_v11, 5  ;;  %v2643_v19 = vrot.slane %v2641_v12, 4  ;;  %v7271_v20 = vld [vmem:[#allocation2 + $0x30] sm:$0xf]  ;;  %v2649_v24 = vrot.slane %v2647_v13, 5  ;;  %v921_v31 = vsel %vm7117_vm12, %v916_v48, %v920_v5 }
  0x54   : > { %v925_v6 = vor.u32 %v924_v55, %v920_v5  ;;  %v2652_v26 = vshrl.u32 %v7271_v20, 16  ;;  %v2655_v27 = vshll.u32 %v7271_v20, 16  ;;  %v794_v28 = vld [vmem:[#allocation2 + $0x30] sm:$0xf]  ;;  %v422_v57 = vor.u32 %v420_v2, %v419_v23  ;;  %v315_v55 = vld [vmem:[%s7090_s27 + $0x28] sm:$0xf] }
  0x55   : > { %v2644_v33 = vor.u32 %v2643_v19, %v2639_v15  ;;  %v933_v38 = vshrl.u32 %v794_v28, 16  ;;  %v936_v39 = vshll.u32 %v794_v28, 16  ;;  %v2640_v63 = vsel %vm7117_vm12, %v2635_v9, %v2639_v15  ;;  %v698_v19 = vld [vmem:[#allocation2 + $0x44] sm:$0x1] }
  0x56   : > { %v926_v40 = vrot.slane %v925_v6, 4  ;;  %v2654_v35 = vrot.slane %v2652_v26, 4  ;;  %v2657_v34 = vrot.slane %v2655_v27, 5  ;;  %v695_v47 = vsel %vm7104_vm10, %v414_v16, %v694_v14  ;;  %v316_v6 = vld [vmem:[%s7090_s27 + $0x2c] sm:$0xf] }
  0x57   : > { %v2645_v42 = vrot.slane %v2644_v33, 4  ;;  %v7280_v44 = vld [vmem:[#allocation2 + $0x34] sm:$0xf]  ;;  %v935_v46 = vrot.slane %v933_v38, 4  ;;  %696 = vst [vmem:[#allocation2 + $0x3c] sm:$0xf] %v695_v47  ;;  %v423_v15 = vsel %vm7097_vm9, %v415_v4, %v422_v57 }
  0x58   : > { %v7282_v45 = vld [vmem:[#allocation2 + $0x38] sm:$0x1]  ;;  %v931_v29 = vsel %vm7117_vm12, %v926_v40, %v930_v17  ;;  %v2658_v48 = vor.u32 %v2657_v34, %v2654_v35  ;;  %v2661_v49 = vshll.u32 %v7280_v44, 16  ;;  %v2665_v50 = vshrl.u32 %v7280_v44, 16  ;;  %v795_v52 = vld [vmem:[#allocation2 + $0x34] sm:$0xf] }
  0x59   : > { %v5539_v7 = vcombine.low %v921_v31, %v931_v29  ;;  %v2650_v53 = vsel %vm7117_vm12, %v2645_v42, %v2649_v24  ;;  %v2671_v58 = vshll.u32 %v7282_v45, 16  ;;  %v796_v59 = vld [vmem:[#allocation2 + $0x38] sm:$0x1]  ;;  %v938_v60 = vrot.slane %v936_v39, 5  ;;  %697 = vst.msk [vmem:[#allocation2 + $0x40] sm:$0xf] %vm249_vm1, %v423_v15 }
  0x5a   : > { %v5733_v61 = vcombine.low %v2640_v63, %v2650_v53  ;;  %v2659_v8 = vrot.slane %v2658_v48, 4  ;;  %v2663_v2 = vrot.slane %v2661_v49, 5  ;;  %v2667_v9 = vrot.slane %v2665_v50, 4  ;;  %v5600_v29 = vld [vmem:[%s8994_s1 + $0x4] sm:$0x3] }
  0x5b   : > { %6204 = vmatmul.mubr.msk.bf16.gmra.mrb[4].mxu1 %vm1268_vm8, %v5539_v7  ;;  %v2673_v11 = vrot.slane %v2671_v58, 5  ;;  %v939_v12 = vor.u32 %v938_v60, %v935_v46  ;;  %v942_v13 = vshll.u32 %v795_v52, 16  ;;  %v946_v5 = vshrl.u32 %v795_v52, 16  ;;  %6763 = vmatprep.subr.msk.bf16.mxu1 %vm1317_vm0, %v5600_v29 }
  0x5c   : > { %6339 = vmatprep.mubr.msk.bf16.mxu0 %vm1268_vm8, %v5733_v61  ;;  %v2664_v17 = vsel %vm7117_vm12, %v2659_v8, %v2663_v2  ;;  %v2668_v16 = vor.u32 %v2667_v9, %v2663_v2  ;;  %v952_v14 = vshll.u32 %v796_v59, 16  ;;  %v424_v28 = vrot.slane %v419_v23, 4  ;;  %v701_v9 = vld [vmem:[#allocation2 + $0x48] sm:$0xf] }
  0x5d   : > { %v940_v24 = vrot.slane %v939_v12, 4  ;;  %v944_v26 = vrot.slane %v942_v13, 5  ;;  %v948_v27 = vrot.slane %v946_v5, 4  ;;  %v426_v38 = vshrl.u32 %v315_v55, 16 }
  0x5e   : > { %v2669_v31 = vrot.slane %v2668_v16, 4  ;;  %v954_v33 = vrot.slane %v952_v14, 5  ;;  %v429_v39 = vshll.u32 %v315_v55, 16  ;;  %v699_v35 = vsel %vm7110_vm11, %v424_v28, %v698_v19  ;;  %v797_v4 = vld [vmem:[#allocation2 + $0x3c] sm:$0xf] }
  0x5f   : > { %v945_v40 = vsel %vm7117_vm12, %v940_v24, %v944_v26  ;;  %v949_v63 = vor.u32 %v948_v27, %v944_v26  ;;  %v7306_v34 = vld [vmem:[#allocation2 + $0x3c] sm:$0xf]  ;;  %v434_v42 = vshrl.u32 %v316_v6, 16  ;;  %700 = vst [vmem:[#allocation2 + $0x44] sm:$0x1] %v699_v35  ;;  %v957_v46 = vshrl.u32 %v797_v4, 16 }
  0x60   : > { %v2674_v23 = vsel %vm7117_vm12, %v2669_v31, %v2673_v11  ;;  %v960_v57 = vshll.u32 %v797_v4, 16  ;;  %v2676_v47 = vshrl.u32 %v7306_v34, 16  ;;  %v2679_v50 = vshll.u32 %v7306_v34, 16  ;;  %v705_v11 = vld [vmem:[#allocation2 + $0x50] sm:$0x1] }
  0x61   : > { %v5734_v48 = vcombine.low %v2664_v17, %v2674_v23  ;;  %v950_v49 = vrot.slane %v949_v63, 4  ;;  %v428_v52 = vrot.slane %v426_v38, 7  ;;  %v959_v7 = vrot.slane %v957_v46, 4  ;;  %v798_v13 = vld [vmem:[#allocation2 + $0x40] sm:$0xf] }
  0x62   : > { %v962_v53 = vrot.slane %v960_v57, 5  ;;  %v2678_v58 = vrot.slane %v2676_v47, 4  ;;  %v436_v59 = vrot.slane %v434_v42, 7  ;;  %v2681_v61 = vrot.slane %v2679_v50, 5  ;;  %v7319_v55 = vld [vmem:[#allocation2 + $0x40] sm:$0xf] }
  0x63   : > { %6340 = vmatmul.mubr.msk.bf16.gmra.mrb[4].mxu0 %vm1268_vm8, %v5734_v48  ;;  %v955_v60 = vsel %vm7117_vm12, %v950_v49, %v954_v33  ;;  %v431_v8 = vor.u32 %v429_v39, %v428_v52  ;;  %v432_v2 = vrot.slane %v428_v52, 4  ;;  %v437_v17 = vshll.u32 %v316_v6, 16  ;;  %v317_v33 = vld [vmem:[%s7090_s27 + $0x30] sm:$0xf]  ;;  %v318_v46 = vld [vmem:[%s7090_s27 + $0x34] sm:$0xf] }
  0x64   : > { %v5540_v12 = vcombine.low %v945_v40, %v955_v60  ;;  %v963_v5 = vor.u32 %v962_v53, %v959_v7  ;;  %v441_v16 = vrot.slane %v436_v59, 4  ;;  %v966_v14 = vshll.u32 %v798_v13, 16  ;;  %v7338_v49 = vld [vmem:[%s7090_s27 + $0x38] sm:$0xf]  ;;  %v7779_v22 = vld [vmem:[#allocation2 + $0x40] sm:$0xf] }
  0x65   : > { %v970_v15 = vshrl.u32 %v798_v13, 16  ;;  %v2682_v19 = vor.u32 %v2681_v61, %v2678_v58  ;;  %v2685_v24 = vshll.u32 %v7319_v55, 16  ;;  %v2689_v27 = vshrl.u32 %v7319_v55, 16  ;;  %v7344_v58 = vld [vmem:[%s7090_s27 + $0x3c] sm:$0xf] }
  0x66   : > { %6207 = vmatprep.mubr.msk.bf16.mxu1 %vm1268_vm8, %v5540_v12  ;;  %v964_v26 = vrot.slane %v963_v5, 4  ;;  %v439_v28 = vor.u32 %v437_v17, %v436_v59  ;;  %v702_v31 = vsel %vm7104_vm10, %v431_v8, %v701_v9  ;;  %v799_v38 = vld [vmem:[#allocation2 + $0x44] sm:$0x1]  ;;  %v968_v6 = vrot.slane %v966_v14, 5  ;;  %v708_v17 = vld [vmem:[#allocation2 + $0x54] sm:$0xf] }
  0x67   : > { %v972_v39 = vrot.slane %v970_v15, 4  ;;  %v7327_v40 = vld [vmem:[#allocation2 + $0x44] sm:$0x1]  ;;  %703 = vst [vmem:[#allocation2 + $0x48] sm:$0xf] %v702_v31  ;;  %v706_v63 = vsel %vm7110_vm11, %v441_v16, %v705_v11  ;;  %v976_v35 = vshll.u32 %v799_v38, 16 }
  0x68   : > { %v2683_v4 = vrot.slane %v2682_v19, 4  ;;  %v2687_v42 = vrot.slane %v2685_v24, 5  ;;  %v2691_v23 = vrot.slane %v2689_v27, 4  ;;  %707 = vst [vmem:[#allocation2 + $0x50] sm:$0x1] %v706_v63  ;;  %v969_v57 = vsel %vm7117_vm12, %v964_v26, %v968_v6 }
  0x69   : > { %v973_v47 = vor.u32 %v972_v39, %v968_v6  ;;  %v2695_v29 = vshll.u32 %v7327_v40, 16  ;;  %v440_v48 = vsel %vm7097_vm9, %v432_v2, %v439_v28  ;;  %v978_v50 = vrot.slane %v976_v35, 5 }
  0x6a   : > { %v2688_v52 = vsel %vm7117_vm12, %v2683_v4, %v2687_v42  ;;  %v2692_v7 = vor.u32 %v2691_v23, %v2687_v42  ;;  %704 = vst.msk [vmem:[#allocation2 + $0x4c] sm:$0xf] %vm249_vm1, %v440_v48  ;;  %v443_v53 = vshrl.u32 %v317_v33, 16  ;;  %v446_v61 = vshll.u32 %v317_v33, 16 }
  0x6b   : > { %v974_v59 = vrot.slane %v973_v47, 4  ;;  %v2697_v60 = vrot.slane %v2695_v29, 5  ;;  %v451_v8 = vshrl.u32 %v318_v46, 16  ;;  %v454_v12 = vshll.u32 %v318_v46, 16 }
  0x6c   : > { %v2693_v9 = vrot.slane %v2692_v7, 4  ;;  %v445_v11 = vrot.slane %v443_v53, 7  ;;  %v460_v2 = vshrl.u32 %v7338_v49, 16  ;;  %v463_v16 = vshll.u32 %v7338_v49, 16 }
  0x6d   : > { %v979_v13 = vsel %vm7117_vm12, %v974_v59, %v978_v50  ;;  %v453_v5 = vrot.slane %v451_v8, 7  ;;  %v468_v14 = vshrl.u32 %v7344_v58, 16  ;;  %v3284_v41 = vrot.slane %v3282_v37, 4 }
  0x6e   : > { %v5541_v15 = vcombine.low %v969_v57, %v979_v13  ;;  %v2698_v19 = vsel %vm7117_vm12, %v2693_v9, %v2697_v60  ;;  %v7353_v24 = vld [vmem:[#allocation2 + $0x48] sm:$0xf]  ;;  %v448_v27 = vor.u32 %v446_v61, %v445_v11  ;;  %v449_v28 = vrot.slane %v445_v11, 4  ;;  %v712_v9 = vld [vmem:[#allocation2 + $0x5c] sm:$0x1] }
  0x6f   : > { %v800_v26 = vld [vmem:[#allocation2 + $0x48] sm:$0xf]  ;;  %v5735_v31 = vcombine.low %v2688_v52, %v2698_v19  ;;  %v7355_v33 = vld [vmem:[#allocation2 + $0x50] sm:$0x1]  ;;  %v2700_v38 = vshrl.u32 %v7353_v24, 16  ;;  %v2703_v6 = vshll.u32 %v7353_v24, 16  ;;  %v456_v63 = vor.u32 %v454_v12, %v453_v5 }
  0x70   : > { %v802_v39 = vld [vmem:[#allocation2 + $0x50] sm:$0x1]  ;;  %6208 = vmatmul.mubr.msk.bf16.gmra.mrb[8].mxu1 %vm1268_vm8, %v5541_v15  ;;  %v2719_v35 = vshll.u32 %v7355_v33, 16  ;;  %v981_v4 = vshrl.u32 %v800_v26, 16  ;;  %v984_v42 = vshll.u32 %v800_v26, 16  ;;  %v709_v49 = vsel %vm7104_vm10, %v448_v27, %v708_v17 }
  0x71   : > { %v1000_v23 = vshll.u32 %v802_v39, 16  ;;  %6343 = vmatprep.mubr.msk.bf16.mxu0 %vm1268_vm8, %v5735_v31  ;;  %v7362_v46 = vld [vmem:[#allocation2 + $0x4c] sm:$0xf]  ;;  %v2702_v57 = vrot.slane %v2700_v38, 4  ;;  %v2705_v47 = vrot.slane %v2703_v6, 5  ;;  %v457_v48 = vsel %vm7097_vm9, %v449_v28, %v456_v63 }
  0x72   : > { %v801_v29 = vld [vmem:[#allocation2 + $0x4c] sm:$0xf]  ;;  %v2709_v50 = vshll.u32 %v7362_v46, 16  ;;  %v2713_v52 = vshrl.u32 %v7362_v46, 16  ;;  %v2721_v7 = vrot.slane %v2719_v35, 5  ;;  %v983_v53 = vrot.slane %v981_v4, 4 }
  0x73   : > { %710 = vst [vmem:[#allocation2 + $0x54] sm:$0xf] %v709_v49  ;;  %711 = vst.msk [vmem:[#allocation2 + $0x58] sm:$0xf] %vm249_vm1, %v457_v48  ;;  %v2706_v59 = vor.u32 %v2705_v47, %v2702_v57  ;;  %v986_v60 = vrot.slane %v984_v42, 5  ;;  %v990_v61 = vshll.u32 %v801_v29, 16  ;;  %v3286_v54 = vsel %vm7416_vm15, %v3284_v41, %v3285_v10 }
  0x74   : > { %v994_v8 = vshrl.u32 %v801_v29, 16  ;;  %v2711_v11 = vrot.slane %v2709_v50, 5  ;;  %v2715_v12 = vrot.slane %v2713_v52, 4  ;;  %v1002_v13 = vrot.slane %v1000_v23, 5  ;;  %v7374_v39 = vld [vmem:[%s7090_s27 + $0x40] sm:$0xf] }
  0x75   : > { %v458_v15 = vrot.slane %v453_v5, 4  ;;  %v2707_v17 = vrot.slane %v2706_v59, 4  ;;  %v987_v19 = vor.u32 %v986_v60, %v983_v53  ;;  %v992_v26 = vrot.slane %v990_v61, 5 }
  0x76   : > { %v996_v27 = vrot.slane %v994_v8, 4  ;;  %v2716_v28 = vor.u32 %v2715_v12, %v2711_v11  ;;  %v462_v38 = vrot.slane %v460_v2, 7  ;;  %v470_v6 = vrot.slane %v468_v14, 7  ;;  %v715_v12 = vld [vmem:[#allocation2 + $0x60] sm:$0xf] }
  0x77   : > { %v713_v31 = vsel %vm7110_vm11, %v458_v15, %v712_v9  ;;  %v2712_v63 = vsel %vm7117_vm12, %v2707_v17, %v2711_v11  ;;  %v988_v35 = vrot.slane %v987_v19, 4  ;;  %v471_v5 = vshll.u32 %v7344_v58, 16 }
  0x78   : > { %v997_v4 = vor.u32 %v996_v27, %v992_v26  ;;  %714 = vst [vmem:[#allocation2 + $0x5c] sm:$0x1] %v713_v31  ;;  %v2717_v42 = vrot.slane %v2716_v28, 4  ;;  %v465_v23 = vor.u32 %v463_v16, %v462_v38  ;;  %v466_v57 = vrot.slane %v462_v38, 4  ;;  %v719_v38 = vld [vmem:[#allocation2 + $0x68] sm:$0x1] }
  0x79   : > { %v475_v47 = vrot.slane %v470_v6, 4  ;;  %v993_v29 = vsel %vm7117_vm12, %v988_v35, %v992_v26  ;;  %v473_v49 = vor.u32 %v471_v5, %v470_v6  ;;  %v477_v50 = vshrl.u32 %v7374_v39, 16 }
  0x7a   : > { %v998_v48 = vrot.slane %v997_v4, 4  ;;  %v803_v2 = vld [vmem:[#allocation2 + $0x54] sm:$0xf]  ;;  %v804_v14 = vld [vmem:[#allocation2 + $0x58] sm:$0xf]  ;;  %v2722_v52 = vsel %vm7117_vm12, %v2717_v42, %v2721_v7  ;;  %v716_v5 = vsel %vm7104_vm10, %v465_v23, %v715_v12  ;;  %v480_v12 = vshll.u32 %v7374_v39, 16 }
  0x7b   : > { %v1005_v53 = vshrl.u32 %v803_v2, 16  ;;  %v1008_v59 = vshll.u32 %v803_v2, 16  ;;  %v1014_v60 = vshll.u32 %v804_v14, 16  ;;  %v7384_v58 = vld [vmem:[#allocation2 + $0x54] sm:$0xf]  ;;  %v5736_v16 = vcombine.low %v2712_v63, %v2722_v52 }
  0x7c   : > { %v1003_v61 = vsel %vm7117_vm12, %v998_v48, %v1002_v13  ;;  %v1018_v8 = vshrl.u32 %v804_v14, 16  ;;  %v7388_v9 = vld [vmem:[#allocation2 + $0x58] sm:$0xf]  ;;  %v2724_v11 = vshrl.u32 %v7384_v58, 16  ;;  %v2727_v28 = vshll.u32 %v7384_v58, 16 }
  0x7d   : > { %v5542_v15 = vcombine.low %v993_v29, %v1003_v61  ;;  %v1007_v17 = vrot.slane %v1005_v53, 4  ;;  %v1010_v7 = vrot.slane %v1008_v59, 5  ;;  %v1016_v19 = vrot.slane %v1014_v60, 5  ;;  %6344 = vmatmul.mubr.msk.bf16.gmra.mrb[8].mxu0 %vm1268_vm8, %v5736_v16  ;;  %717 = vst [vmem:[#allocation2 + $0x60] sm:$0xf] %v716_v5 }
  0x7e   : > { %v1020_v26 = vrot.slane %v1018_v8, 4  ;;  %v2726_v27 = vrot.slane %v2724_v11, 4  ;;  %v2733_v31 = vshll.u32 %v7388_v9, 16  ;;  %v2737_v35 = vshrl.u32 %v7388_v9, 16  ;;  %v322_v60 = vld [vmem:[%s7090_s27 + $0x44] sm:$0xf] }
  0x7f   : > { %6211 = vmatprep.mubr.msk.bf16.mxu1 %vm1268_vm8, %v5542_v15  ;;  %v805_v13 = vld [vmem:[#allocation2 + $0x5c] sm:$0x1]  ;;  %v1011_v6 = vor.u32 %v1010_v7, %v1007_v17  ;;  %v474_v4 = vsel %vm7097_vm9, %v466_v57, %v473_v49  ;;  %v2729_v48 = vrot.slane %v2727_v28, 5  ;;  %v720_v59 = vsel %vm7110_vm11, %v475_v47, %v719_v38  ;;  %v722_v47 = vld [vmem:[#allocation2 + $0x6c] sm:$0xf] }
  0x80   : > { %v7395_v63 = vld [vmem:[#allocation2 + $0x5c] sm:$0x1]  ;;  %v1021_v42 = vor.u32 %v1020_v26, %v1016_v19  ;;  %v1024_v29 = vshll.u32 %v805_v13, 16  ;;  %v2735_v2 = vrot.slane %v2733_v31, 5  ;;  %718 = vst.msk [vmem:[#allocation2 + $0x64] sm:$0xf] %vm249_vm1, %v474_v4 }
  0x81   : > { %v1012_v14 = vrot.slane %v1011_v6, 4  ;;  %v2739_v52 = vrot.slane %v2737_v35, 4  ;;  %v2743_v53 = vshll.u32 %v7395_v63, 16  ;;  %v2730_v49 = vor.u32 %v2729_v48, %v2726_v27  ;;  %721 = vst [vmem:[#allocation2 + $0x68] sm:$0x1] %v720_v59 }
  0x82   : > { %v1022_v16 = vrot.slane %v1021_v42, 4  ;;  %v1026_v57 = vrot.slane %v1024_v29, 5  ;;  %v479_v23 = vrot.slane %v477_v50, 7  ;;  %v485_v26 = vshrl.u32 %v322_v60, 16 }
  0x83   : > { %v1017_v61 = vsel %vm7117_vm12, %v1012_v14, %v1016_v19  ;;  %v2740_v8 = vor.u32 %v2739_v52, %v2735_v2  ;;  %v2745_v11 = vrot.slane %v2743_v53, 5  ;;  %v2731_v17 = vrot.slane %v2730_v49, 4 }
  0x84   : > { %v1027_v15 = vsel %vm7117_vm12, %v1022_v16, %v1026_v57  ;;  %v483_v7 = vrot.slane %v479_v23, 4  ;;  %v482_v38 = vor.u32 %v480_v12, %v479_v23  ;;  %v488_v27 = vshll.u32 %v322_v60, 16  ;;  %v7425_v4 = vld [vmem:[#allocation2 + $0x60] sm:$0xf] }
  0x85   : > { %v5543_v28 = vcombine.low %v1017_v61, %v1027_v15  ;;  %v2741_v31 = vrot.slane %v2740_v8, 4  ;;  %v2736_v50 = vsel %vm7117_vm12, %v2731_v17, %v2735_v2  ;;  %v487_v13 = vrot.slane %v485_v26, 7  ;;  %v806_v42 = vld [vmem:[#allocation2 + $0x60] sm:$0xf] }
  0x86   : > { %v5764_v39 = vrot.slane %v7172_v21, 9  ;;  %v3275_v6 = vrot.slane %v7179_v32, 5  ;;  %v723_v29 = vsel %vm7104_vm10, %v482_v38, %v722_v47  ;;  %v2748_v2 = vshrl.u32 %v7425_v4, 16 }
  0x87   : > { %6212 = vmatmul.mubr.msk.bf16.gmra.mrb[12].mxu1 %vm1268_vm8, %v5543_v28  ;;  %v2746_v35 = vsel %vm7117_vm12, %v2741_v31, %v2745_v11  ;;  %v7427_v5 = vld [vmem:[#allocation2 + $0x64] sm:$0xf]  ;;  %v2751_v21 = vshll.u32 %v7425_v4, 16  ;;  %724 = vst [vmem:[#allocation2 + $0x6c] sm:$0xf] %v723_v29  ;;  %v1029_v60 = vshrl.u32 %v806_v42, 16  ;;  %v490_v16 = vor.u32 %v488_v27, %v487_v13 }
  0x88   : > { %v5737_v48 = vcombine.low %v2736_v50, %v2746_v35  ;;  %v2757_v32 = vshll.u32 %v7427_v5, 16  ;;  %v7434_v14 = vld [vmem:[#allocation2 + $0x64] sm:$0xf]  ;;  %v7436_v52 = vld [vmem:[#allocation2 + $0x68] sm:$0x1]  ;;  %v2761_v53 = vshrl.u32 %v7427_v5, 16  ;;  %v3276_v57 = vsel %vm7416_vm15, %v5764_v39, %v3275_v6 }
  0x89   : > { %v808_v59 = vld [vmem:[#allocation2 + $0x68] sm:$0x1]  ;;  %v2750_v49 = vrot.slane %v2748_v2, 4  ;;  %v2753_v23 = vrot.slane %v2751_v21, 5  ;;  %v2767_v8 = vshll.u32 %v7436_v52, 16  ;;  %v1031_v12 = vrot.slane %v1029_v60, 4 }
  0x8a   : > { %6347 = vmatprep.mubr.msk.bf16.mxu0 %vm1268_vm8, %v5737_v48  ;;  %v2759_v61 = vrot.slane %v2757_v32, 5  ;;  %v2763_v11 = vrot.slane %v2761_v53, 4  ;;  %v1032_v15 = vshll.u32 %v806_v42, 16  ;;  %v1038_v17 = vshll.u32 %v7434_v14, 16  ;;  %v726_v35 = vld [vmem:[#allocation2 + $0x74] sm:$0x1] }
  0x8b   : > { %v2754_v26 = vor.u32 %v2753_v23, %v2750_v49  ;;  %v2769_v47 = vrot.slane %v2767_v8, 5  ;;  %v1042_v28 = vshrl.u32 %v7434_v14, 16  ;;  %v1048_v31 = vshll.u32 %v808_v59, 16 }
  0x8c   : > { %v2764_v38 = vor.u32 %v2763_v11, %v2759_v61  ;;  %v1034_v27 = vrot.slane %v1032_v15, 5  ;;  %v1040_v50 = vrot.slane %v1038_v17, 5  ;;  %v491_v39 = vsel %vm7097_vm9, %v483_v7, %v490_v16 }
  0x8d   : > { %v2755_v29 = vrot.slane %v2754_v26, 4  ;;  %v1044_v48 = vrot.slane %v1042_v28, 4  ;;  %v1050_v2 = vrot.slane %v1048_v31, 5  ;;  %v492_v21 = vrot.slane %v487_v13, 4  ;;  %725 = vst.msk [vmem:[#allocation2 + $0x70] sm:$0xf] %vm249_vm1, %v491_v39 }
  0x8e   : > { %v2765_v42 = vrot.slane %v2764_v38, 4  ;;  %v1035_v32 = vor.u32 %v1034_v27, %v1031_v12  ;;  %v7448_v53 = vld [vmem:[#allocation2 + $0x6c] sm:$0xf]  ;;  %v3277_v59 = vrot.slane %v3275_v6, 4  ;;  %v5765_v60 = vrot.slane %v7191_v51, 9 }
  0x8f   : > { %v2760_v49 = vsel %vm7117_vm12, %v2755_v29, %v2759_v61  ;;  %v1045_v7 = vor.u32 %v1044_v48, %v1040_v50  ;;  %v727_v16 = vsel %vm7110_vm11, %v492_v21, %v726_v35  ;;  %v1053_v13 = vshrl.u32 %v7448_v53, 16  ;;  %v323_v6 = vld [vmem:[%s7090_s27 + $0x48] sm:$0xf]  ;;  %v324_v61 = vld [vmem:[%s7090_s27 + $0x4c] sm:$0xf] }
  0x90   : > { %v2770_v23 = vsel %vm7117_vm12, %v2765_v42, %v2769_v47  ;;  %v1036_v8 = vrot.slane %v1035_v32, 4  ;;  %728 = vst [vmem:[#allocation2 + $0x74] sm:$0x1] %v727_v16  ;;  %v1056_v11 = vshll.u32 %v7448_v53, 16  ;;  %v3279_v51 = vsel %vm7416_vm15, %v3277_v59, %v3278_v25  ;;  %v325_v39 = vld [vmem:[%s7090_s27 + $0x50] sm:$0xf] }
  0x91   : > { %v5738_v12 = vcombine.low %v2760_v49, %v2770_v23  ;;  %v1046_v15 = vrot.slane %v1045_v7, 4  ;;  %v1055_v17 = vrot.slane %v1053_v13, 4  ;;  %v5780_v26 = vcombine.low %v3276_v57, %v3279_v51  ;;  %v729_v48 = vld [vmem:[#allocation2 + $0x78] sm:$0xf]  ;;  %v733_v59 = vld [vmem:[#allocation2 + $0x80] sm:$0x1] }
  0x92   : > { %v1041_v28 = vsel %vm7117_vm12, %v1036_v8, %v1040_v50  ;;  %v1058_v47 = vrot.slane %v1056_v11, 5  ;;  %v3283_v31 = vsel %vm7416_vm15, %v5765_v60, %v3282_v37  ;;  %v494_v38 = vshrl.u32 %v323_v6, 16  ;;  %v326_v7 = vld [vmem:[%s7090_s27 + $0x54] sm:$0xf] }
  0x93   : > { %6348 = vmatmul.mubr.msk.bf16.gmra.mrb[12].mxu0 %vm1268_vm8, %v5738_v12  ;;  %v1051_v25 = vsel %vm7117_vm12, %v1046_v15, %v1050_v2  ;;  %v497_v27 = vshll.u32 %v323_v6, 16  ;;  %v502_v57 = vshrl.u32 %v324_v61, 16  ;;  %v505_v37 = vshll.u32 %v324_v61, 16 }
  0x94   : > { %v5544_v50 = vcombine.low %v1041_v28, %v1051_v25  ;;  %v7477_v35 = vld [vmem:[#allocation2 + $0x70] sm:$0xf]  ;;  %v1059_v29 = vor.u32 %v1058_v47, %v1055_v17  ;;  %6369 = vmatprep.mubr.msk.bf16.mxu0 %vm1268_vm8, %v5780_v26  ;;  %v5781_v42 = vcombine.low %v3283_v31, %v3286_v54  ;;  %v496_v32 = vrot.slane %v494_v38, 7  ;;  %v736_v47 = vld [vmem:[#allocation2 + $0x84] sm:$0xf] }
  0x95   : > { %v1062_v2 = vshll.u32 %v7477_v35, 16  ;;  %v1066_v21 = vshrl.u32 %v7477_v35, 16  ;;  %v504_v49 = vrot.slane %v502_v57, 7  ;;  %v511_v16 = vshrl.u32 %v325_v39, 16  ;;  %v740_v54 = vld [vmem:[#allocation2 + $0x8c] sm:$0x1] }
  0x96   : > { %6215 = vmatprep.mubr.msk.bf16.mxu1 %vm1268_vm8, %v5544_v50  ;;  %v1060_v60 = vrot.slane %v1059_v29, 4  ;;  %v514_v13 = vshll.u32 %v325_v39, 16  ;;  %v499_v10 = vor.u32 %v497_v27, %v496_v32  ;;  %v500_v11 = vrot.slane %v496_v32, 4  ;;  %v7499_v27 = vld [vmem:[%s8994_s1 + $0xe] sm:$0x3] }
  0x97   : > { %v811_v0 = vld [vmem:[#allocation2 + $0x74] sm:$0x1]  ;;  %v1064_v23 = vrot.slane %v1062_v2, 5  ;;  %v1068_v8 = vrot.slane %v1066_v21, 4  ;;  %v507_v6 = vor.u32 %v505_v37, %v504_v49  ;;  %v509_v61 = vrot.slane %v504_v49, 4 }
  0x98   : > { %v1072_v51 = vshll.u32 %v811_v0, 16  ;;  %v513_v12 = vrot.slane %v511_v16, 7  ;;  %v730_v26 = vsel %vm7104_vm10, %v499_v10, %v729_v48  ;;  %v519_v28 = vshrl.u32 %v326_v7, 16 }
  0x99   : > { %v1065_v15 = vsel %vm7117_vm12, %v1060_v60, %v1064_v23  ;;  %v1069_v17 = vor.u32 %v1068_v8, %v1064_v23  ;;  %v508_v41 = vsel %vm7097_vm9, %v500_v11, %v507_v6  ;;  %731 = vst [vmem:[#allocation2 + $0x78] sm:$0xf] %v730_v26  ;;  %v734_v25 = vsel %vm7110_vm11, %v509_v61, %v733_v59 }
  0x9a   : > { %v1074_v31 = vrot.slane %v1072_v51, 5  ;;  %v516_v38 = vor.u32 %v514_v13, %v513_v12  ;;  %732 = vst.msk [vmem:[#allocation2 + $0x7c] sm:$0xf] %vm249_vm1, %v508_v41  ;;  %735 = vst [vmem:[#allocation2 + $0x80] sm:$0x1] %v734_v25  ;;  %v517_v39 = vrot.slane %v513_v12, 4 }
  0x9b   : > { %v1070_v57 = vrot.slane %v1069_v17, 4  ;;  %6370 = vmatmul.mubr.msk.bf16.vlgmr.msra.gmra.mrb[0].mxu0 %vm1268_vm8, %v5781_v42  ;;  %v521_v50 = vrot.slane %v519_v28, 7  ;;  %v522_v29 = vshll.u32 %v326_v7, 16  ;;  %v5766_v48 = vrot.slane %v7222_v1, 9  ;;  %v327_v42 = vld [vmem:[%s7090_s27 + $0x58] sm:$0xf] }
  0x9c   : > { %6402 = vmatpush3.bf16.msra.mxu0 %v7170_v18  ;;  %v737_v37 = vsel %vm7104_vm10, %v516_v38, %v736_v47  ;;  %v3289_v2 = vrot.slane %v7258_v56, 5  ;;  %v3292_v21 = vrot.slane %v7264_v62, 5  ;;  %v5767_v49 = vrot.slane %v7271_v20, 9  ;;  %v328_v62 = vld [vmem:[%s7090_s27 + $0x5c] sm:$0xf] }
  0x9d   : > { %v1075_v32 = vsel %vm7117_vm12, %v1070_v57, %v1074_v31  ;;  %v524_v59 = vor.u32 %v522_v29, %v521_v50  ;;  %v526_v60 = vrot.slane %v521_v50, 4  ;;  %738 = vst [vmem:[#allocation2 + $0x84] sm:$0xf] %v737_v37  ;;  %6769 = vmatprep.subr.msk.bf16.mxu0 %vm1317_vm0, %v7499_v27  ;;  %v3296_v56 = vrot.slane %v7280_v44, 5  ;;  %v743_v12 = vld [vmem:[#allocation2 + $0x90] sm:$0xf] }
  0x9e   : > { %v5545_v18 = vcombine.low %v1065_v15, %v1075_v32  ;;  %v3290_v1 = vsel %vm7416_vm15, %v5766_v48, %v3289_v2  ;;  %v3291_v7 = vrot.slane %v3289_v2, 4  ;;  %v3299_v0 = vrot.slane %v7282_v45, 5  ;;  %v329_v57 = vld [vmem:[%s7090_s27 + $0x60] sm:$0xf] }
  0x9f   : > { %v525_v16 = vsel %vm7097_vm9, %v517_v39, %v524_v59  ;;  %v741_v13 = vsel %vm7110_vm11, %v526_v60, %v740_v54  ;;  %v528_v20 = vshrl.u32 %v327_v42, 16  ;;  %v3297_v44 = vsel %vm7416_vm15, %v5767_v49, %v3296_v56 }
  0xa0   : > { %6216 = vmatmul.mubr.msk.bf16.gmra.mrb[16].mxu1 %vm1268_vm8, %v5545_v18  ;;  %739 = vst.msk [vmem:[#allocation2 + $0x88] sm:$0xf] %vm249_vm1, %v525_v16  ;;  %742 = vst [vmem:[#allocation2 + $0x8c] sm:$0x1] %v741_v13  ;;  %v3293_v23 = vsel %vm7416_vm15, %v3291_v7, %v3292_v21  ;;  %v3298_v8 = vrot.slane %v3296_v56, 4  ;;  %v531_v10 = vshll.u32 %v327_v42, 16 }
  0xa1   : > { %v7530_v11 = vld [vmem:[#allocation2 + $0x78] sm:$0xf]  ;;  %v5782_v51 = vcombine.low %v3290_v1, %v3293_v23  ;;  %v530_v6 = vrot.slane %v528_v20, 7  ;;  %v536_v45 = vshrl.u32 %v328_v62, 16  ;;  %v539_v61 = vshll.u32 %v328_v62, 16 }
  0xa2   : > { %v7532_v15 = vld [vmem:[#allocation2 + $0x7c] sm:$0xf]  ;;  %v814_v17 = vld [vmem:[#allocation2 + $0x80] sm:$0x1]  ;;  %v1077_v26 = vshrl.u32 %v7530_v11, 16  ;;  %v1080_v28 = vshll.u32 %v7530_v11, 16  ;;  %v3300_v47 = vsel %vm7416_vm15, %v3298_v8, %v3299_v0 }
  0xa3   : > { %v1086_v31 = vshll.u32 %v7532_v15, 16  ;;  %v1090_v41 = vshrl.u32 %v7532_v15, 16  ;;  %v1096_v25 = vshll.u32 %v814_v17, 16  ;;  %6373 = vmatprep.mubr.msk.bf16.mxu0 %vm1268_vm8, %v5782_v51  ;;  %v5783_v38 = vcombine.low %v3297_v44, %v3300_v47  ;;  %v747_v23 = vld [vmem:[#allocation2 + $0x98] sm:$0x1] }
  0xa4   : > { %v1079_v39 = vrot.slane %v1077_v26, 4  ;;  %v1082_v50 = vrot.slane %v1080_v28, 5  ;;  %v7542_v29 = vld [vmem:[#allocation2 + $0x84] sm:$0xf]  ;;  %v533_v54 = vor.u32 %v531_v10, %v530_v6  ;;  %v534_v37 = vrot.slane %v530_v6, 4 }
  0xa5   : > { %v1088_v48 = vrot.slane %v1086_v31, 5  ;;  %v1092_v2 = vrot.slane %v1090_v41, 4  ;;  %v1098_v21 = vrot.slane %v1096_v25, 5  ;;  %v1101_v42 = vshrl.u32 %v7542_v29, 16  ;;  %6374 = vmatmul.mubr.msk.bf16.gmra.mrb[4].mxu0 %vm1268_vm8, %v5783_v38  ;;  %v330_v26 = vld [vmem:[%s7090_s27 + $0x64] sm:$0xf] }
  0xa6   : > { %v1083_v32 = vor.u32 %v1082_v50, %v1079_v39  ;;  %v1104_v59 = vshll.u32 %v7542_v29, 16  ;;  %v538_v60 = vrot.slane %v536_v45, 7  ;;  %v744_v49 = vsel %vm7104_vm10, %v533_v54, %v743_v12 }
  0xa7   : > { %v1093_v18 = vor.u32 %v1092_v2, %v1088_v48  ;;  %v7549_v1 = vld [vmem:[#allocation2 + $0x88] sm:$0xf]  ;;  %v817_v7 = vld [vmem:[#allocation2 + $0x8c] sm:$0x1]  ;;  %v1103_v56 = vrot.slane %v1101_v42, 4  ;;  %v545_v62 = vshrl.u32 %v329_v57, 16 }
  0xa8   : > { %745 = vst [vmem:[#allocation2 + $0x90] sm:$0xf] %v744_v49  ;;  %v1084_v16 = vrot.slane %v1083_v32, 4  ;;  %v1106_v13 = vrot.slane %v1104_v59, 5  ;;  %v1110_v0 = vshll.u32 %v7549_v1, 16  ;;  %v1114_v20 = vshrl.u32 %v7549_v1, 16 }
  0xa9   : > { %v1094_v44 = vrot.slane %v1093_v18, 4  ;;  %v1120_v8 = vshll.u32 %v817_v7, 16  ;;  %v541_v10 = vor.u32 %v539_v61, %v538_v60  ;;  %v543_v51 = vrot.slane %v538_v60, 4  ;;  %v750_v7 = vld [vmem:[#allocation2 + $0x9c] sm:$0xf] }
  0xaa   : > { %v1089_v6 = vsel %vm7117_vm12, %v1084_v16, %v1088_v48  ;;  %v1107_v45 = vor.u32 %v1106_v13, %v1103_v56  ;;  %v1112_v12 = vrot.slane %v1110_v0, 5  ;;  %v1116_v17 = vrot.slane %v1114_v20, 4 }
  0xab   : > { %v1099_v28 = vsel %vm7117_vm12, %v1094_v44, %v1098_v21  ;;  %v1122_v47 = vrot.slane %v1120_v8, 5  ;;  %v542_v31 = vsel %vm7097_vm9, %v534_v37, %v541_v10  ;;  %v748_v41 = vsel %vm7110_vm11, %v543_v51, %v747_v23  ;;  %v754_v23 = vld [vmem:[#allocation2 + $0xa4] sm:$0x1] }
  0xac   : > { %v5546_v25 = vcombine.low %v1089_v6, %v1099_v28  ;;  %v1108_v61 = vrot.slane %v1107_v45, 4  ;;  %v1117_v38 = vor.u32 %v1116_v17, %v1112_v12  ;;  %746 = vst.msk [vmem:[#allocation2 + $0x94] sm:$0xf] %vm249_vm1, %v542_v31  ;;  %749 = vst [vmem:[#allocation2 + $0x98] sm:$0x1] %v748_v41  ;;  %v547_v39 = vrot.slane %v545_v62, 7 }
  0xad   : > { %v548_v50 = vshll.u32 %v329_v57, 16  ;;  %v553_v54 = vshrl.u32 %v330_v26, 16  ;;  %v556_v48 = vshll.u32 %v330_v26, 16  ;;  %v5768_v2 = vrot.slane %v7306_v34, 9  ;;  %v331_v6 = vld [vmem:[%s7090_s27 + $0x68] sm:$0xf] }
  0xae   : > { %6219 = vmatprep.mubr.msk.bf16.mxu1 %vm1268_vm8, %v5546_v25  ;;  %v1113_v37 = vsel %vm7117_vm12, %v1108_v61, %v1112_v12  ;;  %v1118_v21 = vrot.slane %v1117_v38, 4  ;;  %v551_v32 = vrot.slane %v547_v39, 4  ;;  %v3303_v59 = vrot.slane %v7319_v55, 5  ;;  %v332_v25 = vld [vmem:[%s7090_s27 + $0x6c] sm:$0xf] }
  0xaf   : > { %v7567_v42 = vld [vmem:[#allocation2 + $0x90] sm:$0xf]  ;;  %v550_v57 = vor.u32 %v548_v50, %v547_v39  ;;  %v555_v18 = vrot.slane %v553_v54, 7  ;;  %v3306_v16 = vrot.slane %v7327_v40, 5  ;;  %v5769_v51 = vrot.slane %v7353_v24, 9 }
  0xb0   : > { %v1125_v60 = vshrl.u32 %v7567_v42, 16  ;;  %v1128_v49 = vshll.u32 %v7567_v42, 16  ;;  %v1123_v34 = vsel %vm7117_vm12, %v1118_v21, %v1122_v47  ;;  %v3304_v56 = vsel %vm7416_vm15, %v5768_v2, %v3303_v59  ;;  %v333_v50 = vld [vmem:[%s7090_s27 + $0x70] sm:$0xf]  ;;  %v334_v21 = vld [vmem:[%s7090_s27 + $0x74] sm:$0xf] }
  0xb1   : > { %v3305_v62 = vrot.slane %v3303_v59, 4  ;;  %v5547_v13 = vcombine.low %v1113_v37, %v1123_v34  ;;  %v558_v20 = vor.u32 %v556_v48, %v555_v18  ;;  %v560_v44 = vrot.slane %v555_v18, 4 }
  0xb2   : > { %v1127_v0 = vrot.slane %v1125_v60, 4  ;;  %v1130_v55 = vrot.slane %v1128_v49, 5  ;;  %v751_v8 = vsel %vm7104_vm10, %v550_v57, %v750_v7  ;;  %v3310_v28 = vrot.slane %v7362_v46, 5 }
  0xb3   : > { %v3307_v10 = vsel %vm7416_vm15, %v3305_v62, %v3306_v16  ;;  %6220 = vmatmul.mubr.msk.bf16.gmra.mrb[20].mxu1 %vm1268_vm8, %v5547_v13  ;;  %v7584_v45 = vld [vmem:[#allocation2 + $0x94] sm:$0xf]  ;;  %v820_v40 = vld [vmem:[#allocation2 + $0x98] sm:$0x1]  ;;  %v559_v17 = vsel %vm7097_vm9, %v551_v32, %v558_v20  ;;  %752 = vst [vmem:[#allocation2 + $0x9c] sm:$0xf] %v751_v8  ;;  %v755_v41 = vsel %vm7110_vm11, %v560_v44, %v754_v23 }
  0xb4   : > { %v1131_v12 = vor.u32 %v1130_v55, %v1127_v0  ;;  %v5784_v26 = vcombine.low %v3304_v56, %v3307_v10  ;;  %v1134_v47 = vshll.u32 %v7584_v45, 16  ;;  %v1138_v31 = vshrl.u32 %v7584_v45, 16  ;;  %753 = vst.msk [vmem:[#allocation2 + $0xa0] sm:$0xf] %vm249_vm1, %v559_v17  ;;  %756 = vst [vmem:[#allocation2 + $0xa4] sm:$0x1] %v755_v41 }
  0xb5   : > { %v1144_v24 = vshll.u32 %v820_v40, 16  ;;  %v3311_v38 = vsel %vm7416_vm15, %v5769_v51, %v3310_v28  ;;  %v3312_v46 = vrot.slane %v3310_v28, 4  ;;  %v3313_v39 = vrot.slane %v7355_v33, 5  ;;  %v757_v56 = vld [vmem:[#allocation2 + $0xa8] sm:$0xf] }
  0xb6   : > { %v1132_v61 = vrot.slane %v1131_v12, 4  ;;  %6377 = vmatprep.mubr.msk.bf16.mxu0 %vm1268_vm8, %v5784_v26  ;;  %v1136_v54 = vrot.slane %v1134_v47, 5  ;;  %v1140_v48 = vrot.slane %v1138_v31, 4  ;;  %v562_v37 = vshrl.u32 %v331_v6, 16  ;;  %v761_v62 = vld [vmem:[#allocation2 + $0xb0] sm:$0x1] }
  0xb7   : > { %v1146_v2 = vrot.slane %v1144_v24, 5  ;;  %v3314_v32 = vsel %vm7416_vm15, %v3312_v46, %v3313_v39  ;;  %v565_v59 = vshll.u32 %v331_v6, 16  ;;  %v570_v60 = vshrl.u32 %v332_v25, 16 }
  0xb8   : > { %v573_v49 = vshll.u32 %v332_v25, 16  ;;  %v1137_v57 = vsel %vm7117_vm12, %v1132_v61, %v1136_v54  ;;  %v1141_v18 = vor.u32 %v1140_v48, %v1136_v54  ;;  %v5785_v7 = vcombine.low %v3311_v38, %v3314_v32  ;;  %v764_v32 = vld [vmem:[#allocation2 + $0xb4] sm:$0xf] }
  0xb9   : > { %v564_v34 = vrot.slane %v562_v37, 7  ;;  %v572_v33 = vrot.slane %v570_v60, 7  ;;  %v579_v16 = vshrl.u32 %v333_v50, 16  ;;  %v582_v13 = vshll.u32 %v333_v50, 16 }
  0xba   : > { %v587_v0 = vshrl.u32 %v334_v21, 16  ;;  %v1142_v55 = vrot.slane %v1141_v18, 4  ;;  %v7605_v20 = vld [vmem:[#allocation2 + $0x9c] sm:$0xf]  ;;  %6378 = vmatmul.mubr.msk.bf16.gmra.mrb[8].mxu0 %vm1268_vm8, %v5785_v7  ;;  %v590_v8 = vshll.u32 %v334_v21, 16  ;;  %v3317_v60 = vrot.slane %v7388_v9, 5 }
  0xbb   : > { %v567_v23 = vor.u32 %v565_v59, %v564_v34  ;;  %v568_v44 = vrot.slane %v564_v34, 4  ;;  %v7608_v10 = vld [vmem:[#allocation2 + $0xa0] sm:$0xf]  ;;  %v1149_v51 = vshrl.u32 %v7605_v20, 16  ;;  %v1152_v6 = vshll.u32 %v7605_v20, 16 }
  0xbc   : > { %v575_v40 = vor.u32 %v573_v49, %v572_v33  ;;  %v577_v12 = vrot.slane %v572_v33, 4  ;;  %v1147_v17 = vsel %vm7117_vm12, %v1142_v55, %v1146_v2  ;;  %v823_v26 = vld [vmem:[#allocation2 + $0xa4] sm:$0x1]  ;;  %v1158_v28 = vshll.u32 %v7608_v10, 16 }
  0xbd   : > { %v1162_v47 = vshrl.u32 %v7608_v10, 16  ;;  %v758_v31 = vsel %vm7104_vm10, %v567_v23, %v757_v56  ;;  %v5548_v24 = vcombine.low %v1137_v57, %v1147_v17  ;;  %v1151_v41 = vrot.slane %v1149_v51, 4  ;;  %v768_v56 = vld [vmem:[#allocation2 + $0xbc] sm:$0x1]  ;;  %v5673_v17 = vld [vmem:[#allocation2 + $0x6c] sm:$0xf] }
  0xbe   : > { %v1154_v25 = vrot.slane %v1152_v6, 5  ;;  %v1168_v61 = vshll.u32 %v823_v26, 16  ;;  %759 = vst [vmem:[#allocation2 + $0xa8] sm:$0xf] %v758_v31  ;;  %v1160_v38 = vrot.slane %v1158_v28, 5  ;;  %v576_v39 = vsel %vm7097_vm9, %v568_v44, %v575_v40 }
  0xbf   : > { %v1164_v46 = vrot.slane %v1162_v47, 4  ;;  %v762_v50 = vsel %vm7110_vm11, %v577_v12, %v761_v62  ;;  %6223 = vmatprep.mubr.msk.bf16.mxu1 %vm1268_vm8, %v5548_v24  ;;  %760 = vst.msk [vmem:[#allocation2 + $0xac] sm:$0xf] %vm249_vm1, %v576_v39  ;;  %v581_v2 = vrot.slane %v579_v16, 7  ;;  %v589_v37 = vrot.slane %v587_v0, 7 }
  0xc0   : > { %v1155_v54 = vor.u32 %v1154_v25, %v1151_v41  ;;  %v1170_v48 = vrot.slane %v1168_v61, 5  ;;  %763 = vst [vmem:[#allocation2 + $0xb0] sm:$0x1] %v762_v50  ;;  %v5770_v59 = vrot.slane %v7384_v58, 9  ;;  %v3320_v49 = vrot.slane %v7395_v63, 5 }
  0xc1   : > { %v1165_v21 = vor.u32 %v1164_v46, %v1160_v38  ;;  %v584_v18 = vor.u32 %v582_v13, %v581_v2  ;;  %v585_v7 = vrot.slane %v581_v2, 4  ;;  %v592_v34 = vor.u32 %v590_v8, %v589_v37  ;;  %v5674_v26 = vld [vmem:[#allocation2 + $0x70] sm:$0xf]  ;;  %v5675_v46 = vld [vmem:[#allocation2 + $0x74] sm:$0x1] }
  0xc2   : > { %v1156_v57 = vrot.slane %v1155_v54, 4  ;;  %v594_v62 = vrot.slane %v589_v37, 4  ;;  %v3318_v55 = vsel %vm7416_vm15, %v5770_v59, %v3317_v60  ;;  %v3319_v16 = vrot.slane %v3317_v60, 4 }
  0xc3   : > { %v1166_v33 = vrot.slane %v1165_v21, 4  ;;  %v593_v58 = vsel %vm7097_vm9, %v585_v7, %v592_v34  ;;  %v765_v9 = vsel %vm7104_vm10, %v584_v18, %v764_v32  ;;  %v5771_v63 = vrot.slane %v7425_v4, 9 }
  0xc4   : > { %v1161_v0 = vsel %vm7117_vm12, %v1156_v57, %v1160_v38  ;;  %766 = vst [vmem:[#allocation2 + $0xb4] sm:$0xf] %v765_v9  ;;  %767 = vst.msk [vmem:[#allocation2 + $0xb8] sm:$0xf] %vm249_vm1, %v593_v58  ;;  %v769_v44 = vsel %vm7110_vm11, %v594_v62, %v768_v56  ;;  %v3321_v8 = vsel %vm7416_vm15, %v3319_v16, %v3320_v49  ;;  %v3324_v51 = vrot.slane %v7427_v5, 5 }
  0xc5   : > { %v1171_v13 = vsel %vm7117_vm12, %v1166_v33, %v1170_v48  ;;  %v7638_v23 = vld [vmem:[#allocation2 + $0xa8] sm:$0xf]  ;;  %770 = vst [vmem:[#allocation2 + $0xbc] sm:$0x1] %v769_v44  ;;  %v5786_v12 = vcombine.low %v3318_v55, %v3321_v8  ;;  %v3327_v41 = vrot.slane %v7436_v52, 5  ;;  %v5772_v54 = vrot.slane %v5673_v17, 9 }
  0xc6   : > { %9028 = vst [vmem:[#allocation4_spill] sm:$0xff] %v7638_v23  ;;  %v5549_v6 = vcombine.low %v1161_v0, %v1171_v13  ;;  %v1173_v40 = vshrl.u32 %v7638_v23, 16  ;;  %v1176_v4 = vshll.u32 %v7638_v23, 16  ;;  %v7648_v28 = vld [vmem:[#allocation2 + $0xac] sm:$0xf]  ;;  %v3325_v31 = vsel %vm7416_vm15, %v5771_v63, %v3324_v51 }
  0xc7   : > { %9029 = vst [vmem:[#allocation5_spill] sm:$0xff] %v7648_v28  ;;  %v7650_v47 = vld [vmem:[#allocation2 + $0xb0] sm:$0x1]  ;;  %v3326_v24 = vrot.slane %v3324_v51, 4  ;;  %v1182_v61 = vshll.u32 %v7648_v28, 16  ;;  %v1186_v38 = vshrl.u32 %v7648_v28, 16  ;;  %6381 = vmatprep.mubr.msk.bf16.mxu0 %vm1268_vm8, %v5786_v12 }
  0xc8   : > { %9030 = vst [vmem:[#allocation6_spill] sm:$0xff] %v7650_v47  ;;  %6224 = vmatmul.mubr.msk.bf16.gmra.mrb[24].mxu1 %vm1268_vm8, %v5549_v6  ;;  %v1175_v5 = vrot.slane %v1173_v40, 4  ;;  %v1178_v25 = vrot.slane %v1176_v4, 5  ;;  %v1192_v39 = vshll.u32 %v7650_v47, 16  ;;  %v3331_v48 = vrot.slane %v5674_v26, 5 }
  0xc9   : > { %v3328_v50 = vsel %vm7416_vm15, %v3326_v24, %v3327_v41  ;;  %v1184_v52 = vrot.slane %v1182_v61, 5  ;;  %v1188_v37 = vrot.slane %v1186_v38, 4  ;;  %v3334_v59 = vrot.slane %v5675_v46, 5  ;;  %v5676_v4 = vld [vmem:[#allocation2 + $0x78] sm:$0xf] }
  0xca   : > { %v1179_v2 = vor.u32 %v1178_v25, %v1175_v5  ;;  %v5787_v21 = vcombine.low %v3325_v31, %v3328_v50  ;;  %v3333_v32 = vrot.slane %v3331_v48, 4  ;;  %v1194_v57 = vrot.slane %v1192_v39, 5  ;;  %v5677_v24 = vld [vmem:[#allocation2 + $0x7c] sm:$0xf]  ;;  %v5678_v41 = vld [vmem:[#allocation2 + $0x80] sm:$0x1] }
  0xcb   : > { %v1189_v49 = vor.u32 %v1188_v37, %v1184_v52  ;;  %v7662_v18 = vld [vmem:[#allocation2 + $0xb4] sm:$0xf]  ;;  %v7664_v7 = vld [vmem:[#allocation2 + $0xb8] sm:$0xf]  ;;  %v3332_v34 = vsel %vm7416_vm15, %v5772_v54, %v3331_v48  ;;  %v5679_v5 = vld [vmem:[#allocation2 + $0x84] sm:$0xf] }
  0xcc   : > { %v1180_v60 = vrot.slane %v1179_v2, 4  ;;  %6382 = vmatmul.mubr.msk.bf16.gmra.mrb[12].mxu0 %vm1268_vm8, %v5787_v21  ;;  %v829_v56 = vld [vmem:[#allocation2 + $0xbc] sm:$0x1]  ;;  %v1197_v33 = vshrl.u32 %v7662_v18, 16  ;;  %v1200_v62 = vshll.u32 %v7662_v18, 16  ;;  %v1206_v55 = vshll.u32 %v7664_v7, 16 }
  0xcd   : > { %v1210_v16 = vshrl.u32 %v7664_v7, 16  ;;  %v1190_v58 = vrot.slane %v1189_v49, 4  ;;  %v1216_v9 = vshll.u32 %v829_v56, 16  ;;  %v3335_v63 = vsel %vm7416_vm15, %v3333_v32, %v3334_v59  ;;  %v5680_v25 = vld [vmem:[#allocation2 + $0x88] sm:$0xf] }
  0xce   : > { %v1185_v0 = vsel %vm7117_vm12, %v1180_v60, %v1184_v52  ;;  %v1199_v13 = vrot.slane %v1197_v33, 4  ;;  %v1202_v44 = vrot.slane %v1200_v62, 5  ;;  %v1208_v8 = vrot.slane %v1206_v55, 5  ;;  %v5681_v39 = vld [vmem:[#allocation2 + $0x8c] sm:$0x1] }
  0xcf   : > { %v1212_v51 = vrot.slane %v1210_v16, 4  ;;  %v1195_v6 = vsel %vm7117_vm12, %v1190_v58, %v1194_v57  ;;  %v5788_v40 = vcombine.low %v3332_v34, %v3335_v63  ;;  %v1218_v31 = vrot.slane %v1216_v9, 5  ;;  %v7681_v50 = vld [vmem:[#allocation2] sm:$0xf]  ;;  %v7683_v54 = vld [vmem:[#allocation2 + $0x4] sm:$0xf] }
  0xd0   : > { %v5550_v12 = vcombine.low %v1185_v0, %v1195_v6  ;;  %v1203_v17 = vor.u32 %v1202_v44, %v1199_v13  ;;  %v5773_v46 = vrot.slane %v5676_v4, 9  ;;  %v5568_v48 = vcombine.low %v7681_v50, %v7683_v54  ;;  %v5682_v52 = vld [vmem:[#allocation2 + $0x90] sm:$0xf]  ;;  %v5683_v37 = vld [vmem:[#allocation2 + $0x94] sm:$0xf] }
  0xd1   : > { %v1213_v26 = vor.u32 %v1212_v51, %v1208_v8  ;;  %6385 = vmatprep.mubr.msk.bf16.mxu0 %vm1268_vm8, %v5788_v40  ;;  %v3338_v2 = vrot.slane %v5677_v24, 5  ;;  %v3341_v59 = vrot.slane %v5678_v41, 5  ;;  %v5774_v60 = vrot.slane %v5679_v5, 9  ;;  %v5684_v49 = vld [vmem:[#allocation2 + $0x98] sm:$0x1] }
  0xd2   : > { %6227 = vmatprep.mubr.msk.bf16.mxu1 %vm1268_vm8, %v5550_v12  ;;  %v1204_v61 = vrot.slane %v1203_v17, 4  ;;  %v3345_v33 = vrot.slane %v5680_v25, 5  ;;  %v5685_v62 = vld [vmem:[#allocation2 + $0x9c] sm:$0xf]  ;;  %v5686_v55 = vld [vmem:[#allocation2 + $0xa0] sm:$0xf] }
  0xd3   : > { %v1214_v38 = vrot.slane %v1213_v26, 4  ;;  %v3339_v34 = vsel %vm7416_vm15, %v5773_v46, %v3338_v2  ;;  %v3340_v56 = vrot.slane %v3338_v2, 4  ;;  %v3348_v16 = vrot.slane %v5681_v39, 5  ;;  %v5687_v9 = vld [vmem:[#allocation2 + $0xa4] sm:$0x1] }
  0xd4   : > { %v1209_v21 = vsel %vm7117_vm12, %v1204_v61, %v1208_v8  ;;  %v5775_v0 = vrot.slane %v5682_v52, 9  ;;  %v3352_v58 = vrot.slane %v5683_v37, 5  ;;  %v3346_v13 = vsel %vm7416_vm15, %v5774_v60, %v3345_v33  ;;  %v7698_v51 = vld [vmem:[#allocation2 + $0xac] sm:$0xf]  ;;  %v335_v25 = vld [vmem:[%s7090_s27 + $0x78] sm:$0xf] }
  0xd5   : > { %v1219_v32 = vsel %vm7117_vm12, %v1214_v38, %v1218_v31  ;;  %v3342_v63 = vsel %vm7416_vm15, %v3340_v56, %v3341_v59  ;;  %v3347_v44 = vrot.slane %v3345_v33, 4  ;;  %v3355_v8 = vrot.slane %v5684_v49, 5  ;;  %v7703_v31 = vld [vmem:[#allocation2 + $0xb8] sm:$0xf]  ;;  %v7708_v61 = vld [vmem:[#allocation2 + $0xc] sm:$0xf] }
  0xd6   : > { %v5551_v57 = vcombine.low %v1209_v21, %v1219_v32  ;;  %v5789_v6 = vcombine.low %v3339_v34, %v3342_v63  ;;  %v3354_v40 = vrot.slane %v3352_v58, 4  ;;  %v5776_v4 = vrot.slane %v5685_v62, 9  ;;  %v7710_v38 = vld [vmem:[#allocation2 + $0x10] sm:$0xf]  ;;  %v7714_v39 = vld [vmem:[#allocation2 + $0x18] sm:$0xf] }
  0xd7   : > { %v3359_v12 = vrot.slane %v5686_v55, 5  ;;  %v3349_v17 = vsel %vm7416_vm15, %v3347_v44, %v3348_v16  ;;  %v3362_v26 = vrot.slane %v5687_v9, 5  ;;  %v3366_v5 = vrot.slane %v7698_v51, 5  ;;  %v5688_v21 = vld [vmem:[#allocation2 + $0xa8] sm:$0xf] }
  0xd8   : > { %6228 = vmatmul.mubr.msk.bf16.gmra.mrb[28].mxu1 %vm1268_vm8, %v5551_v57  ;;  %6386 = vmatmul.mubr.msk.bf16.gmra.mrb[16].mxu0 %vm1268_vm8, %v5789_v6  ;;  %v5790_v24 = vcombine.low %v3346_v13, %v3349_v17  ;;  %v5569_v46 = vcombine.low %v7708_v61, %v7710_v38  ;;  %v3353_v52 = vsel %vm7416_vm15, %v5775_v0, %v3352_v58  ;;  %v336_v32 = vld [vmem:[%s7090_s27 + $0x7c] sm:$0xf]  ;;  %v6819_v59 = vld [vmem:[%s8994_s1 + $0x4] sm:$0x3]  ;;  %v5690_v34 = vld [vmem:[#allocation2 + $0xb0] sm:$0x1] }
  0xd9   : > { %6233 = vmatprep.mubr.msk.bf16.mxu1 %vm1268_vm8, %v5568_v48  ;;  %v3361_v41 = vrot.slane %v3359_v12, 4  ;;  %v7716_v48 = vld [vmem:[#allocation2 + $0x1c] sm:$0xf]  ;;  %v3356_v37 = vsel %vm7416_vm15, %v3354_v40, %v3355_v8  ;;  %v2004_v60 = vsel %vm1317_vm0, %v6819_v59, 0  ;;  %v3360_v49 = vsel %vm7416_vm15, %v5776_v4, %v3359_v12  ;;  %v5691_v33 = vld [vmem:[#allocation2 + $0xb4] sm:$0xf] }
  0xda   : > { %v5570_v2 = vcombine.low %v7714_v39, %v7716_v48  ;;  %6389 = vmatprep.mubr.msk.bf16.mxu0 %vm1268_vm8, %v5790_v24  ;;  %v3373_v56 = vrot.slane %v7703_v31, 5  ;;  %v5693_v62 = vld [vmem:[#allocation2 + $0xbc] sm:$0x1]  ;;  %v596_v55 = vshrl.u32 %v335_v25, 16  ;;  %v599_v16 = vshll.u32 %v335_v25, 16 }
  0xdb   : > { %v3363_v57 = vsel %vm7416_vm15, %v3361_v41, %v3362_v26  ;;  %v5791_v0 = vcombine.low %v3353_v52, %v3356_v37  ;;  %v5777_v58 = vrot.slane %v5688_v21, 9  ;;  %v3368_v9 = vrot.slane %v3366_v5, 4  ;;  %v7738_v13 = vld [vmem:[%s8994_s1 + $0x6] sm:$0x3]  ;;  %v771_v26 = vld [vmem:[#allocation2 + $0xc0] sm:$0xf] }
  0xdc   : > { %v604_v63 = vshrl.u32 %v336_v32, 16  ;;  %v5792_v44 = vcombine.low %v3360_v49, %v3363_v57  ;;  %v3369_v8 = vrot.slane %v5690_v34, 5  ;;  %v598_v51 = vrot.slane %v596_v55, 7  ;;  %v775_v41 = vld [vmem:[#allocation2 + $0xc8] sm:$0x1] }
  0xdd   : > { %v607_v6 = vshll.u32 %v336_v32, 16  ;;  %v5778_v40 = vrot.slane %v5691_v33, 9  ;;  %v3375_v4 = vrot.slane %v3373_v56, 4  ;;  %v3376_v12 = vrot.slane %v5693_v62, 5  ;;  %v7744_v25 = vld [vmem:[#allocation2 + $0x24] sm:$0xf] }
  0xde   : > { %v606_v17 = vrot.slane %v604_v63, 7  ;;  %v601_v31 = vor.u32 %v599_v16, %v598_v51  ;;  %v602_v24 = vrot.slane %v598_v51, 4  ;;  %v7751_v21 = vld [vmem:[#allocation2 + $0x30] sm:$0xf]  ;;  %v7753_v32 = vld [vmem:[#allocation2 + $0x34] sm:$0xf]  ;;  %v3370_v49 = vsel %vm7416_vm15, %v3368_v9, %v3369_v8 }
  0xdf   : > { %v5572_v59 = vcombine.low %v7751_v21, %v7753_v32  ;;  %v3374_v34 = vsel %vm7416_vm15, %v5778_v40, %v3373_v56  ;;  %v3377_v33 = vsel %vm7416_vm15, %v3375_v4, %v3376_v12  ;;  %v1804_v56 = vrot.slane %v7710_v38, 5  ;;  %v7777_v16 = vld [vmem:[#allocation2 + $0x3c] sm:$0xf]  ;;  %v7784_v63 = vld [vmem:[#allocation2 + $0x48] sm:$0xf] }
  0xe0   : > { %6234 = vmatmul.mubr.msk.bf16.vlgmr.msra.gmra.mrb[0].mxu1 %vm1268_vm8, %v5569_v46  ;;  %v7746_v46 = vld [vmem:[#allocation2 + $0x28] sm:$0xf]  ;;  %6390 = vmatmul.mubr.msk.bf16.gmra.mrb[20].mxu0 %vm1268_vm8, %v5791_v0  ;;  %v611_v37 = vrot.slane %v606_v17, 4  ;;  %v772_v57 = vsel %vm7104_vm10, %v601_v31, %v771_v26  ;;  %v5794_v30 = vcombine.low %v3374_v34, %v3377_v33  ;;  %v5573_v36 = vcombine.low %v7777_v16, %v7779_v22  ;;  %v7790_v12 = vld [vmem:[#allocation2 + $0x18] sm:$0xf] }
  0xe1   : > { %6266 = vmatpush3.bf16.msra.mxu1 %v2004_v60  ;;  %6237 = vmatprep.mubr.msk.bf16.mxu1 %vm1268_vm8, %v5570_v2  ;;  %v5571_v52 = vcombine.low %v7744_v25, %v7746_v46  ;;  %v609_v2 = vor.u32 %v607_v6, %v606_v17  ;;  %v3367_v60 = vsel %vm7416_vm15, %v5777_v58, %v3366_v5  ;;  %v6826_v58 = vld [vmem:[#allocation2 + $0x14] sm:$0x1]  ;;  %v7792_v17 = vld [vmem:[#allocation2 + $0x1c] sm:$0xf]  ;;  %v5602_v26 = vrot.slane %v7708_v61, 9 }
  0xe2   : > { %6764 = vmatprep.subr.msk.bf16.mxu1 %vm1317_vm0, %v7738_v13  ;;  %6393 = vmatprep.mubr.msk.bf16.mxu0 %vm1268_vm8, %v5792_v44  ;;  %773 = vst [vmem:[#allocation2 + $0xc0] sm:$0xf] %v772_v57  ;;  %v776_v55 = vsel %vm7110_vm11, %v611_v37, %v775_v41  ;;  %v5793_v5 = vcombine.low %v3367_v60, %v3370_v49  ;;  %v1807_v9 = vrot.slane %v6826_v58, 5  ;;  %v7786_v44 = vld [vmem:[#allocation2 + $0x4c] sm:$0xf]  ;;  %v1806_v31 = vrot.slane %v1804_v56, 4 }
  0xe3   : > { %v610_v62 = vsel %vm7097_vm9, %v602_v24, %v609_v2  ;;  %777 = vst [vmem:[#allocation2 + $0xc8] sm:$0x1] %v776_v55  ;;  %v5574_v38 = vcombine.low %v7784_v63, %v7786_v44  ;;  %v5861_v37 = vcombine.low %v7790_v12, %v7792_v17  ;;  %v7813_v49 = vld [vmem:[#allocation2 + $0x54] sm:$0xf]  ;;  %v7815_v57 = vld [vmem:[#allocation2 + $0x58] sm:$0xf]  ;;  %v5577_v58 = vcombine.low %v7448_v53, %v7477_v35 }
  0xe4   : > { %774 = vst.msk [vmem:[#allocation2 + $0xc4] sm:$0xf] %vm249_vm1, %v610_v62  ;;  %v7805_v2 = vsel %vm7416_vm15, %v1806_v31, %v1807_v9  ;;  %v5575_v34 = vcombine.low %v7813_v49, %v7815_v57  ;;  %v7820_v33 = vld [vmem:[#allocation2 + $0x60] sm:$0xf]  ;;  %v7825_v55 = vld [vmem:[#allocation2 + $0x24] sm:$0xf] }
  0xe5   : > { %v5576_v62 = vcombine.low %v7820_v33, %v7434_v14  ;;  %v7846_v9 = vld [vmem:[%s8994_s1 + $0x10] sm:$0x3]  ;;  %v7858_v53 = vld [vmem:[#allocation2 + $0x4c] sm:$0xf]  ;;  %v7871_v31 = vld [vmem:[#allocation2 + $0x54] sm:$0xf] }
  0xe6   : > { %v8024_v3 = vld [vmem:[#allocation2 + $0xb8] sm:$0xf] }
  0xe8   : > { %6238 = vmatmul.mubr.msk.bf16.gmra.mrb[4].mxu1 %vm1268_vm8, %v5571_v52  ;;  %6394 = vmatmul.mubr.msk.bf16.gmra.mrb[24].mxu0 %vm1268_vm8, %v5793_v5  ;;  %v7801_v52 = vsel %vm7416_vm15, %v5602_v26, %v1804_v56  ;;  %v7827_v5 = vld [vmem:[#allocation2 + $0x28] sm:$0xf]  ;;  %v7831_v56 = vld [vmem:[#allocation2 + $0x34] sm:$0xf] }
  0xe9   : > { %6241 = vmatprep.mubr.msk.bf16.mxu1 %vm1268_vm8, %v5572_v59  ;;  %6397 = vmatprep.mubr.msk.bf16.mxu0 %vm1268_vm8, %v5794_v30  ;;  %v5694_v0 = vld [vmem:[#allocation2 + $0xc0] sm:$0xf]  ;;  %v7829_v30 = vld [vmem:[#allocation2 + $0x30] sm:$0xf] }
  0xea   : > { %v5696_v51 = vld [vmem:[#allocation2 + $0xc8] sm:$0x1]  ;;  %v5779_v6 = vrot.slane %v5694_v0, 9  ;;  %v5863_v14 = vcombine.low %v7829_v30, %v7831_v56  ;;  %v4538_v0 = vsel %vm1317_vm0, %v7499_v27, 0  ;;  %v6833_v59 = vld [vmem:[#allocation2 + $0x20] sm:$0x1] }
  0xeb   : > { %v5695_v8 = vld [vmem:[#allocation2 + $0xc4] sm:$0xf]  ;;  %v3383_v4 = vrot.slane %v5696_v51, 5  ;;  %v7854_v51 = vld [vmem:[#allocation2 + $0x40] sm:$0xf]  ;;  %v1814_v26 = vrot.slane %v6833_v59, 5 }
  0xec   : > { %v3380_v40 = vrot.slane %v5695_v8, 5  ;;  %v7852_v8 = vld [vmem:[#allocation2 + $0x3c] sm:$0xf]  ;;  %v7856_v27 = vld [vmem:[#allocation2 + $0x48] sm:$0xf] }
  0xed   : > { %v5864_v35 = vcombine.low %v7852_v8, %v7854_v51  ;;  %v7997_v59 = vld [vmem:[#allocation2 + $0xa8] sm:$0xf] }
  0xee   : > { %v3381_v24 = vsel %vm7416_vm15, %v5779_v6, %v3380_v40  ;;  %v3382_v41 = vrot.slane %v3380_v40, 4  ;;  %v7967_v40 = vld [vmem:[#allocation2 + $0x94] sm:$0xf] }
  0xef   : > { %9036 = vst [vmem:[#allocation12_spill] sm:$0xff] %v7967_v40 }
  0xf0   : > { %6242 = vmatmul.mubr.msk.bf16.gmra.mrb[8].mxu1 %vm1268_vm8, %v5573_v36  ;;  %v3384_v61 = vsel %vm7416_vm15, %v3382_v41, %v3383_v4  ;;  %v5862_v36 = vcombine.low %v7825_v55, %v7827_v5  ;;  %v5604_v41 = vrot.slane %v7744_v25, 9  ;;  %v1825_v4 = vrot.slane %v7753_v32, 5  ;;  %v7956_v25 = vld [vmem:[#allocation2 + $0x90] sm:$0xf] }
  0xf1   : > { %6245 = vmatprep.mubr.msk.bf16.mxu1 %vm1268_vm8, %v5574_v38  ;;  %v5795_v60 = vcombine.low %v3381_v24, %v3384_v61  ;;  %v5578_v38 = vcombine.low %v7530_v11, %v7532_v15  ;;  %v5865_v11 = vcombine.low %v7856_v27, %v7858_v53  ;;  %v6832_v15 = vld [vmem:[#allocation2 + $0x8] sm:$0x1]  ;;  %v5579_v61 = vcombine.low %v7542_v29, %v7549_v1  ;;  %v7906_v1 = vld [vmem:[#allocation2 + $0x70] sm:$0xf] }
  0xf2   : > { %v1800_v6 = vrot.slane %v6832_v15, 5  ;;  %9032 = vst [vmem:[#allocation8_spill] sm:$0xff] %v7906_v1  ;;  %v5601_v29 = vrot.slane %v7681_v50, 9  ;;  %9035 = vst [vmem:[#allocation11_spill] sm:$0xff] %v7956_v25 }
  0xf3   : > { %6398 = vmatmul.mubr.msk.bf16.gmra.mrb[28].mxu0 %vm1268_vm8, %v5795_v60  ;;  %v1797_v60 = vrot.slane %v7683_v54, 5 }
  0xf4   : > { %6403 = vmatprep.mubr.msk.bf16.mxu0 %vm1268_vm8, %v5861_v37  ;;  %v7877_v37 = vld [vmem:[#allocation2 + $0x58] sm:$0xf] }
  0xf5   : > { %v5866_v54 = vcombine.low %v7871_v31, %v7877_v37  ;;  %v7934_v50 = vsel %vm7416_vm15, %v5601_v29, %v1797_v60  ;;  %v6834_v29 = vld [vmem:[#allocation2 + $0x2c] sm:$0x1] }
  0xf8   : > { %6246 = vmatmul.mubr.msk.bf16.gmra.mrb[12].mxu1 %vm1268_vm8, %v5575_v34  ;;  %v7928_v34 = vld [vmem:[#allocation2 + $0x7c] sm:$0xf] }
  0xf9   : > { %6249 = vmatprep.mubr.msk.bf16.mxu1 %vm1268_vm8, %v5576_v62  ;;  %9034 = vst [vmem:[#allocation10_spill] sm:$0xff] %v7928_v34 }
  0xfb   : > { %6404 = vmatmul.mubr.msk.bf16.vlgmr.msra.gmra.mrb[0].mxu0 %vm1268_vm8, %v5862_v36  ;;  %v7920_v36 = vld [vmem:[#allocation2 + $0x78] sm:$0xf] }
  0xfc   : > { %6436 = vmatpush3.bf16.msra.mxu0 %v4538_v0  ;;  %6407 = vmatprep.mubr.msk.bf16.mxu0 %vm1268_vm8, %v5863_v14  ;;  %v5580_v14 = vcombine.low %v7567_v42, %v7584_v45  ;;  %v7886_v0 = vld [vmem:[#allocation2 + $0x60] sm:$0xf]  ;;  %v5582_v42 = vcombine.low %v7638_v23, %v7648_v28  ;;  %9033 = vst [vmem:[#allocation9_spill] sm:$0xff] %v7920_v36  ;;  %v7940_v45 = vld [vmem:[#allocation2 + $0x84] sm:$0xf] }
  0xfd   : > { %6770 = vmatprep.subr.msk.bf16.mxu0 %vm1317_vm0, %v7846_v9 }
 0x100   : > { %6250 = vmatmul.mubr.msk.bf16.gmra.mrb[16].mxu1 %vm1268_vm8, %v5577_v58  ;;  %v7900_v58 = vld [vmem:[#allocation2 + $0x6c] sm:$0xf] }
 0x101   : > { %6253 = vmatprep.mubr.msk.bf16.mxu1 %vm1268_vm8, %v5578_v38  ;;  %v7893_v38 = vld [vmem:[#allocation2 + $0x64] sm:$0xf]  ;;  %9031 = vst [vmem:[#allocation7_spill] sm:$0xff] %v7900_v58  ;;  %v5868_v62 = vcombine.low %v7900_v58, %v7906_v1 }
 0x103   : > { %6408 = vmatmul.mubr.msk.bf16.gmra.mrb[4].mxu0 %vm1268_vm8, %v5864_v35  ;;  %v5581_v35 = vcombine.low %v7605_v20, %v7608_v10  ;;  %v1799_v20 = vrot.slane %v1797_v60, 4  ;;  %v7942_v10 = vld [vmem:[#allocation2 + $0x88] sm:$0xf]  ;;  %v5869_v60 = vcombine.low %v7920_v36, %v7928_v34  ;;  %v9039_v34 = vshll.u32 %v7790_v12, 16 }
 0x104   : > { %6411 = vmatprep.mubr.msk.bf16.mxu0 %vm1268_vm8, %v5865_v11  ;;  %v5867_v11 = vcombine.low %v7886_v0, %v7893_v38 }
 0x105   : > { %v4063_v23 = vrot.slane %v9039_v34, 5 }
 0x108   : > { %6254 = vmatmul.mubr.msk.bf16.gmra.mrb[20].mxu1 %vm1268_vm8, %v5579_v61  ;;  %v1811_v61 = vrot.slane %v7716_v48, 5  ;;  %v5603_v48 = vrot.slane %v7714_v39, 9  ;;  %v5605_v39 = vrot.slane %v7751_v21, 9 }
 0x109   : > { %6257 = vmatprep.mubr.msk.bf16.mxu1 %vm1268_vm8, %v5580_v14  ;;  %v1818_v14 = vrot.slane %v7746_v46, 5  ;;  %v7938_v46 = vsel %vm7416_vm15, %v1799_v20, %v1800_v6  ;;  %v1821_v20 = vrot.slane %v6834_v29, 5  ;;  %v7963_v29 = vsel %vm1317_vm0, %v7738_v13, 0 }
 0x10a   : > { %v1813_v24 = vrot.slane %v1811_v61, 4  ;;  %v8016_v21 = vsel %vm7416_vm15, %v5605_v39, %v1825_v4  ;;  %v1846_v39 = vrot.slane %v7815_v57, 5  ;;  %v9038_v57 = vshrl.u32 %v7790_v12, 16 }
 0x10b   : > { %6412 = vmatmul.mubr.msk.bf16.gmra.mrb[8].mxu0 %vm1268_vm8, %v5866_v54  ;;  %v1820_v6 = vrot.slane %v1818_v14, 4  ;;  %v7981_v13 = vsel %vm7416_vm15, %v5604_v41, %v1818_v14  ;;  %v7985_v54 = vld [vmem:[#allocation2 + $0xa0] sm:$0xf]  ;;  %v5606_v14 = vrot.slane %v7777_v16, 9  ;;  %v8022_v41 = vld [vmem:[#allocation2 + $0xb4] sm:$0xf] }
 0x10c   : > { %6415 = vmatprep.mubr.msk.bf16.mxu0 %vm1268_vm8, %v5867_v11  ;;  %v5617_v11 = vcombine.low %v7934_v50, %v7938_v46  ;;  %v7977_v50 = vsel %vm7416_vm15, %v1813_v24, %v1814_v26  ;;  %v7983_v46 = vld [vmem:[#allocation2 + $0x9c] sm:$0xf]  ;;  %v5871_v26 = vcombine.low %v7956_v25, %v7967_v40  ;;  %v1839_v24 = vrot.slane %v7786_v44, 5  ;;  %v6837_v16 = vld [vmem:[#allocation2 + $0x64] sm:$0xf] }
 0x10d   : > { %v6839_v44 = vld [vmem:[#allocation2 + $0x5c] sm:$0x1]  ;;  %v6840_v40 = vld [vmem:[#allocation2 + $0x68] sm:$0x1] }
 0x10e   : > { %v1849_v25 = vrot.slane %v6839_v44, 5  ;;  %v1856_v36 = vrot.slane %v6840_v40, 5 }
 0x110   : > { %6258 = vmatmul.mubr.msk.bf16.gmra.mrb[24].mxu1 %vm1268_vm8, %v5581_v35  ;;  %v7973_v35 = vsel %vm7416_vm15, %v5603_v48, %v1811_v61  ;;  %v1827_v61 = vrot.slane %v1825_v4, 4  ;;  %v6835_v48 = vld [vmem:[#allocation2 + $0x38] sm:$0x1]  ;;  %v6841_v4 = vld [vmem:[#allocation2 + $0x70] sm:$0xf] }
 0x111   : > { %6261 = vmatprep.mubr.msk.bf16.mxu1 %vm1268_vm8, %v5582_v42  ;;  %v7989_v42 = vsel %vm7416_vm15, %v1820_v6, %v1821_v20  ;;  %v1828_v32 = vrot.slane %v6835_v48, 5  ;;  %v1832_v20 = vrot.slane %v7779_v22, 5  ;;  %v8004_v48 = vld [vmem:[#allocation2 + $0xac] sm:$0xf]  ;;  %v1860_v47 = vrot.slane %v6841_v4, 5 }
 0x112   : > { %v9042_v4 = vshrl.u32 %v7825_v55, 16 }
 0x113   : > { %6416 = vmatmul.mubr.msk.bf16.gmra.mrb[12].mxu0 %vm1268_vm8, %v5868_v62  ;;  %v8020_v22 = vsel %vm7416_vm15, %v1827_v61, %v1828_v32  ;;  %v6836_v62 = vld [vmem:[#allocation2 + $0x44] sm:$0x1]  ;;  %v8029_v15 = vsel %vm7416_vm15, %v5606_v14, %v1832_v20  ;;  %v9037_v32 = vcombine.low %v7662_v18, %v7664_v7  ;;  %v1834_v61 = vrot.slane %v1832_v20, 4  ;;  %v6838_v20 = vld [vmem:[#allocation2 + $0x50] sm:$0x1] }
 0x114   : > { %6419 = vmatprep.mubr.msk.bf16.mxu0 %vm1268_vm8, %v5869_v60  ;;  %v1835_v6 = vrot.slane %v6836_v62, 5  ;;  %v1853_v14 = vrot.slane %v6837_v16, 5  ;;  %v5607_v60 = vrot.slane %v7784_v63, 9  ;;  %v4067_v18 = vshll.u32 %v7792_v17, 16 }
 0x115   : > { %v1841_v7 = vrot.slane %v1839_v24, 4  ;;  %v5608_v62 = vrot.slane %v7813_v49, 9  ;;  %v1848_v16 = vrot.slane %v1846_v39, 4  ;;  %v4060_v63 = vrot.slane %v9038_v57, 4 }
 0x116   : > { %v1855_v58 = vrot.slane %v1853_v14, 4  ;;  %v9040_v49 = vcombine.low %v7940_v45, %v7942_v10  ;;  %v8059_v44 = vrot.slane %v4067_v18, 5  ;;  %v4084_v1 = vrot.slane %v9042_v4, 4 }
 0x117   : > { %v9043_v57 = vshll.u32 %v7825_v55, 16  ;;  %v8070_v12 = vsel %vm7416_vm15, %v1834_v61, %v1835_v6  ;;  %v8074_v34 = vsel %vm7416_vm15, %v5607_v60, %v1839_v24  ;;  %v8082_v18 = vsel %vm7416_vm15, %v5608_v62, %v1846_v39  ;;  %v8084_v55 = vld [vmem:[#allocation2 + $0xcc] sm:$0xf]  ;;  %v8094_v24 = vld [vmem:[#allocation2 + $0xc0] sm:$0xf] }
 0x118   : > { %6262 = vmatmul.mubr.msk.bf16.gmra.mrb[28].mxu1 %vm1268_vm8, %v9037_v32  ;;  %v1842_v32 = vrot.slane %v6838_v20, 5  ;;  %v4091_v20 = vshll.u32 %v7827_v5, 16  ;;  %v8092_v6 = vsel %vm7416_vm15, %v1848_v16, %v1849_v25  ;;  %v8096_v60 = vld [vmem:[#allocation2 + $0xc4] sm:$0xf]  ;;  %v6842_v39 = vld [vmem:[#allocation2 + $0x6c] sm:$0xf]  ;;  %v8108_v25 = vsel %vm7416_vm15, %v1855_v58, %v1856_v36 }
 0x119   : > { %6267 = vmatprep.mubr.msk.bf16.mxu1 %vm1268_vm8, %v5617_v11  ;;  %v5609_v11 = vrot.slane %v7820_v33, 9  ;;  %v9041_v33 = vshrl.u32 %v7792_v17, 16  ;;  %v4087_v28 = vrot.slane %v9043_v57, 5  ;;  %9045 = vst [vmem:[#allocation14_spill] sm:$0xff] %v8096_v60  ;;  %v5610_v62 = vrot.slane %v6842_v39, 9 }
 0x11a   : > { %v8078_v17 = vsel %vm7416_vm15, %v1841_v7, %v1842_v32  ;;  %v6843_v7 = vld [vmem:[#allocation2 + $0x74] sm:$0x1]  ;;  %v1862_v16 = vrot.slane %v1860_v47, 4  ;;  %v8110_v4 = vrot.slane %v4091_v20, 5  ;;  %v9047_v57 = vshrl.u32 %v7827_v5, 16 }
 0x11b   : > { %6420 = vmatmul.mubr.msk.bf16.gmra.mrb[16].mxu0 %vm1268_vm8, %v9040_v49  ;;  %v4073_v40 = vrot.slane %v9041_v33, 4  ;;  %v8086_v49 = vld [vmem:[#allocation2 + $0xd0] sm:$0xf]  ;;  %v8100_v61 = vsel %vm7416_vm15, %v5609_v11, %v1853_v14  ;;  %v1863_v32 = vrot.slane %v6843_v7, 5  ;;  %v9046_v33 = vcombine.low %v7801_v52, %v7805_v2  ;;  %v8121_v36 = vld [vmem:[#allocation2 + $0x2c] sm:$0x1] }
 0x11c   : > { %6423 = vmatprep.mubr.msk.bf16.mxu0 %vm1268_vm8, %v5871_v26  ;;  %v8088_v26 = vld [vmem:[#allocation2 + $0x20] sm:$0x1]  ;;  %v4097_v14 = vrot.slane %v9047_v57, 4  ;;  %v9048_v11 = vcombine.low %v7973_v35, %v7977_v50  ;;  %v4064_v52 = vor.u32 %v4063_v23, %v4060_v63  ;;  %9049 = vst [vmem:[#allocation15_spill] sm:$0xff] %v8121_v36  ;;  %v4088_v58 = vor.u32 %v4087_v28, %v4084_v1  ;;  %v6844_v23 = vld [vmem:[%s8994_s1 + $0x8] sm:$0x3] }
 0x11d   : > { %9044 = vst [vmem:[#allocation13_spill] sm:$0xff] %v8088_v26  ;;  %v4074_v2 = vor.u32 %v4073_v40, %v8059_v44  ;;  %v4077_v39 = vshll.u32 %v8088_v26, 16  ;;  %v8139_v1 = vsel %vm7416_vm15, %v5610_v62, %v1860_v47  ;;  %v6845_v50 = vld [vmem:[#allocation2 + $0x7c] sm:$0xf]  ;;  %v4115_v40 = vshll.u32 %v7831_v56, 16 }
 0x11e   : > { %v1867_v63 = vrot.slane %v6845_v50, 5  ;;  %v4098_v57 = vor.u32 %v4097_v14, %v8110_v4  ;;  %v4065_v47 = vrot.slane %v4064_v52, 4  ;;  %v4089_v28 = vrot.slane %v4088_v58, 4  ;;  %v6847_v35 = vld [vmem:[#allocation2 + $0x80] sm:$0x1] }
 0x11f   : > { %v4075_v62 = vrot.slane %v4074_v2, 4  ;;  %v4079_v50 = vrot.slane %v4077_v39, 5  ;;  %v9051_v7 = vcombine.low %v7997_v59, %v8004_v48  ;;  %v1870_v14 = vrot.slane %v6847_v35, 5  ;;  %v6848_v52 = vld [vmem:[#allocation2 + $0x88] sm:$0xf] }
 0x120   : > { %6268 = vmatmul.mubr.msk.bf16.vlgmr.msra.gmra.mrb[0].mxu1 %vm1268_vm8, %v9046_v33  ;;  %v8146_v33 = vsel %vm7416_vm15, %v1862_v16, %v1863_v32  ;;  %v6846_v32 = vld [vmem:[#allocation2 + $0x78] sm:$0xf]  ;;  %v9052_v5 = vshrl.u32 %v7829_v30, 16  ;;  %v1874_v2 = vrot.slane %v6848_v52, 5  ;;  %v8162_v39 = vrot.slane %v4115_v40, 5 }
 0x121   : > { %6300 = vmatpush3.bf16.msra.mxu1 %v7963_v29  ;;  %6271 = vmatprep.mubr.msk.bf16.mxu1 %vm1268_vm8, %v9048_v11  ;;  %v5875_v29 = vcombine.low %v8094_v24, %v8096_v60  ;;  %v4101_v11 = vshll.u32 %v8121_v36, 16  ;;  %v5611_v16 = vrot.slane %v6846_v32, 9  ;;  %v9053_v36 = vshll.u32 %v7829_v30, 16  ;;  %v8172_v30 = vld [vmem:[#allocation2 + $0x38] sm:$0x1] }
 0x122   : > { %6766 = vmatprep.subr.msk.bf16.mxu1 %vm1317_vm0, %v6844_v23  ;;  %v9050_v23 = vcombine.low %v7983_v46, %v7985_v54  ;;  %v4108_v20 = vrot.slane %v9052_v5, 4  ;;  %v9054_v58 = vshrl.u32 %v7831_v56, 16  ;;  %v4099_v5 = vrot.slane %v4098_v57, 4  ;;  %v6849_v57 = vld [vmem:[#allocation2 + $0x84] sm:$0xf] }
 0x123   : > { %v4111_v26 = vrot.slane %v9053_v36, 5  ;;  %v4103_v32 = vrot.slane %v4101_v11, 5  ;;  %v4139_v36 = vshll.u32 %v7854_v51, 16  ;;  %v9056_v40 = vcombine.low %v8016_v21, %v8020_v22 }
 0x124   : > { %6424 = vmatmul.mubr.msk.bf16.gmra.mrb[20].mxu0 %vm1268_vm8, %v9050_v23  ;;  %v1869_v23 = vrot.slane %v1867_v63, 4  ;;  %v4121_v60 = vrot.slane %v9054_v58, 4  ;;  %v4070_v56 = vsel %vm7117_vm12, %v4065_v47, %v8059_v44  ;;  %v5612_v11 = vrot.slane %v6849_v57, 9 }
 0x125   : > { %6427 = vmatprep.mubr.msk.bf16.mxu0 %vm1268_vm8, %v9051_v7  ;;  %v9055_v7 = vcombine.low %v7981_v13, %v7989_v42  ;;  %v4080_v13 = vsel %vm7117_vm12, %v4075_v62, %v4079_v50  ;;  %v4094_v42 = vsel %vm7117_vm12, %v4089_v28, %v8110_v4  ;;  %v8189_v52 = vsel %vm7416_vm15, %v5611_v16, %v1867_v63  ;;  %v8201_v50 = vld [vmem:[#allocation2 + $0x44] sm:$0x1] }
 0x126   : > { %v4112_v21 = vor.u32 %v4111_v26, %v4108_v20  ;;  %v9057_v22 = vshrl.u32 %v7852_v8, 16  ;;  %v8197_v47 = vsel %vm7416_vm15, %v1869_v23, %v1870_v14  ;;  %v1876_v62 = vrot.slane %v1874_v2, 4  ;;  %v6850_v20 = vld [vmem:[#allocation2 + $0x8c] sm:$0x1] }
 0x127   : > { %v4122_v4 = vor.u32 %v4121_v60, %v8162_v39  ;;  %v4125_v28 = vshll.u32 %v8172_v30, 16  ;;  %v4104_v26 = vsel %vm7117_vm12, %v4099_v5, %v4103_v32  ;;  %v1877_v63 = vrot.slane %v6850_v20, 5 }
 0x128   : > { %6272 = vmatmul.mubr.msk.bf16.gmra.mrb[4].mxu1 %vm1268_vm8, %v9055_v7  ;;  %v4132_v58 = vrot.slane %v9057_v22, 4  ;;  %v9058_v7 = vshll.u32 %v7852_v8, 16  ;;  %v8205_v16 = vrot.slane %v4139_v36, 5  ;;  %v9059_v8 = vshrl.u32 %v7854_v51, 16 }
 0x129   : > { %6275 = vmatprep.mubr.msk.bf16.mxu1 %vm1268_vm8, %v9056_v40  ;;  %v9060_v14 = vcombine.low %v8022_v41, %v8024_v3  ;;  %v5894_v60 = vcombine.low %v4070_v56, %v4080_v13  ;;  %v8215_v23 = vsel %vm1317_vm0, %v7846_v9, 0  ;;  %v8219_v5 = vsel %vm7416_vm15, %v5612_v11, %v1874_v2 }
 0x12a   : > { %v4135_v44 = vrot.slane %v9058_v7, 5  ;;  %v4145_v40 = vrot.slane %v9059_v8, 4  ;;  %v4163_v32 = vshll.u32 %v7858_v53, 16  ;;  %v4113_v36 = vrot.slane %v4112_v21, 4  ;;  %v6851_v7 = vld [vmem:[#allocation2 + $0x94] sm:$0xf] }
 0x12b   : > { %v4149_v22 = vshll.u32 %v8201_v50, 16  ;;  %v8226_v56 = vcombine.low %v4094_v42, %v4104_v26  ;;  %v4123_v13 = vrot.slane %v4122_v4, 4  ;;  %v4127_v9 = vrot.slane %v4125_v28, 5  ;;  %v8245_v28 = vld [vmem:[#allocation2 + $0x50] sm:$0x1] }
 0x12c   : > { %6428 = vmatmul.mubr.msk.bf16.gmra.mrb[24].mxu0 %vm1268_vm8, %v9060_v14  ;;  %v4136_v57 = vor.u32 %v4135_v44, %v4132_v58  ;;  %v1881_v20 = vrot.slane %v6851_v7, 5  ;;  %v9061_v2 = vcombine.low %v8029_v15, %v8070_v12  ;;  %v4146_v11 = vor.u32 %v4145_v40, %v8205_v16  ;;  %v6852_v15 = vld [vmem:[#allocation2 + $0x90] sm:$0xf] }
 0x12d   : > { %6431 = vmatprep.mubr.msk.bf16.mxu0 %vm1268_vm8, %v5875_v29  ;;  %v8234_v29 = vsel %vm7416_vm15, %v1876_v62, %v1877_v63  ;;  %v9062_v21 = vshrl.u32 %v7856_v27, 16  ;;  %v9063_v42 = vshll.u32 %v7856_v27, 16  ;;  %v9064_v4 = vcombine.low %v8074_v34, %v8078_v17  ;;  %v6853_v34 = vld [vmem:[#allocation2 + $0x98] sm:$0x1] }
 0x12e   : > { %v5613_v12 = vrot.slane %v6852_v15, 9  ;;  %v8247_v26 = vrot.slane %v4163_v32, 5  ;;  %v9065_v62 = vshrl.u32 %v7858_v53, 16  ;;  %v4187_v8 = vshll.u32 %v7877_v37, 16 }
 0x12f   : > { %v4156_v58 = vrot.slane %v9062_v21, 4  ;;  %v4159_v44 = vrot.slane %v9063_v42, 5  ;;  %v4118_v27 = vsel %vm7117_vm12, %v4113_v36, %v8162_v39  ;;  %v4137_v40 = vrot.slane %v4136_v57, 4  ;;  %v6854_v21 = vld [vmem:[#allocation2 + $0x9c] sm:$0xf] }
 0x130   : > { %6276 = vmatmul.mubr.msk.bf16.gmra.mrb[8].mxu1 %vm1268_vm8, %v9061_v2  ;;  %v4169_v63 = vrot.slane %v9065_v62, 4  ;;  %v4151_v14 = vrot.slane %v4149_v22, 5  ;;  %v1884_v17 = vrot.slane %v6853_v34, 5  ;;  %v4128_v7 = vsel %vm7117_vm12, %v4123_v13, %v4127_v9  ;;  %v6855_v42 = vld [vmem:[#allocation2 + $0xa0] sm:$0xf] }
 0x131   : > { %6279 = vmatprep.mubr.msk.bf16.mxu1 %vm1268_vm8, %v9064_v4  ;;  %v1883_v2 = vrot.slane %v1881_v20, 4  ;;  %v5614_v32 = vrot.slane %v6854_v21, 9  ;;  %v1888_v4 = vrot.slane %v6855_v42, 5  ;;  %v4147_v53 = vrot.slane %v4146_v11, 4  ;;  %v8265_v57 = vld [vmem:[#allocation2 + $0x5c] sm:$0x1] }
 0x132   : > { %v4160_v15 = vor.u32 %v4159_v44, %v4156_v58  ;;  %v4173_v62 = vshll.u32 %v8245_v28, 16  ;;  %v9066_v51 = vshrl.u32 %v7871_v31, 16  ;;  %v9067_v39 = vcombine.low %v8084_v55, %v8086_v49 }
 0x133   : > { %v4170_v36 = vor.u32 %v4169_v63, %v8247_v26  ;;  %v9068_v22 = vshll.u32 %v7871_v31, 16  ;;  %v8269_v9 = vrot.slane %v4187_v8, 5  ;;  %v9069_v11 = vshrl.u32 %v7877_v37, 16 }
 0x134   : > { %v4180_v35 = vrot.slane %v9066_v51, 4  ;;  %6432 = vmatmul.mubr.msk.bf16.gmra.mrb[28].mxu0 %vm1268_vm8, %v9067_v39  ;;  %v5628_v51 = vcombine.low %v8219_v5, %v8234_v29  ;;  %v4142_v44 = vsel %vm7117_vm12, %v4137_v40, %v8205_v16  ;;  %v8281_v63 = vsel %vm7416_vm15, %v5613_v12, %v1881_v20 }
 0x135   : > { %v4183_v13 = vrot.slane %v9068_v22, 5  ;;  %v4193_v58 = vrot.slane %v9069_v11, 4  ;;  %6437 = vmatprep.mubr.msk.bf16.mxu0 %vm1268_vm8, %v5894_v60  ;;  %v4211_v31 = vshll.u32 %v7893_v38, 16  ;;  %v5896_v8 = vcombine.low %v4118_v27, %v4128_v7  ;;  %v6856_v60 = vld [vmem:[#allocation2 + $0xa4] sm:$0x1] }
 0x136   : > { %v8286_v37 = vsel %vm7416_vm15, %v1883_v2, %v1884_v17  ;;  %v1890_v34 = vrot.slane %v1888_v4, 4  ;;  %v1891_v21 = vrot.slane %v6856_v60, 5  ;;  %v9070_v42 = vcombine.low %v8082_v18, %v8092_v6  ;;  %v8304_v2 = vld [vmem:[#allocation2 + $0x68] sm:$0x1]  ;;  %v9076_v22 = vld [vmem:[#allocation8_spill] sm:$0xff]  ;;  %v9078_v60 = vld [vmem:[#allocation10_spill] sm:$0xff] }
 0x137   : > { %v4152_v16 = vsel %vm7117_vm12, %v4147_v53, %v4151_v14  ;;  %v8296_v20 = vsel %vm7416_vm15, %v5614_v32, %v1888_v4  ;;  %v4161_v12 = vrot.slane %v4160_v15, 4  ;;  %v4197_v27 = vshll.u32 %v8265_v57, 16 }
 0x138   : > { %6280 = vmatmul.mubr.msk.bf16.gmra.mrb[12].mxu1 %vm1268_vm8, %v9070_v42  ;;  %v9071_v40 = vcombine.low %v8100_v61, %v8108_v25  ;;  %v4171_v17 = vrot.slane %v4170_v36, 4  ;;  %v4175_v7 = vrot.slane %v4173_v62, 5  ;;  %v4184_v18 = vor.u32 %v4183_v13, %v4180_v35  ;;  %v9075_v35 = vld [vmem:[#allocation5_spill] sm:$0xff] }
 0x139   : > { %v4194_v6 = vor.u32 %v4193_v58, %v8269_v9  ;;  %v9072_v14 = vshrl.u32 %v7886_v0, 16  ;;  %v9073_v32 = vshll.u32 %v7886_v0, 16  ;;  %v8310_v15 = vrot.slane %v4211_v31, 5  ;;  %v9077_v58 = vld [vmem:[#allocation4_spill] sm:$0xff] }
 0x13a   : > { %6283 = vmatprep.mubr.msk.bf16.mxu1 %vm1268_vm8, %v9071_v40  ;;  %v9074_v39 = vshrl.u32 %v7893_v38, 16  ;;  %v5897_v25 = vcombine.low %v4142_v44, %v4152_v16  ;;  %v8316_v62 = vsel %vm7416_vm15, %v1890_v34, %v1891_v21  ;;  %v1895_v36 = vrot.slane %v9075_v35, 5 }
 0x13b   : > { %v4204_v53 = vrot.slane %v9072_v14, 4  ;;  %v4207_v4 = vrot.slane %v9073_v32, 5  ;;  %v4235_v13 = vshll.u32 %v9076_v22, 16  ;;  %v4166_v11 = vsel %vm7117_vm12, %v4161_v12, %v8247_v26  ;;  %v9079_v12 = vld [vmem:[#allocation7_spill] sm:$0xff] }
 0x13c   : > { %v4217_v61 = vrot.slane %v9074_v39, 4  ;;  %v4199_v0 = vrot.slane %v4197_v27, 5  ;;  %v5615_v31 = vrot.slane %v9077_v58, 9  ;;  %v4259_v42 = vshll.u32 %v9078_v60, 16  ;;  %6438 = vmatmul.mubr.msk.bf16.vlgmr.msra.gmra.mrb[0].mxu0 %vm1268_vm8, %v8226_v56  ;;  %v9082_v39 = vld [vmem:[#allocation6_spill] sm:$0xff] }
 0x13d   : > { %v4176_v38 = vsel %vm7117_vm12, %v4171_v17, %v4175_v7  ;;  %v4185_v44 = vrot.slane %v4184_v18, 4  ;;  %v4195_v34 = vrot.slane %v4194_v6, 4  ;;  %v4221_v21 = vshll.u32 %v8304_v2, 16  ;;  %6470 = vmatpush3.bf16.msra.mxu0 %v8215_v23  ;;  %6441 = vmatprep.mubr.msk.bf16.mxu0 %vm1268_vm8, %v5896_v8  ;;  %v8338_v7 = vld [vmem:[#allocation2 + $0x74] sm:$0x1] }
 0x13e   : > { %v4208_v26 = vor.u32 %v4207_v4, %v4204_v53  ;;  %v4218_v16 = vor.u32 %v4217_v61, %v8310_v15  ;;  %v9080_v27 = vshrl.u32 %v9079_v12, 16  ;;  %v9081_v14 = vshll.u32 %v9079_v12, 16  ;;  %v8348_v53 = vld [vmem:[#allocation2 + $0x80] sm:$0x1]  ;;  %v9085_v4 = vld [vmem:[#allocation9_spill] sm:$0xff] }
 0x13f   : > { %v1897_v32 = vrot.slane %v1895_v36, 4  ;;  %v1898_v17 = vrot.slane %v9082_v39, 5  ;;  %v8340_v18 = vrot.slane %v4235_v13, 5  ;;  %v9083_v23 = vshrl.u32 %v9076_v22, 16 }
 0x140   : > { %v4228_v40 = vrot.slane %v9080_v27, 4  ;;  %v4231_v56 = vrot.slane %v9081_v14, 5  ;;  %v9084_v8 = vcombine.low %v8139_v1, %v8146_v33  ;;  %v9086_v61 = vshrl.u32 %v9085_v4, 16 }
 0x141   : > { %v4241_v6 = vrot.slane %v9083_v23, 4  ;;  %v9087_v58 = vshll.u32 %v9085_v4, 16  ;;  %v8354_v27 = vrot.slane %v4259_v42, 5  ;;  %v9088_v13 = vshrl.u32 %v9078_v60, 16 }
 0x142   : > { %6284 = vmatmul.mubr.msk.bf16.gmra.mrb[16].mxu1 %vm1268_vm8, %v9084_v8  ;;  %v4252_v35 = vrot.slane %v9086_v61, 4  ;;  %v9089_v22 = vcombine.low %v8189_v52, %v8197_v47  ;;  %v5898_v1 = vcombine.low %v4166_v11, %v4176_v38  ;;  %v4190_v33 = vsel %vm7117_vm12, %v4185_v44, %v8269_v9 }
 0x143   : > { %v4255_v12 = vrot.slane %v9087_v58, 5  ;;  %v4265_v14 = vrot.slane %v9088_v13, 4  ;;  %v4200_v39 = vsel %vm7117_vm12, %v4195_v34, %v4199_v0  ;;  %v4223_v23 = vrot.slane %v4221_v21, 5  ;;  %v8398_v58 = vld [vmem:[#allocation2 + $0x8c] sm:$0x1] }
 0x144   : > { %6287 = vmatprep.mubr.msk.bf16.mxu1 %vm1268_vm8, %v9089_v22  ;;  %v4209_v8 = vrot.slane %v4208_v26, 4  ;;  %v4219_v42 = vrot.slane %v4218_v16, 4  ;;  %v4232_v4 = vor.u32 %v4231_v56, %v4228_v40  ;;  %v4245_v60 = vshll.u32 %v8338_v7, 16  ;;  %6442 = vmatmul.mubr.msk.bf16.gmra.mrb[4].mxu0 %vm1268_vm8, %v5897_v25  ;;  %v9094_v22 = vld [vmem:[#allocation11_spill] sm:$0xff] }
 0x145   : > { %v5629_v61 = vcombine.low %v8281_v63, %v8286_v37  ;;  %v5630_v52 = vcombine.low %v8296_v20, %v8316_v62  ;;  %v4242_v47 = vor.u32 %v4241_v6, %v8340_v18  ;;  %v4269_v11 = vshll.u32 %v8348_v53, 16  ;;  %v6857_v37 = vld [vmem:[#allocation2 + $0xb8] sm:$0xf]  ;;  %v9090_v62 = vld [vmem:[#allocation12_spill] sm:$0xff]  ;;  %6445 = vmatprep.mubr.msk.bf16.mxu0 %vm1268_vm8, %v5898_v1 }
 0x146   : > { %v8376_v9 = vsel %vm7416_vm15, %v5615_v31, %v1895_v36  ;;  %v4256_v0 = vor.u32 %v4255_v12, %v4252_v35  ;;  %v4266_v38 = vor.u32 %v4265_v14, %v8354_v27  ;;  %v4283_v44 = vshll.u32 %v7942_v10, 16 }
 0x147   : > { %v5899_v34 = vcombine.low %v4190_v33, %v4200_v39  ;;  %v1899_v63 = vsel %vm7416_vm15, %v1897_v32, %v1898_v17  ;;  %v1902_v20 = vrot.slane %v6857_v37, 5  ;;  %v4307_v21 = vshll.u32 %v9090_v62, 16 }
 0x148   : > { %v4214_v36 = vsel %vm7117_vm12, %v4209_v8, %v8310_v15  ;;  %v4224_v31 = vsel %vm7117_vm12, %v4219_v42, %v4223_v23  ;;  %v4233_v26 = vrot.slane %v4232_v4, 4  ;;  %v4247_v16 = vrot.slane %v4245_v60, 5  ;;  %v6858_v23 = vld [vmem:[#allocation2 + $0xb4] sm:$0xf]  ;;  %v6859_v4 = vld [vmem:[#allocation2 + $0xbc] sm:$0x1] }
 0x149   : > { %v4243_v25 = vrot.slane %v4242_v47, 4  ;;  %v4271_v40 = vrot.slane %v4269_v11, 5  ;;  %v9091_v56 = vshrl.u32 %v7940_v45, 16  ;;  %v9092_v17 = vshll.u32 %v7940_v45, 16  ;;  %v8413_v47 = vld [vmem:[#allocation2 + $0x98] sm:$0x1] }
 0x14a   : > { %6288 = vmatmul.mubr.msk.bf16.gmra.mrb[20].mxu1 %vm1268_vm8, %v5628_v51  ;;  %v4257_v35 = vrot.slane %v4256_v0, 4  ;;  %v4267_v15 = vrot.slane %v4266_v38, 4  ;;  %v8400_v12 = vrot.slane %v4283_v44, 5  ;;  %v9093_v13 = vshrl.u32 %v7942_v10, 16 }
 0x14b   : > { %v4276_v32 = vrot.slane %v9091_v56, 4  ;;  %v4279_v6 = vrot.slane %v9092_v17, 5  ;;  %6291 = vmatprep.mubr.msk.bf16.mxu1 %vm1268_vm8, %v5629_v61  ;;  %v9095_v1 = vshrl.u32 %v9094_v22, 16  ;;  %v9096_v33 = vshll.u32 %v9094_v22, 16 }
 0x14c   : > { %v4289_v14 = vrot.slane %v9093_v13, 4  ;;  %v8409_v5 = vrot.slane %v4307_v21, 5  ;;  %v9097_v29 = vshrl.u32 %v9090_v62, 16  ;;  %v5616_v8 = vrot.slane %v6858_v23, 9  ;;  %6446 = vmatmul.mubr.msk.bf16.gmra.mrb[8].mxu0 %vm1268_vm8, %v5899_v34 }
 0x14d   : > { %v4300_v45 = vrot.slane %v9095_v1, 4  ;;  %v4303_v39 = vrot.slane %v9096_v33, 5  ;;  %v1904_v42 = vrot.slane %v1902_v20, 4  ;;  %v1905_v60 = vrot.slane %v6859_v4, 5  ;;  %v8449_v33 = vld [vmem:[#allocation2 + $0xa4] sm:$0x1] }
 0x14e   : > { %v4313_v51 = vrot.slane %v9097_v29, 4  ;;  %v5900_v10 = vcombine.low %v4214_v36, %v4224_v31  ;;  %v5631_v61 = vcombine.low %v8376_v9, %v1899_v63  ;;  %v4238_v11 = vsel %vm7117_vm12, %v4233_v26, %v8340_v18 }
 0x14f   : > { %v4280_v0 = vor.u32 %v4279_v6, %v4276_v32  ;;  %v4293_v38 = vshll.u32 %v8398_v58, 16  ;;  %v4248_v44 = vsel %vm7117_vm12, %v4243_v25, %v4247_v16  ;;  %v4262_v37 = vsel %vm7117_vm12, %v4257_v35, %v8354_v27 }
 0x150   : > { %v4290_v62 = vor.u32 %v4289_v14, %v8400_v12  ;;  %v4331_v21 = vshll.u32 %v7985_v54, 16  ;;  %v4272_v9 = vsel %vm7117_vm12, %v4267_v15, %v4271_v40  ;;  %v4304_v18 = vor.u32 %v4303_v39, %v4300_v45  ;;  %6449 = vmatprep.mubr.msk.bf16.mxu0 %vm1268_vm8, %v5900_v10  ;;  %v8451_v39 = vld [vmem:[#allocation2 + $0xb0] sm:$0x1] }
 0x151   : > { %v4314_v63 = vor.u32 %v4313_v51, %v8409_v5  ;;  %v4317_v36 = vshll.u32 %v8413_v47, 16  ;;  %v4370_v31 = vshrl.u32 %v8022_v41, 16  ;;  %v1903_v26 = vsel %vm7416_vm15, %v5616_v8, %v1902_v20 }
 0x152   : > { %v1906_v27 = vsel %vm7416_vm15, %v1904_v42, %v1905_v60  ;;  %v4355_v34 = vshll.u32 %v8004_v48, 16  ;;  %v5901_v16 = vcombine.low %v4238_v11, %v4248_v44  ;;  %v4281_v25 = vrot.slane %v4280_v0, 4  ;;  %6292 = vmatmul.mubr.msk.bf16.gmra.mrb[24].mxu1 %vm1268_vm8, %v5630_v52  ;;  %v6861_v11 = vld [vmem:[#allocation2 + $0x10] sm:$0xf] }
 0x153   : > { %v4295_v40 = vrot.slane %v4293_v38, 5  ;;  %v9098_v56 = vshrl.u32 %v7983_v46, 16  ;;  %v5902_v17 = vcombine.low %v4262_v37, %v4272_v9  ;;  %v9099_v6 = vshll.u32 %v7983_v46, 16  ;;  %6295 = vmatprep.mubr.msk.bf16.mxu1 %vm1268_vm8, %v5631_v61  ;;  %v6860_v61 = vld [vmem:[#allocation2 + $0xc] sm:$0xf] }
 0x154   : > { %v8444_v20 = vrot.slane %v4331_v21, 5  ;;  %v9100_v15 = vshrl.u32 %v7985_v54, 16  ;;  %v4291_v14 = vrot.slane %v4290_v62, 4  ;;  %v4305_v22 = vrot.slane %v4304_v18, 4  ;;  %6450 = vmatmul.mubr.msk.bf16.gmra.mrb[12].mxu0 %vm1268_vm8, %v5901_v16 }
 0x155   : > { %v4324_v32 = vrot.slane %v9098_v56, 4  ;;  %v4327_v35 = vrot.slane %v9099_v6, 5  ;;  %v4315_v1 = vrot.slane %v4314_v63, 4  ;;  %v4319_v45 = vrot.slane %v4317_v36, 5  ;;  %6453 = vmatprep.mubr.msk.bf16.mxu0 %vm1268_vm8, %v5902_v17  ;;  %v9104_v36 = vld [vmem:[#allocation14_spill] sm:$0xff] }
 0x156   : > { %v4337_v13 = vrot.slane %v9100_v15, 4  ;;  %v9101_v52 = vshrl.u32 %v7997_v59, 16  ;;  %v9102_v46 = vshll.u32 %v7997_v59, 16  ;;  %v8457_v23 = vrot.slane %v4355_v34, 5 }
 0x157   : > { %v9103_v54 = vshrl.u32 %v8004_v48, 16  ;;  %v4373_v42 = vshll.u32 %v8022_v41, 16  ;;  %v4383_v4 = vshrl.u32 %v8024_v3, 16  ;;  %v4394_v60 = vshrl.u32 %v8094_v24, 16 }
 0x158   : > { %v4348_v29 = vrot.slane %v9101_v52, 4  ;;  %v4351_v51 = vrot.slane %v9102_v46, 5  ;;  %v5632_v10 = vcombine.low %v1903_v26, %v1906_v27  ;;  %v5698_v0 = vcombine.low %v6860_v61, %v6861_v11  ;;  %v6862_v46 = vld [vmem:[#allocation2 + $0x18] sm:$0xf] }
 0x159   : > { %v4361_v8 = vrot.slane %v9103_v54, 4  ;;  %v4328_v38 = vor.u32 %v4327_v35, %v4324_v32  ;;  %v4338_v44 = vor.u32 %v4337_v13, %v8444_v20  ;;  %v4341_v59 = vshll.u32 %v8449_v33, 16  ;;  %v8487_v35 = vld [vmem:[#allocation2 + $0xbc] sm:$0x1] }
 0x15a   : > { %v4286_v48 = vsel %vm7117_vm12, %v4281_v25, %v8400_v12  ;;  %v4296_v41 = vsel %vm7117_vm12, %v4291_v14, %v4295_v40  ;;  %v4310_v37 = vsel %vm7117_vm12, %v4305_v22, %v8409_v5  ;;  %v4365_v62 = vshll.u32 %v8451_v39, 16  ;;  %6296 = vmatmul.mubr.msk.bf16.gmra.mrb[28].mxu1 %vm1268_vm8, %v5632_v10  ;;  %v8493_v10 = vld [vmem:[#allocation2 + $0xc8] sm:$0x1] }
 0x15b   : > { %v4320_v21 = vsel %vm7117_vm12, %v4315_v1, %v4319_v45  ;;  %v4352_v9 = vor.u32 %v4351_v51, %v4348_v29  ;;  %v4362_v18 = vor.u32 %v4361_v8, %v8457_v23  ;;  %v4379_v63 = vshll.u32 %v8024_v3, 16  ;;  %6301 = vmatprep.mubr.msk.bf16.mxu1 %vm1268_vm8, %v5698_v0  ;;  %v6863_v51 = vld [vmem:[#allocation2 + $0x1c] sm:$0xf]  ;;  %v6865_v8 = vld [vmem:[#allocation2 + $0x28] sm:$0xf] }
 0x15c   : > { %v4397_v12 = vshll.u32 %v8094_v24, 16  ;;  %v4407_v26 = vshrl.u32 %v9104_v36, 16  ;;  %v4418_v27 = vshrl.u32 %v8084_v55, 16  ;;  %v4403_v5 = vshll.u32 %v9104_v36, 16 }
 0x15d   : > { %v5903_v34 = vcombine.low %v4286_v48, %v4296_v41  ;;  %v4329_v16 = vrot.slane %v4328_v38, 4  ;;  %v4339_v25 = vrot.slane %v4338_v44, 4  ;;  %v4343_v40 = vrot.slane %v4341_v59, 5 }
 0x15e   : > { %v5904_v56 = vcombine.low %v4310_v37, %v4320_v21  ;;  %v4367_v32 = vrot.slane %v4365_v62, 5  ;;  %v4372_v17 = vrot.slane %v4370_v31, 4  ;;  %v4375_v3 = vrot.slane %v4373_v42, 5  ;;  %v6864_v31 = vld [vmem:[#allocation2 + $0x24] sm:$0xf]  ;;  %v9105_v37 = vld [vmem:[#allocation3_spill] sm:$0xff] }
 0x15f   : > { %v4353_v6 = vrot.slane %v4352_v9, 4  ;;  %v4363_v24 = vrot.slane %v4362_v18, 4  ;;  %v8489_v15 = vrot.slane %v4379_v63, 5  ;;  %v4385_v13 = vrot.slane %v4383_v4, 4  ;;  %6454 = vmatmul.mubr.msk.bf16.gmra.mrb[16].mxu0 %vm1268_vm8, %v5903_v34  ;;  %v8516_v34 = vld [vmem:[#allocation2 + $0xd4] sm:$0x1] }
 0x160   : > { %v4396_v14 = vrot.slane %v4394_v60, 4  ;;  %v4399_v22 = vrot.slane %v4397_v12, 5  ;;  %v4405_v1 = vrot.slane %v4403_v5, 5  ;;  %v4409_v45 = vrot.slane %v4407_v26, 4  ;;  %6457 = vmatprep.mubr.msk.bf16.mxu0 %vm1268_vm8, %v5904_v56  ;;  %v6868_v56 = vld [vmem:[#allocation2 + $0x3c] sm:$0xf] }
 0x161   : > { %v4421_v52 = vshll.u32 %v8084_v55, 16  ;;  %v4431_v29 = vshrl.u32 %v8086_v49, 16  ;;  %v5699_v54 = vcombine.low %v6862_v46, %v6863_v51  ;;  %v5700_v42 = vcombine.low %v6864_v31, %v6865_v8  ;;  %v6871_v31 = vld [vmem:[#allocation2 + $0x18] sm:$0xf] }
 0x162   : > { %v4334_v4 = vsel %vm7117_vm12, %v4329_v16, %v8444_v20  ;;  %v4344_v60 = vsel %vm7117_vm12, %v4339_v25, %v4343_v40  ;;  %v4376_v55 = vor.u32 %v4375_v3, %v4372_v17  ;;  %v4389_v61 = vshll.u32 %v8487_v35, 16  ;;  %v6866_v16 = vld [vmem:[#allocation2 + $0x30] sm:$0xf]  ;;  %v6867_v25 = vld [vmem:[#allocation2 + $0x34] sm:$0xf] }
 0x163   : > { %v4358_v11 = vsel %vm7117_vm12, %v4353_v6, %v8457_v23  ;;  %v4368_v0 = vsel %vm7117_vm12, %v4363_v24, %v4367_v32  ;;  %v4386_v38 = vor.u32 %v4385_v13, %v8489_v15  ;;  %v4427_v44 = vshll.u32 %v8086_v49, 16  ;;  %6302 = vmatmul.mubr.msk.bf16.vlgmr.msra.gmra.mrb[0].mxu1 %vm1268_vm8, %v5699_v54  ;;  %v6869_v32 = vld [vmem:[#allocation2 + $0x40] sm:$0xf] }
 0x164   : > { %v4400_v20 = vor.u32 %v4399_v22, %v4396_v14  ;;  %v4410_v59 = vor.u32 %v4409_v45, %v4405_v1  ;;  %v4413_v48 = vshll.u32 %v8493_v10, 16  ;;  %v5905_v41 = vcombine.low %v4334_v4, %v4344_v60  ;;  %6504 = vmatpush3.bf16.msra.mxu1 %v9105_v37  ;;  %6305 = vmatprep.mubr.msk.bf16.mxu1 %vm1268_vm8, %v5700_v42  ;;  %v6870_v45 = vld [vmem:[#allocation2 + $0x1c] sm:$0xf]  ;;  %v9106_v4 = vld [vmem:[#allocation13_spill] sm:$0xff]  ;;  %v6877_v37 = vld [vmem:[#allocation2 + $0x54] sm:$0xf] }
 0x165   : > { %v5906_v62 = vcombine.low %v4358_v11, %v4368_v0  ;;  %v4377_v23 = vrot.slane %v4376_v55, 4  ;;  %v4391_v21 = vrot.slane %v4389_v61, 5  ;;  %v4420_v9 = vrot.slane %v4418_v27, 4  ;;  %v8534_v61 = vld [vmem:[#allocation2 + $0x78] sm:$0xf] }
 0x166   : > { %v4387_v18 = vrot.slane %v4386_v38, 4  ;;  %v4423_v63 = vrot.slane %v4421_v52, 5  ;;  %v8514_v12 = vrot.slane %v4427_v44, 5  ;;  %v4433_v49 = vrot.slane %v4431_v29, 4  ;;  %v6874_v38 = vld [vmem:[#allocation2 + $0x48] sm:$0xf] }
 0x167   : > { %v4401_v36 = vrot.slane %v4400_v20, 4  ;;  %v4411_v26 = vrot.slane %v4410_v59, 4  ;;  %v4415_v5 = vrot.slane %v4413_v48, 5  ;;  %v5701_v40 = vcombine.low %v6866_v16, %v6867_v25  ;;  %6458 = vmatmul.mubr.msk.bf16.gmra.mrb[20].mxu0 %vm1268_vm8, %v5905_v41  ;;  %v6875_v44 = vld [vmem:[#allocation2 + $0x4c] sm:$0xf] }
 0x168   : > { %v5702_v17 = vcombine.low %v6868_v56, %v6869_v32  ;;  %v4382_v27 = vsel %vm7117_vm12, %v4377_v23, %v8489_v15  ;;  %6461 = vmatprep.mubr.msk.bf16.mxu0 %vm1268_vm8, %v5906_v62  ;;  %v4392_v3 = vsel %vm7117_vm12, %v4387_v18, %v4391_v21  ;;  %v4424_v6 = vor.u32 %v4423_v63, %v4420_v9  ;;  %v8538_v59 = vld [vmem:[#allocation2 + $0x7c] sm:$0xf]  ;;  %v6878_v62 = vld [vmem:[#allocation2 + $0x58] sm:$0xf]  ;;  %v6879_v21 = vld [vmem:[#allocation2 + $0x34] sm:$0xf] }
 0x169   : > { %v4434_v24 = vor.u32 %v4433_v49, %v8514_v12  ;;  %v4437_v13 = vshll.u32 %v8516_v34, 16  ;;  %v4406_v14 = vsel %vm7117_vm12, %v4401_v36, %v4405_v1  ;;  %v4416_v22 = vsel %vm7117_vm12, %v4411_v26, %v4415_v5  ;;  %v6872_v1 = vld [vmem:[#allocation2 + $0x28] sm:$0xf]  ;;  %v6880_v18 = vld [vmem:[#allocation2 + $0x80] sm:$0x1]  ;;  %v9107_v56 = vld [vmem:[#allocation15_spill] sm:$0xff] }
 0x16a   : > { %v4753_v52 = vrot.slane %v6870_v45, 5  ;;  %v5907_v15 = vcombine.low %v4382_v27, %v4392_v3  ;;  %v5908_v29 = vcombine.low %v4406_v14, %v4416_v22  ;;  %v4425_v46 = vrot.slane %v4424_v6, 4  ;;  %v6881_v26 = vld [vmem:[#allocation2 + $0x24] sm:$0xf]  ;;  %v6882_v3 = vld [vmem:[#allocation2 + $0x30] sm:$0xf] }
 0x16b   : > { %6306 = vmatmul.mubr.msk.bf16.gmra.mrb[4].mxu1 %vm1268_vm8, %v5701_v40  ;;  %v4435_v51 = vrot.slane %v4434_v24, 4  ;;  %v4439_v54 = vrot.slane %v4437_v13, 5  ;;  %v5927_v8 = vrot.slane %v6871_v31, 9  ;;  %v4756_v60 = vrot.slane %v9106_v4, 5  ;;  %v6885_v31 = vld [vmem:[#allocation2 + $0x40] sm:$0xf] }
 0x16c   : > { %6309 = vmatprep.mubr.msk.bf16.mxu1 %vm1268_vm8, %v5702_v17  ;;  %v4755_v42 = vrot.slane %v4753_v52, 4  ;;  %v4760_v55 = vrot.slane %v6872_v1, 5  ;;  %v2796_v11 = vshrl.u32 %v8534_v61, 16  ;;  %v2799_v0 = vshll.u32 %v8534_v61, 16  ;;  %v8573_v1 = vld [vmem:[#allocation2 + $0x84] sm:$0xf] }
 0x16d   : > { %v5703_v20 = vcombine.low %v6874_v38, %v6875_v44  ;;  %v2805_v48 = vshll.u32 %v8538_v59, 16  ;;  %v2809_v41 = vshrl.u32 %v8538_v59, 16  ;;  %v5704_v23 = vcombine.low %v6877_v37, %v6878_v62  ;;  %v6890_v38 = vld [vmem:[#allocation2 + $0x3c] sm:$0xf]  ;;  %v6892_v37 = vld [vmem:[#allocation2 + $0x58] sm:$0xf] }
 0x16e   : > { %v4767_v9 = vrot.slane %v6879_v21, 5  ;;  %v2815_v63 = vshll.u32 %v6880_v18, 16  ;;  %v4430_v49 = vsel %vm7117_vm12, %v4425_v46, %v8514_v12  ;;  %v4440_v36 = vsel %vm7117_vm12, %v4435_v51, %v4439_v54  ;;  %v6893_v18 = vld [vmem:[#allocation2 + $0x48] sm:$0xf] }
 0x16f   : > { %6462 = vmatmul.mubr.msk.bf16.gmra.mrb[24].mxu0 %vm1268_vm8, %v5907_v15  ;;  %v5928_v5 = vrot.slane %v6881_v26, 9  ;;  %v4754_v16 = vsel %vm7416_vm15, %v5927_v8, %v4753_v52  ;;  %v4757_v25 = vsel %vm7416_vm15, %v4755_v42, %v4756_v60  ;;  %v4762_v40 = vrot.slane %v4760_v55, 4  ;;  %v6883_v15 = vld [vmem:[#allocation2 + $0x60] sm:$0xf]  ;;  %v6886_v42 = vld [vmem:[#allocation2 + $0x6c] sm:$0xf] }
 0x170   : > { %6465 = vmatprep.mubr.msk.bf16.mxu0 %vm1268_vm8, %v5908_v29  ;;  %v4763_v32 = vrot.slane %v9107_v56, 5  ;;  %v8554_v17 = vrot.slane %v2796_v11, 4  ;;  %v8556_v27 = vrot.slane %v2799_v0, 5  ;;  %v5909_v12 = vcombine.low %v4430_v49, %v4440_v36  ;;  %v6884_v29 = vld [vmem:[#allocation2 + $0x64] sm:$0xf] }
 0x171   : > { %v5929_v6 = vrot.slane %v6882_v3, 9  ;;  %v4769_v24 = vrot.slane %v4767_v9, 4  ;;  %v4770_v13 = vrot.slane %v8172_v30, 5  ;;  %v8561_v14 = vrot.slane %v2805_v48, 5  ;;  %v6887_v30 = vld [vmem:[#allocation2 + $0x70] sm:$0xf] }
 0x172   : > { %v8563_v22 = vrot.slane %v2809_v41, 4  ;;  %v8565_v45 = vrot.slane %v2815_v63, 5  ;;  %v5943_v52 = vcombine.low %v4754_v16, %v4757_v25  ;;  %v5705_v46 = vcombine.low %v6883_v15, %v6884_v29  ;;  %v8575_v11 = vld [vmem:[#allocation2 + $0x88] sm:$0xf]  ;;  %v6891_v48 = vld [vmem:[#allocation2 + $0x4c] sm:$0xf] }
 0x173   : > { %6310 = vmatmul.mubr.msk.bf16.gmra.mrb[8].mxu1 %vm1268_vm8, %v5703_v20  ;;  %v4761_v51 = vsel %vm7416_vm15, %v5928_v5, %v4760_v55  ;;  %v4764_v54 = vsel %vm7416_vm15, %v4762_v40, %v4763_v32  ;;  %v4774_v8 = vrot.slane %v6885_v31, 5  ;;  %v5706_v4 = vcombine.low %v6886_v42, %v6887_v30  ;;  %v6894_v49 = vld [vmem:[#allocation2 + $0x64] sm:$0xf]  ;;  %v6895_v5 = vld [vmem:[#allocation2 + $0x70] sm:$0xf] }
 0x174   : > { %6313 = vmatprep.mubr.msk.bf16.mxu1 %vm1268_vm8, %v5704_v23  ;;  %v5707_v60 = vcombine.low %v8534_v61, %v8538_v59  ;;  %v5708_v0 = vcombine.low %v8573_v1, %v8575_v11  ;;  %v5930_v55 = vrot.slane %v6890_v38, 9  ;;  %v4768_v44 = vsel %vm7416_vm15, %v5929_v6, %v4767_v9  ;;  %v8592_v38 = vld [vmem:[#allocation2 + $0x90] sm:$0xf] }
 0x175   : > { %v4771_v20 = vsel %vm7416_vm15, %v4769_v24, %v4770_v13  ;;  %v4781_v41 = vrot.slane %v6891_v48, 5  ;;  %v4788_v62 = vrot.slane %v6892_v37, 5  ;;  %v5944_v23 = vcombine.low %v4761_v51, %v4764_v54  ;;  %v6898_v54 = vld [vmem:[#allocation2 + $0x6c] sm:$0xf] }
 0x176   : > { %v4777_v21 = vrot.slane %v8201_v50, 5  ;;  %v5931_v63 = vrot.slane %v6893_v18, 9  ;;  %v4795_v36 = vrot.slane %v6894_v49, 5  ;;  %v4776_v26 = vrot.slane %v4774_v8, 4  ;;  %v6896_v50 = vld [vmem:[#allocation2 + $0x54] sm:$0xf] }
 0x177   : > { %6466 = vmatmul.mubr.msk.bf16.gmra.mrb[28].mxu0 %vm1268_vm8, %v5909_v12  ;;  %v4802_v16 = vrot.slane %v6895_v5, 5  ;;  %v2772_v9 = vshrl.u32 %v6886_v42, 16  ;;  %v2775_v25 = vshll.u32 %v6886_v42, 16  ;;  %v5945_v40 = vcombine.low %v4768_v44, %v4771_v20  ;;  %v6901_v49 = vld [vmem:[#allocation2 + $0x74] sm:$0x1] }
 0x178   : > { %6471 = vmatprep.mubr.msk.bf16.mxu0 %vm1268_vm8, %v5943_v52  ;;  %v4784_v56 = vrot.slane %v8245_v28, 5  ;;  %v2781_v32 = vshll.u32 %v6887_v30, 16  ;;  %v2785_v12 = vshrl.u32 %v6887_v30, 16  ;;  %v4783_v3 = vrot.slane %v4781_v41, 4  ;;  %v6897_v52 = vld [vmem:[#allocation2 + $0x60] sm:$0xf] }
 0x179   : > { %v5932_v6 = vrot.slane %v6896_v50, 9  ;;  %v4790_v24 = vrot.slane %v4788_v62, 4  ;;  %v4791_v13 = vrot.slane %v8265_v57, 5  ;;  %v5933_v15 = vrot.slane %v6897_v52, 9  ;;  %v8642_v5 = vld [vmem:[#allocation2 + $0xa0] sm:$0xf] }
 0x17a   : > { %v4797_v29 = vrot.slane %v4795_v36, 4  ;;  %v4798_v51 = vrot.slane %v8304_v2, 5  ;;  %v4804_v31 = vrot.slane %v4802_v16, 4  ;;  %v4805_v28 = vrot.slane %v8338_v7, 5 }
 0x17b   : > { %6314 = vmatmul.mubr.msk.bf16.gmra.mrb[12].mxu1 %vm1268_vm8, %v5705_v46  ;;  %v5934_v46 = vrot.slane %v6898_v54, 9  ;;  %v2774_v42 = vrot.slane %v2772_v9, 4  ;;  %v2777_v30 = vrot.slane %v2775_v25, 5  ;;  %v4775_v57 = vsel %vm7416_vm15, %v5930_v55, %v4774_v8 }
 0x17c   : > { %6317 = vmatprep.mubr.msk.bf16.mxu1 %vm1268_vm8, %v5706_v4  ;;  %v8594_v4 = vld [vmem:[#allocation2 + $0x94] sm:$0xf]  ;;  %v8600_v20 = vrot.slane %v2781_v32, 5  ;;  %v2787_v2 = vrot.slane %v2785_v12, 4  ;;  %v4778_v7 = vsel %vm7416_vm15, %v4776_v26, %v4777_v21  ;;  %v4782_v48 = vsel %vm7416_vm15, %v5931_v63, %v4781_v41  ;;  %v8665_v12 = vld [vmem:[#allocation2 + $0xc0] sm:$0xf] }
 0x17d   : > { %v5709_v44 = vcombine.low %v8592_v38, %v8594_v4  ;;  %v4785_v37 = vsel %vm7416_vm15, %v4783_v3, %v4784_v56  ;;  %v8611_v18 = vsel %vm7416_vm15, %v5932_v6, %v4788_v62  ;;  %v8616_v8 = vsel %vm7416_vm15, %v4790_v24, %v4791_v13  ;;  %v8661_v56 = vld [vmem:[#allocation2 + $0xb4] sm:$0xf]  ;;  %v8667_v3 = vld [vmem:[#allocation2 + $0xc4] sm:$0xf] }
 0x17e   : > { %v8620_v55 = vsel %vm7416_vm15, %v5933_v15, %v4795_v36  ;;  %v8624_v41 = vsel %vm7416_vm15, %v4797_v29, %v4798_v51  ;;  %v8630_v62 = vsel %vm7416_vm15, %v5934_v46, %v4802_v16  ;;  %v8634_v21 = vsel %vm7416_vm15, %v4804_v31, %v4805_v28  ;;  %v8640_v36 = vld [vmem:[#allocation2 + $0x9c] sm:$0xf]  ;;  %v8648_v16 = vld [vmem:[#allocation2 + $0xa8] sm:$0xf]  ;;  %v6910_v15 = vld [vmem:[#allocation2 + $0x78] sm:$0xf] }
 0x17f   : > { %6472 = vmatmul.mubr.msk.bf16.vlgmr.msra.gmra.mrb[0].mxu0 %vm1268_vm8, %v5944_v23  ;;  %v2802_v23 = vor.u32 %v8556_v27, %v8554_v17  ;;  %v2778_v63 = vor.u32 %v2777_v30, %v2774_v42  ;;  %v2791_v26 = vshll.u32 %v6901_v49, 16  ;;  %v5710_v17 = vcombine.low %v8640_v36, %v8642_v5  ;;  %v8646_v27 = vld [vmem:[#allocation2 + $0xac] sm:$0xf]  ;;  %v6911_v51 = vld [vmem:[#allocation2 + $0x7c] sm:$0xf] }
 0x180   : > { %6475 = vmatprep.mubr.msk.bf16.mxu0 %vm1268_vm8, %v5945_v40  ;;  %v5711_v9 = vcombine.low %v8648_v16, %v8646_v27  ;;  %v2788_v25 = vor.u32 %v2787_v2, %v8600_v20  ;;  %v2812_v61 = vor.u32 %v8563_v22, %v8561_v14  ;;  %v5946_v59 = vcombine.low %v4775_v57, %v4778_v7  ;;  %v8659_v40 = vld [vmem:[#allocation2 + $0xb8] sm:$0xf]  ;;  %v6912_v42 = vld [vmem:[#allocation2 + $0x88] sm:$0xf] }
 0x181   : > { %v5712_v32 = vcombine.low %v8661_v56, %v8659_v40  ;;  %v5713_v22 = vcombine.low %v8665_v12, %v8667_v3  ;;  %v5948_v50 = vcombine.low %v8611_v18, %v8616_v8  ;;  %v5950_v6 = vcombine.low %v8630_v62, %v8634_v21  ;;  %v6913_v18 = vld [vmem:[#allocation2 + $0x84] sm:$0xf] }
 0x182   : > { %v2803_v24 = vrot.slane %v2802_v23, 4  ;;  %v2779_v13 = vrot.slane %v2778_v63, 4  ;;  %v2793_v52 = vrot.slane %v2791_v26, 5  ;;  %v5935_v29 = vrot.slane %v6910_v15, 9 }
 0x183   : > { %6318 = vmatmul.mubr.msk.bf16.gmra.mrb[16].mxu1 %vm1268_vm8, %v5707_v60  ;;  %v5947_v60 = vcombine.low %v4782_v48, %v4785_v37  ;;  %v4809_v54 = vrot.slane %v6911_v51, 5  ;;  %v2789_v46 = vrot.slane %v2788_v25, 4  ;;  %v2813_v31 = vrot.slane %v2812_v61, 4  ;;  %v6915_v51 = vld [vmem:[#allocation2 + $0x8c] sm:$0x1] }
 0x184   : > { %6321 = vmatprep.mubr.msk.bf16.mxu1 %vm1268_vm8, %v5708_v0  ;;  %v5949_v0 = vcombine.low %v8620_v55, %v8624_v41  ;;  %v4812_v28 = vrot.slane %v8348_v53, 5  ;;  %v4816_v30 = vrot.slane %v6912_v42, 5  ;;  %v2820_v57 = vshrl.u32 %v8573_v1, 16 }
 0x185   : > { %v2823_v2 = vshll.u32 %v8573_v1, 16  ;;  %v2829_v7 = vshll.u32 %v8575_v11, 16  ;;  %v2833_v48 = vshrl.u32 %v8575_v11, 16  ;;  %v2808_v37 = vsel %vm7117_vm12, %v2803_v24, %v8561_v14 }
 0x186   : > { %v5936_v53 = vrot.slane %v6913_v18, 9  ;;  %v2844_v8 = vshrl.u32 %v8592_v38, 16  ;;  %v2847_v55 = vshll.u32 %v8592_v38, 16  ;;  %v2784_v1 = vsel %vm7117_vm12, %v2779_v13, %v8600_v20 }
 0x187   : > { %6476 = vmatmul.mubr.msk.bf16.gmra.mrb[4].mxu0 %vm1268_vm8, %v5946_v59  ;;  %v4811_v41 = vrot.slane %v4809_v54, 4  ;;  %v2853_v23 = vshll.u32 %v8594_v4, 16  ;;  %v2857_v11 = vshrl.u32 %v8594_v4, 16  ;;  %v2794_v14 = vsel %vm7117_vm12, %v2789_v46, %v2793_v52 }
 0x188   : > { %6479 = vmatprep.mubr.msk.bf16.mxu0 %vm1268_vm8, %v5947_v60  ;;  %v2818_v63 = vsel %vm7117_vm12, %v2813_v31, %v8565_v45  ;;  %v4818_v49 = vrot.slane %v4816_v30, 4  ;;  %v4819_v20 = vrot.slane %v8398_v58, 5  ;;  %v2822_v26 = vrot.slane %v2820_v57, 4  ;;  %v6914_v60 = vld [vmem:[#allocation2 + $0x94] sm:$0xf] }
 0x189   : > { %v2825_v25 = vrot.slane %v2823_v2, 5  ;;  %v8705_v61 = vrot.slane %v2829_v7, 5  ;;  %v2835_v59 = vrot.slane %v2833_v48, 4  ;;  %v4810_v38 = vsel %vm7416_vm15, %v5935_v29, %v4809_v54  ;;  %v6917_v7 = vld [vmem:[#allocation2 + $0x90] sm:$0xf] }
 0x18a   : > { %v2846_v4 = vrot.slane %v2844_v8, 4  ;;  %v4823_v24 = vrot.slane %v6914_v60, 5  ;;  %v8709_v13 = vcombine.low %v2808_v37, %v2818_v63  ;;  %v4813_v45 = vsel %vm7416_vm15, %v4811_v41, %v4812_v28 }
 0x18b   : > { %6322 = vmatmul.mubr.msk.bf16.gmra.mrb[20].mxu1 %vm1268_vm8, %v5709_v44  ;;  %v2849_v44 = vrot.slane %v2847_v55, 5  ;;  %v8713_v58 = vrot.slane %v2853_v23, 5  ;;  %v8715_v52 = vcombine.low %v2784_v1, %v2794_v14  ;;  %v8719_v15 = vsel %vm7416_vm15, %v5936_v53, %v4816_v30  ;;  %v6916_v30 = vld [vmem:[#allocation2 + $0x98] sm:$0x1]  ;;  %v6918_v1 = vld [vmem:[#allocation2 + $0xa0] sm:$0xf] }
 0x18c   : > { %6325 = vmatprep.mubr.msk.bf16.mxu1 %vm1268_vm8, %v5710_v17  ;;  %v2859_v17 = vrot.slane %v2857_v11, 4  ;;  %v8723_v29 = vsel %vm7416_vm15, %v4818_v49, %v4819_v20  ;;  %v2839_v54 = vshll.u32 %v6915_v51, 16  ;;  %v2826_v46 = vor.u32 %v2825_v25, %v2822_v26  ;;  %v6919_v49 = vld [vmem:[#allocation2 + $0x9c] sm:$0xf] }
 0x18d   : > { %v2836_v31 = vor.u32 %v2835_v59, %v8705_v61  ;;  %v2868_v28 = vshrl.u32 %v8640_v36, 16  ;;  %v2871_v42 = vshll.u32 %v8640_v36, 16  ;;  %v2850_v57 = vor.u32 %v2849_v44, %v2846_v4  ;;  %v6920_v44 = vld [vmem:[#allocation2 + $0xa4] sm:$0x1] }
 0x18e   : > { %v2863_v2 = vshll.u32 %v6916_v30, 16  ;;  %v5937_v48 = vrot.slane %v6917_v7, 9  ;;  %v4825_v37 = vrot.slane %v4823_v24, 4  ;;  %v2860_v18 = vor.u32 %v2859_v17, %v8713_v58 }
 0x18f   : > { %6480 = vmatmul.mubr.msk.bf16.gmra.mrb[8].mxu0 %vm1268_vm8, %v5948_v50  ;;  %v4826_v53 = vrot.slane %v8413_v47, 5  ;;  %v2877_v50 = vshll.u32 %v8642_v5, 16  ;;  %v2881_v8 = vshrl.u32 %v8642_v5, 16  ;;  %v5951_v36 = vcombine.low %v4810_v38, %v4813_v45 }
 0x190   : > { %6483 = vmatprep.mubr.msk.bf16.mxu0 %vm1268_vm8, %v5949_v0  ;;  %v5952_v0 = vcombine.low %v8719_v15, %v8723_v29  ;;  %v2841_v55 = vrot.slane %v2839_v54, 5  ;;  %v4830_v41 = vrot.slane %v6918_v1, 5  ;;  %v2827_v47 = vrot.slane %v2826_v46, 4 }
 0x191   : > { %v2837_v23 = vrot.slane %v2836_v31, 4  ;;  %v2870_v5 = vrot.slane %v2868_v28, 4  ;;  %v2873_v11 = vrot.slane %v2871_v42, 5  ;;  %v2851_v14 = vrot.slane %v2850_v57, 4  ;;  %v6921_v31 = vld [vmem:[#allocation2 + $0xac] sm:$0xf] }
 0x192   : > { %v2865_v63 = vrot.slane %v2863_v2, 5  ;;  %v5938_v20 = vrot.slane %v6919_v49, 9  ;;  %v2861_v26 = vrot.slane %v2860_v18, 4  ;;  %v4827_v25 = vsel %vm7416_vm15, %v4825_v37, %v4826_v53  ;;  %v6922_v57 = vld [vmem:[#allocation2 + $0xb0] sm:$0x1] }
 0x193   : > { %6326 = vmatmul.mubr.msk.bf16.gmra.mrb[24].mxu1 %vm1268_vm8, %v5711_v9  ;;  %v4824_v9 = vsel %vm7416_vm15, %v5937_v48, %v4823_v24  ;;  %v8748_v59 = vrot.slane %v2877_v50, 5  ;;  %v2883_v38 = vrot.slane %v2881_v8, 4  ;;  %v4832_v4 = vrot.slane %v4830_v41, 4 }
 0x194   : > { %6329 = vmatprep.mubr.msk.bf16.mxu1 %vm1268_vm8, %v5712_v32  ;;  %v4833_v32 = vrot.slane %v8449_v33, 5  ;;  %v2887_v60 = vshll.u32 %v6920_v44, 16  ;;  %v2892_v45 = vshrl.u32 %v8648_v16, 16  ;;  %v2832_v24 = vsel %vm7117_vm12, %v2827_v47, %v8705_v61 }
 0x195   : > { %v2842_v17 = vsel %vm7117_vm12, %v2837_v23, %v2841_v55  ;;  %v2874_v51 = vor.u32 %v2873_v11, %v2870_v5  ;;  %v2895_v54 = vshll.u32 %v8648_v16, 16  ;;  %v2856_v33 = vsel %vm7117_vm12, %v2851_v14, %v8713_v58  ;;  %v6924_v5 = vld [vmem:[#allocation2 + $0xb8] sm:$0xf] }
 0x196   : > { %v5953_v46 = vcombine.low %v4824_v9, %v4827_v25  ;;  %v2901_v62 = vshll.u32 %v8646_v27, 16  ;;  %v2905_v21 = vshrl.u32 %v8646_v27, 16  ;;  %v8772_v61 = vsel %vm7416_vm15, %v5938_v20, %v4830_v41 }
 0x197   : > { %6484 = vmatmul.mubr.msk.bf16.gmra.mrb[12].mxu0 %vm1268_vm8, %v5950_v6  ;;  %v2866_v6 = vsel %vm7117_vm12, %v2861_v26, %v2865_v63  ;;  %v2884_v16 = vor.u32 %v2883_v38, %v8748_v59  ;;  %v4837_v28 = vrot.slane %v6921_v31, 5  ;;  %v8781_v58 = vsel %vm7416_vm15, %v4832_v4, %v4833_v32  ;;  %v6925_v26 = vld [vmem:[#allocation2 + $0xc4] sm:$0xf] }
 0x198   : > { %6487 = vmatprep.mubr.msk.bf16.mxu0 %vm1268_vm8, %v5951_v36  ;;  %v2889_v27 = vrot.slane %v2887_v60, 5  ;;  %v2894_v42 = vrot.slane %v2892_v45, 4  ;;  %v2911_v30 = vshll.u32 %v6922_v57, 16  ;;  %v2875_v2 = vrot.slane %v2874_v51, 4  ;;  %v6923_v36 = vld [vmem:[#allocation2 + $0xa8] sm:$0xf] }
 0x199   : > { %v2897_v7 = vrot.slane %v2895_v54, 5  ;;  %v2916_v48 = vshrl.u32 %v8661_v56, 16  ;;  %v2919_v37 = vshll.u32 %v8661_v56, 16  ;;  %v8787_v18 = vrot.slane %v2901_v62, 5 }
 0x19a   : > { %v2925_v53 = vshll.u32 %v8659_v40, 16  ;;  %v2929_v50 = vshrl.u32 %v8659_v40, 16  ;;  %v2885_v8 = vrot.slane %v2884_v16, 4  ;;  %v5939_v55 = vrot.slane %v6923_v36, 9 }
 0x19b   : > { %6330 = vmatmul.mubr.msk.bf16.gmra.mrb[28].mxu1 %vm1268_vm8, %v5713_v22  ;;  %v2907_v22 = vrot.slane %v2905_v21, 4  ;;  %v4839_v1 = vrot.slane %v4837_v28, 4  ;;  %v4840_v41 = vrot.slane %v8451_v39, 5  ;;  %v5742_v47 = vcombine.low %v2856_v33, %v2866_v6  ;;  %v6927_v33 = vld [vmem:[#allocation2 + $0xbc] sm:$0x1] }
 0x19c   : > { %6351 = vmatprep.mubr.msk.bf16.mxu1 %vm1268_vm8, %v8715_v52  ;;  %v5741_v52 = vcombine.low %v2832_v24, %v2842_v17  ;;  %v5954_v23 = vcombine.low %v8772_v61, %v8781_v58  ;;  %v4844_v56 = vrot.slane %v6924_v5, 5  ;;  %v2880_v40 = vsel %vm7117_vm12, %v2875_v2, %v8748_v59  ;;  %v6926_v59 = vld [vmem:[#allocation2 + $0xb4] sm:$0xf]  ;;  %v6928_v21 = vld [vmem:[#allocation2 + $0xc0] sm:$0xf] }
 0x19d   : > { %v8801_v11 = vrot.slane %v2911_v30, 5  ;;  %v2918_v14 = vrot.slane %v2916_v48, 4  ;;  %v2921_v39 = vrot.slane %v2919_v37, 5  ;;  %v2898_v63 = vor.u32 %v2897_v7, %v2894_v42  ;;  %v6929_v2 = vld [vmem:[#allocation2 + $0xd0] sm:$0xf] }
 0x19e   : > { %v2908_v9 = vor.u32 %v2907_v22, %v8787_v18  ;;  %v8805_v49 = vrot.slane %v2925_v53, 5  ;;  %v2931_v20 = vrot.slane %v2929_v50, 4  ;;  %v2890_v15 = vsel %vm7117_vm12, %v2885_v8, %v2889_v27  ;;  %v6930_v50 = vld [vmem:[#allocation2 + $0xc8] sm:$0x1] }
 0x19f   : > { %6488 = vmatmul.mubr.msk.bf16.gmra.mrb[16].mxu0 %vm1268_vm8, %v5952_v0  ;;  %v4838_v29 = vsel %vm7416_vm15, %v5939_v55, %v4837_v28  ;;  %v4841_v0 = vsel %vm7416_vm15, %v4839_v1, %v4840_v41  ;;  %v4851_v25 = vrot.slane %v6925_v26, 5  ;;  %v5940_v38 = vrot.slane %v6926_v59, 9  ;;  %v6931_v41 = vld [vmem:[#allocation2 + $0xcc] sm:$0xf] }
 0x1a0   : > { %6491 = vmatprep.mubr.msk.bf16.mxu0 %vm1268_vm8, %v5953_v46  ;;  %v4846_v4 = vrot.slane %v4844_v56, 4  ;;  %v4847_v32 = vrot.slane %v8487_v35, 5  ;;  %v2940_v44 = vshrl.u32 %v8665_v12, 16  ;;  %v2922_v60 = vor.u32 %v2921_v39, %v2918_v14 }
 0x1a1   : > { %v2943_v45 = vshll.u32 %v8665_v12, 16  ;;  %v2949_v24 = vshll.u32 %v8667_v3, 16  ;;  %v2953_v17 = vshrl.u32 %v8667_v3, 16  ;;  %v5743_v51 = vcombine.low %v2880_v40, %v2890_v15 }
 0x1a2   : > { %v5955_v54 = vcombine.low %v4838_v29, %v4841_v0  ;;  %v2935_v46 = vshll.u32 %v6927_v33, 16  ;;  %v2899_v62 = vrot.slane %v2898_v63, 4  ;;  %v5941_v35 = vrot.slane %v6928_v21, 9 }
 0x1a3   : > { %6352 = vmatmul.mubr.msk.bf16.vlgmr.msra.gmra.mrb[16].mxu1 %vm1268_vm8, %v8709_v13  ;;  %v2932_v13 = vor.u32 %v2931_v20, %v8805_v49  ;;  %v4853_v6 = vrot.slane %v4851_v25, 4  ;;  %v4854_v61 = vrot.slane %v8493_v10, 5  ;;  %v2909_v16 = vrot.slane %v2908_v9, 4 }
 0x1a4   : > { %6355 = vmatprep.mubr.msk.bf16.mxu1 %vm1268_vm8, %v5741_v52  ;;  %v4845_v12 = vsel %vm7416_vm15, %v5940_v38, %v4844_v56  ;;  %v4848_v31 = vsel %vm7416_vm15, %v4846_v4, %v4847_v32  ;;  %v2942_v3 = vrot.slane %v2940_v44, 4  ;;  %v2923_v28 = vrot.slane %v2922_v60, 4 }
 0x1a5   : > { %v2945_v58 = vrot.slane %v2943_v45, 5  ;;  %v2951_v27 = vrot.slane %v2949_v24, 5  ;;  %v2955_v42 = vrot.slane %v2953_v17, 4  ;;  %v2933_v57 = vrot.slane %v2932_v13, 4  ;;  %v8874_v13 = vld [vmem:[%s8995_s2] ss:$0 sm:$0xff] }
 0x1a6   : > { %v2937_v30 = vrot.slane %v2935_v46, 5  ;;  %v4858_v10 = vrot.slane %v6929_v2, 5  ;;  %v4852_v7 = vsel %vm7416_vm15, %v5941_v35, %v4851_v25  ;;  %v4855_v48 = vsel %vm7416_vm15, %v4853_v6, %v4854_v61 }
 0x1a7   : > { %6492 = vmatmul.mubr.msk.bf16.gmra.mrb[20].mxu0 %vm1268_vm8, %v5954_v23  ;;  %v2904_v37 = vsel %vm7117_vm12, %v2899_v62, %v8787_v18  ;;  %v2914_v22 = vsel %vm7117_vm12, %v2909_v16, %v8801_v11  ;;  %v5956_v53 = vcombine.low %v4845_v12, %v4848_v31  ;;  %v2959_v8 = vshll.u32 %v6930_v50, 16 }
 0x1a8   : > { %6495 = vmatprep.mubr.msk.bf16.mxu0 %vm1268_vm8, %v5955_v54  ;;  %v2928_v36 = vsel %vm7117_vm12, %v2923_v28, %v8805_v49  ;;  %v2946_v55 = vor.u32 %v2945_v58, %v2942_v3  ;;  %v2956_v1 = vor.u32 %v2955_v42, %v2951_v27  ;;  %v5942_v52 = vrot.slane %v6931_v41, 9 }
 0x1a9   : > { %v2938_v18 = vsel %vm7117_vm12, %v2933_v57, %v2937_v30  ;;  %v4860_v23 = vrot.slane %v4858_v10, 4  ;;  %v4861_v5 = vrot.slane %v8516_v34, 5  ;;  %v5744_v56 = vcombine.low %v2904_v37, %v2914_v22 }
 0x1aa   : > { %v5745_v40 = vcombine.low %v2928_v36, %v2938_v18  ;;  %v2947_v11 = vrot.slane %v2946_v55, 4  ;;  %v2957_v14 = vrot.slane %v2956_v1, 4  ;;  %v2961_v39 = vrot.slane %v2959_v8, 5 }
 0x1ab   : > { %6356 = vmatmul.mubr.msk.bf16.gmra.mrb[20].mxu1 %vm1268_vm8, %v5742_v47  ;;  %v5957_v47 = vcombine.low %v4852_v7, %v4855_v48  ;;  %v4859_v63 = vsel %vm7416_vm15, %v5942_v52, %v4858_v10  ;;  %v4862_v9 = vsel %vm7416_vm15, %v4860_v23, %v4861_v5 }
 0x1ac   : > { %6359 = vmatprep.mubr.msk.bf16.mxu1 %vm1268_vm8, %v5743_v51  ;;  %v2952_v34 = vsel %vm7117_vm12, %v2947_v11, %v2951_v27  ;;  %v2962_v49 = vsel %vm7117_vm12, %v2957_v14, %v2961_v39  ;;  %v5958_v20 = vcombine.low %v4859_v63, %v4862_v9 }
 0x1ad   : > { %v5746_v15 = vcombine.low %v2952_v34, %v2962_v49 }
 0x1af   : > { %6496 = vmatmul.mubr.msk.bf16.gmra.mrb[24].mxu0 %vm1268_vm8, %v5956_v53 }
 0x1b0   : > { %6499 = vmatprep.mubr.msk.bf16.mxu0 %vm1268_vm8, %v5957_v47 }
 0x1b3   : > { %6360 = vmatmul.mubr.msk.bf16.gmra.mrb[24].mxu1 %vm1268_vm8, %v5744_v56 }
 0x1b4   : > { %6363 = vmatprep.mubr.msk.bf16.mxu1 %vm1268_vm8, %v5745_v40 }
 0x1b7   : > { %6500 = vmatmul.mubr.msk.bf16.gmra.mrb[28].mxu0 %vm1268_vm8, %v5958_v20 }
 0x1bb   : > { %6364 = vmatmul.mubr.msk.bf16.gmra.mrb[28].mxu1 %vm1268_vm8, %v5746_v15 }
 0x236   : > { %v6303_v29 = vpop.f32.mrb[0].mxu1 }
 0x237   : > { %v2418_v0 = vpop.f32.mrb[1].mxu1 }
 0x238   : > { %v6304_v19 = vpop.f32.mrb[2].mxu1 }
 0x239   : > { %v2421_v26 = vpop.f32.mrb[3].mxu1 }
 0x23e   : > { %v6307_v25 = vpop.f32.mrb[4].mxu1 }
 0x23f   : > { %v2434_v59 = vpop.f32.mrb[5].mxu1 }
 0x240   : > { %v6308_v38 = vpop.f32.mrb[6].mxu1 }
 0x241   : > { %v2437_v4 = vpop.f32.mrb[7].mxu1 }
 0x246   : > { %v6311_v32 = vpop.f32.mrb[8].mxu1 }
 0x247   : > { %v2450_v44 = vpop.f32.mrb[9].mxu1 }
 0x248   : > { %v6312_v60 = vpop.f32.mrb[10].mxu1 }
 0x249   : > { %v8861_v45 = vpop.f32.mrb[11].mxu1 }
 0x24e   : > { %v8863_v43 = vpop.f32.mrb[12].mxu1 }
 0x24f   : > { %v8865_v24 = vpop.f32.mrb[13].mxu1 }
 0x250   : > { %v8867_v17 = vpop.f32.mrb[14].mxu1 }
 0x251   : > { %v8869_v51 = vpop.f32.mrb[15].mxu1 }
 0x252   : > { %v6473_v54 = vpop.f32.mrb[0].mxu0 }
 0x253   : > { %v6505_v33 = vadd.f32 %v6473_v54, %v6303_v29  ;;  %v4996_v46 = vpop.f32.mrb[1].mxu0 }
 0x254   : > { %v6506_v62 = vadd.f32 %v4996_v46, %v2418_v0  ;;  %v6474_v21 = vpop.f32.mrb[2].mxu0 }
 0x255   : > { %v5164_v35 = vadd.f32 %v6505_v33, %v8874_v13  ;;  %v6507_v6 = vadd.f32 %v6474_v21, %v6304_v19  ;;  %v4999_v61 = vpop.f32.mrb[3].mxu0 }
 0x256   : > { %v5162_v16 = vadd.f32 %v6506_v62, %v8874_v13  ;;  %v6508_v12 = vadd.f32 %v4999_v61, %v2421_v26 }
 0x257   : > { %v5196_v31 = vmax.f32 %v5164_v35, 0.0  ;;  %v5165_v3 = vadd.f32 %v6507_v6, %v8874_v13 }
 0x258   : > { %v5194_v28 = vmax.f32 %v5162_v16, 0.0  ;;  %v5163_v58 = vadd.f32 %v6508_v12, %v8874_v13 }
 0x259   : > { %v6014_v27 = vpack.c.bf16 %v5196_v31, %v5196_v31  ;;  %v5197_v42 = vmax.f32 %v5165_v3, 0.0 }
 0x25a   : > { %v6012_v57 = vpack.c.bf16 %v5194_v28, %v5194_v28  ;;  %v5195_v30 = vmax.f32 %v5163_v58, 0.0  ;;  %v6477_v2 = vpop.f32.mrb[4].mxu0 }
 0x25b   : > { %5357 = vst.msk [vmem:[%s8884_s23 + $0x8] sm:$0xf] %vm249_vm1, %v6014_v27  ;;  %v6015_v10 = vpack.c.bf16 %v5197_v42, %v5197_v42  ;;  %v6509_v7 = vadd.f32 %v6477_v2, %v6307_v25  ;;  %v5012_v48 = vpop.f32.mrb[5].mxu0 }
 0x25c   : > { %5355 = vst.msk [vmem:[%s8884_s23] sm:$0xf] %vm249_vm1, %v6012_v57  ;;  %v6013_v37 = vpack.c.bf16 %v5195_v30, %v5195_v30  ;;  %v6510_v22 = vadd.f32 %v5012_v48, %v2434_v59  ;;  %v6478_v53 = vpop.f32.mrb[6].mxu0 }
 0x25d   : > { %5358 = vst.msk [vmem:[%s8884_s23 + $0xc] sm:$0xf] %vm249_vm1, %v6015_v10  ;;  %v5168_v50 = vadd.f32 %v6509_v7, %v8874_v13  ;;  %v6511_v8 = vadd.f32 %v6478_v53, %v6308_v38  ;;  %v5015_v36 = vpop.f32.mrb[7].mxu0 }
 0x25e   : > { %5356 = vst.msk [vmem:[%s8884_s23 + $0x4] sm:$0xf] %vm249_vm1, %v6013_v37  ;;  %v5166_v55 = vadd.f32 %v6510_v22, %v8874_v13  ;;  %v6512_v1 = vadd.f32 %v5015_v36, %v2437_v4 }
 0x25f   : > { %v5200_v41 = vmax.f32 %v5168_v50, 0.0  ;;  %v5169_v52 = vadd.f32 %v6511_v8, %v8874_v13 }
 0x260   : > { %v5198_v18 = vmax.f32 %v5166_v55, 0.0  ;;  %v5167_v47 = vadd.f32 %v6512_v1, %v8874_v13 }
 0x261   : > { %v6018_v23 = vpack.c.bf16 %v5200_v41, %v5200_v41  ;;  %v5201_v5 = vmax.f32 %v5169_v52, 0.0 }
 0x262   : > { %v6016_v56 = vpack.c.bf16 %v5198_v18, %v5198_v18  ;;  %v5199_v40 = vmax.f32 %v5167_v47, 0.0  ;;  %v6481_v11 = vpop.f32.mrb[8].mxu0 }
 0x263   : > { %5361 = vst.msk [vmem:[%s8884_s23 + $0x18] sm:$0xf] %vm249_vm1, %v6018_v23  ;;  %v6019_v14 = vpack.c.bf16 %v5201_v5, %v5201_v5  ;;  %v6513_v39 = vadd.f32 %v6481_v11, %v6311_v32  ;;  %v5028_v63 = vpop.f32.mrb[9].mxu0 }
 0x264   : > { %5359 = vst.msk [vmem:[%s8884_s23 + $0x10] sm:$0xf] %vm249_vm1, %v6016_v56  ;;  %v6017_v9 = vpack.c.bf16 %v5199_v40, %v5199_v40  ;;  %v6514_v34 = vadd.f32 %v5028_v63, %v2450_v44  ;;  %v6482_v49 = vpop.f32.mrb[10].mxu0 }
 0x265   : > { %5362 = vst.msk [vmem:[%s8884_s23 + $0x1c] sm:$0xf] %vm249_vm1, %v6019_v14  ;;  %v5172_v20 = vadd.f32 %v6513_v39, %v8874_v13  ;;  %v6515_v15 = vadd.f32 %v6482_v49, %v6312_v60  ;;  %v5031_v29 = vpop.f32.mrb[11].mxu0 }
 0x266   : > { %5360 = vst.msk [vmem:[%s8884_s23 + $0x14] sm:$0xf] %vm249_vm1, %v6017_v9  ;;  %v5170_v0 = vadd.f32 %v6514_v34, %v8874_v13  ;;  %v6516_v19 = vadd.f32 %v5031_v29, %v8861_v45 }
 0x267   : > { %v5204_v26 = vmax.f32 %v5172_v20, 0.0  ;;  %v5173_v25 = vadd.f32 %v6515_v15, %v8874_v13 }
 0x268   : > { %v5202_v59 = vmax.f32 %v5170_v0, 0.0  ;;  %v5171_v38 = vadd.f32 %v6516_v19, %v8874_v13 }
 0x269   : > { %v6022_v4 = vpack.c.bf16 %v5204_v26, %v5204_v26  ;;  %v5205_v32 = vmax.f32 %v5173_v25, 0.0 }
 0x26a   : > { %v6020_v44 = vpack.c.bf16 %v5202_v59, %v5202_v59  ;;  %v5203_v60 = vmax.f32 %v5171_v38, 0.0  ;;  %v6485_v54 = vpop.f32.mrb[12].mxu0 }
 0x26b   : > { %5365 = vst.msk [vmem:[%s8884_s23 + $0x28] sm:$0xf] %vm249_vm1, %v6022_v4  ;;  %v6023_v33 = vpack.c.bf16 %v5205_v32, %v5205_v32  ;;  %v6517_v46 = vadd.f32 %v6485_v54, %v8863_v43  ;;  %v5044_v62 = vpop.f32.mrb[13].mxu0 }
 0x26c   : > { %5363 = vst.msk [vmem:[%s8884_s23 + $0x20] sm:$0xf] %vm249_vm1, %v6020_v44  ;;  %v6021_v45 = vpack.c.bf16 %v5203_v60, %v5203_v60  ;;  %v6518_v21 = vadd.f32 %v5044_v62, %v8865_v24  ;;  %v6486_v35 = vpop.f32.mrb[14].mxu0 }
 0x26d   : > { %5366 = vst.msk [vmem:[%s8884_s23 + $0x2c] sm:$0xf] %vm249_vm1, %v6023_v33  ;;  %v5176_v6 = vadd.f32 %v6517_v46, %v8874_v13  ;;  %v6519_v61 = vadd.f32 %v6486_v35, %v8867_v17  ;;  %v5047_v16 = vpop.f32.mrb[15].mxu0 }
 0x26e   : > { %5364 = vst.msk [vmem:[%s8884_s23 + $0x24] sm:$0xf] %vm249_vm1, %v6021_v45  ;;  %v5174_v43 = vadd.f32 %v6518_v21, %v8874_v13  ;;  %v6520_v12 = vadd.f32 %v5047_v16, %v8869_v51 }
 0x26f   : > { %v5208_v31 = vmax.f32 %v5176_v6, 0.0  ;;  %v5177_v24 = vadd.f32 %v6519_v61, %v8874_v13 }
 0x270   : > { %v5206_v3 = vmax.f32 %v5174_v43, 0.0  ;;  %v5175_v28 = vadd.f32 %v6520_v12, %v8874_v13 }
 0x271   : > { %v6026_v58 = vpack.c.bf16 %v5208_v31, %v5208_v31  ;;  %v5209_v27 = vmax.f32 %v5177_v24, 0.0 }
 0x272   : > { %v6024_v42 = vpack.c.bf16 %v5206_v3, %v5206_v3  ;;  %v5207_v17 = vmax.f32 %v5175_v28, 0.0  ;;  %v6489_v57 = vpop.f32.mrb[16].mxu0 }
 0x273   : > { %5369 = vst.msk [vmem:[%s8884_s23 + $0x38] sm:$0xf] %vm249_vm1, %v6026_v58  ;;  %v6027_v30 = vpack.c.bf16 %v5209_v27, %v5209_v27  ;;  %v5060_v2 = vpop.f32.mrb[17].mxu0 }
 0x274   : > { %5367 = vst.msk [vmem:[%s8884_s23 + $0x30] sm:$0xf] %vm249_vm1, %v6024_v42  ;;  %v6025_v51 = vpack.c.bf16 %v5207_v17, %v5207_v17  ;;  %v6490_v10 = vpop.f32.mrb[18].mxu0 }
 0x275   : > { %5370 = vst.msk [vmem:[%s8884_s23 + $0x3c] sm:$0xf] %vm249_vm1, %v6027_v30  ;;  %v5063_v48 = vpop.f32.mrb[19].mxu0 }
 0x276   : > { %v6353_v7 = vpop.f32.mrb[16].mxu1  ;;  %5368 = vst.msk [vmem:[%s8884_s23 + $0x34] sm:$0xf] %vm249_vm1, %v6025_v51 }
 0x277   : > { %v3160_v37 = vpop.f32.mrb[17].mxu1  ;;  %v6521_v22 = vadd.f32 %v6489_v57, %v6353_v7 }
 0x278   : > { %v6354_v53 = vpop.f32.mrb[18].mxu1  ;;  %v6522_v50 = vadd.f32 %v5060_v2, %v3160_v37 }
 0x279   : > { %v5180_v8 = vadd.f32 %v6521_v22, %v8874_v13  ;;  %v3163_v36 = vpop.f32.mrb[19].mxu1  ;;  %v6523_v55 = vadd.f32 %v6490_v10, %v6354_v53 }
 0x27a   : > { %v5178_v1 = vadd.f32 %v6522_v50, %v8874_v13  ;;  %v6524_v41 = vadd.f32 %v5063_v48, %v3163_v36  ;;  %v6493_v47 = vpop.f32.mrb[20].mxu0 }
 0x27b   : > { %v5212_v52 = vmax.f32 %v5180_v8, 0.0  ;;  %v5181_v18 = vadd.f32 %v6523_v55, %v8874_v13  ;;  %v5076_v56 = vpop.f32.mrb[21].mxu0 }
 0x27c   : > { %v5210_v23 = vmax.f32 %v5178_v1, 0.0  ;;  %v5179_v5 = vadd.f32 %v6524_v41, %v8874_v13  ;;  %v6494_v14 = vpop.f32.mrb[22].mxu0 }
 0x27d   : > { %v6030_v40 = vpack.c.bf16 %v5212_v52, %v5212_v52  ;;  %v5213_v11 = vmax.f32 %v5181_v18, 0.0  ;;  %v5079_v34 = vpop.f32.mrb[23].mxu0 }
 0x27e   : > { %v6028_v39 = vpack.c.bf16 %v5210_v23, %v5210_v23  ;;  %v5211_v63 = vmax.f32 %v5179_v5, 0.0  ;;  %v6357_v9 = vpop.f32.mrb[20].mxu1 }
 0x27f   : > { %5373 = vst.msk [vmem:[%s8884_s23 + $0x48] sm:$0xf] %vm249_vm1, %v6030_v40  ;;  %v6031_v49 = vpack.c.bf16 %v5213_v11, %v5213_v11  ;;  %v3176_v20 = vpop.f32.mrb[21].mxu1  ;;  %v6525_v15 = vadd.f32 %v6493_v47, %v6357_v9 }
 0x280   : > { %5371 = vst.msk [vmem:[%s8884_s23 + $0x40] sm:$0xf] %vm249_vm1, %v6028_v39  ;;  %v6029_v29 = vpack.c.bf16 %v5211_v63, %v5211_v63  ;;  %v6358_v0 = vpop.f32.mrb[22].mxu1  ;;  %v6526_v19 = vadd.f32 %v5076_v56, %v3176_v20 }
 0x281   : > { %5374 = vst.msk [vmem:[%s8884_s23 + $0x4c] sm:$0xf] %vm249_vm1, %v6031_v49  ;;  %v5184_v26 = vadd.f32 %v6525_v15, %v8874_v13  ;;  %v3179_v25 = vpop.f32.mrb[23].mxu1  ;;  %v6527_v59 = vadd.f32 %v6494_v14, %v6358_v0 }
 0x282   : > { %5372 = vst.msk [vmem:[%s8884_s23 + $0x44] sm:$0xf] %vm249_vm1, %v6029_v29  ;;  %v5182_v38 = vadd.f32 %v6526_v19, %v8874_v13  ;;  %v6528_v4 = vadd.f32 %v5079_v34, %v3179_v25  ;;  %v6497_v60 = vpop.f32.mrb[24].mxu0 }
 0x283   : > { %v5216_v32 = vmax.f32 %v5184_v26, 0.0  ;;  %v5185_v44 = vadd.f32 %v6527_v59, %v8874_v13  ;;  %v5092_v46 = vpop.f32.mrb[25].mxu0 }
 0x284   : > { %v5214_v54 = vmax.f32 %v5182_v38, 0.0  ;;  %v5183_v33 = vadd.f32 %v6528_v4, %v8874_v13  ;;  %v6498_v21 = vpop.f32.mrb[26].mxu0 }
 0x285   : > { %v6034_v62 = vpack.c.bf16 %v5216_v32, %v5216_v32  ;;  %v5217_v45 = vmax.f32 %v5185_v44, 0.0  ;;  %v5095_v16 = vpop.f32.mrb[27].mxu0 }
 0x286   : > { %v6032_v35 = vpack.c.bf16 %v5214_v54, %v5214_v54  ;;  %v5215_v6 = vmax.f32 %v5183_v33, 0.0  ;;  %v6361_v61 = vpop.f32.mrb[24].mxu1 }
 0x287   : > { %5377 = vst.msk [vmem:[%s8884_s23 + $0x58] sm:$0xf] %vm249_vm1, %v6034_v62  ;;  %v6035_v43 = vpack.c.bf16 %v5217_v45, %v5217_v45  ;;  %v3192_v12 = vpop.f32.mrb[25].mxu1  ;;  %v6529_v31 = vadd.f32 %v6497_v60, %v6361_v61 }
 0x288   : > { %5375 = vst.msk [vmem:[%s8884_s23 + $0x50] sm:$0xf] %vm249_vm1, %v6032_v35  ;;  %v6033_v24 = vpack.c.bf16 %v5215_v6, %v5215_v6  ;;  %v6362_v3 = vpop.f32.mrb[26].mxu1  ;;  %v6530_v28 = vadd.f32 %v5092_v46, %v3192_v12 }
 0x289   : > { %5378 = vst.msk [vmem:[%s8884_s23 + $0x5c] sm:$0xf] %vm249_vm1, %v6035_v43  ;;  %v5188_v58 = vadd.f32 %v6529_v31, %v8874_v13  ;;  %v3195_v27 = vpop.f32.mrb[27].mxu1  ;;  %v6531_v42 = vadd.f32 %v6498_v21, %v6362_v3 }
 0x28a   : > { %5376 = vst.msk [vmem:[%s8884_s23 + $0x54] sm:$0xf] %vm249_vm1, %v6033_v24  ;;  %v5186_v17 = vadd.f32 %v6530_v28, %v8874_v13  ;;  %v6532_v57 = vadd.f32 %v5095_v16, %v3195_v27  ;;  %v6501_v51 = vpop.f32.mrb[28].mxu0 }
 0x28b   : > { %v5220_v30 = vmax.f32 %v5188_v58, 0.0  ;;  %v5189_v2 = vadd.f32 %v6531_v42, %v8874_v13  ;;  %v5108_v48 = vpop.f32.mrb[29].mxu0 }
 0x28c   : > { %v5218_v10 = vmax.f32 %v5186_v17, 0.0  ;;  %v5187_v7 = vadd.f32 %v6532_v57, %v8874_v13  ;;  %v6502_v53 = vpop.f32.mrb[30].mxu0 }
 0x28d   : > { %v6038_v37 = vpack.c.bf16 %v5220_v30, %v5220_v30  ;;  %v5221_v22 = vmax.f32 %v5189_v2, 0.0  ;;  %v5111_v55 = vpop.f32.mrb[31].mxu0 }
 0x28e   : > { %v6036_v50 = vpack.c.bf16 %v5218_v10, %v5218_v10  ;;  %v5219_v8 = vmax.f32 %v5187_v7, 0.0  ;;  %v6365_v36 = vpop.f32.mrb[28].mxu1 }
 0x28f   : > { %5381 = vst.msk [vmem:[%s8884_s23 + $0x68] sm:$0xf] %vm249_vm1, %v6038_v37  ;;  %v6039_v1 = vpack.c.bf16 %v5221_v22, %v5221_v22  ;;  %v3208_v41 = vpop.f32.mrb[29].mxu1  ;;  %v6533_v52 = vadd.f32 %v6501_v51, %v6365_v36 }
 0x290   : > { %5379 = vst.msk [vmem:[%s8884_s23 + $0x60] sm:$0xf] %vm249_vm1, %v6036_v50  ;;  %v6037_v18 = vpack.c.bf16 %v5219_v8, %v5219_v8  ;;  %v6366_v47 = vpop.f32.mrb[30].mxu1  ;;  %v6534_v23 = vadd.f32 %v5108_v48, %v3208_v41 }
 0x291   : > { %5382 = vst.msk [vmem:[%s8884_s23 + $0x6c] sm:$0xf] %vm249_vm1, %v6039_v1  ;;  %v5192_v5 = vadd.f32 %v6533_v52, %v8874_v13  ;;  %v3211_v56 = vpop.f32.mrb[31].mxu1  ;;  %v6535_v40 = vadd.f32 %v6502_v53, %v6366_v47 }
 0x292   : > { %5380 = vst.msk [vmem:[%s8884_s23 + $0x64] sm:$0xf] %vm249_vm1, %v6037_v18  ;;  %v5190_v11 = vadd.f32 %v6534_v23, %v8874_v13  ;;  %v6536_v14 = vadd.f32 %v5111_v55, %v3211_v56 }
 0x293   : > { %v5224_v39 = vmax.f32 %v5192_v5, 0.0  ;;  %v5193_v63 = vadd.f32 %v6535_v40, %v8874_v13 }
 0x294   : > { %v5222_v9 = vmax.f32 %v5190_v11, 0.0  ;;  %v5191_v34 = vadd.f32 %v6536_v14, %v8874_v13 }
 0x295   : > { %v6042_v49 = vpack.c.bf16 %v5224_v39, %v5224_v39  ;;  %v5225_v20 = vmax.f32 %v5193_v63, 0.0 }
 0x296   : > { %v6040_v15 = vpack.c.bf16 %v5222_v9, %v5222_v9  ;;  %v5223_v29 = vmax.f32 %v5191_v34, 0.0 }
 0x297   : > { %5385 = vst.msk [vmem:[%s8884_s23 + $0x78] sm:$0xf] %vm249_vm1, %v6042_v49  ;;  %v6043_v0 = vpack.c.bf16 %v5225_v20, %v5225_v20 }
 0x298   : > { %5383 = vst.msk [vmem:[%s8884_s23 + $0x70] sm:$0xf] %vm249_vm1, %v6040_v15  ;;  %v6041_v19 = vpack.c.bf16 %v5223_v29, %v5223_v29 }
 0x299   : > { %5386 = vst.msk [vmem:[%s8884_s23 + $0x7c] sm:$0xf] %vm249_vm1, %v6043_v0 }
 0x29a   : > { %5384 = vst.msk [vmem:[%s8884_s23 + $0x74] sm:$0xf] %vm249_vm1, %v6041_v19 }
 0x29b PF: > { %s13_s14 = sadd.s32 1, %s6954_s14   ;;  %s9108_s12 = smov %s6950_s13 }
 0x29c   : > { %p10_p5 = scmp.ge.s32.totalorder %s13_s14, 4   ;;  %s9109_s13 = smov %s9111_s15 }
 0x29e   :  { %12 = sbr.rel (!%p10_p5) target bundleno = 2 (0x2), region = 84 }

</bundles_post_ra>
